<compile_context>
chip_gen: v5e
topology: v5e:2x2
jax: 0.10.0
libtpu: 0.0.40
codegen_flags: <defaults>
</compile_context>

<pallas_src>
import functools

import jax
import jax.numpy as jnp
from jax.experimental import pallas as pl
from jax.experimental.pallas import tpu as pltpu


def _round_up(x, m):
    return (x + m - 1) // m * m


def _num_tensorcores():
    """Best-effort TensorCore count per device (v5e/v6e: 1, v7x: 2)."""
    try:
        d = jax.devices()[0]
        return max(1, int(getattr(d, "num_cores", 1) or 1))
    except Exception:
        return 1


# ----------------------------------------------------------------------------
# Kernel bodies: one token-tile of the full 3-MLP forward pass.
# ----------------------------------------------------------------------------
def _kernel_fused(hs_ref, hm_ref,
                  w_t1_ref, b_t1_ref,        # to_latent[0]
                  w_h1_ref, b_h1_ref,        # heatmap_proj[0] (K=1 -> VPU)
                  w_big_ref, b_big_ref,      # fused to_latent[2]+heatmap_proj[2]+from_latent[0]
                  w_f2_ref, b_f2_ref,        # from_latent[2]
                  out_ref, cat_ref):
    f32, bf16 = jnp.float32, jnp.bfloat16
    lp = w_t1_ref.shape[1]                   # padded latent dim (static)

    # to_latent first layer: Linear(D, Lp) + ReLU (MXU bf16, f32 accum).
    a = jnp.dot(hs_ref[...].astype(bf16), w_t1_ref[...],
                preferred_element_type=f32) + b_t1_ref[...]
    a = jnp.maximum(a, 0.0)                                        # (tn, Lp)

    # heatmap_proj first layer: K=1 matmul == broadcast outer product -> VPU.
    h = jnp.maximum(hm_ref[...] * w_h1_ref[...] + b_h1_ref[...], 0.0)  # (tn, Lp)

    # Write both halves straight into the bf16 scratch (no jnp.concatenate).
    cat_ref[:, :lp] = a.astype(bf16)
    cat_ref[:, lp:] = h.astype(bf16)

    # Fused (to_latent[2] + heatmap_proj[2] + from_latent[0]) -> ReLU.
    y = jnp.dot(cat_ref[...], w_big_ref[...],
                preferred_element_type=f32) + b_big_ref[...]       # (tn, D)
    y = jnp.maximum(y, 0.0)

    # from_latent[2]: Linear(D, D).
    y = jnp.dot(y.astype(bf16), w_f2_ref[...],
                preferred_element_type=f32) + b_f2_ref[...]
    out_ref[...] = y.astype(out_ref.dtype)


def _kernel_unfused(hs_ref, hm_ref,
                    w_t1_ref, b_t1_ref, w_h1_ref, b_h1_ref,
                    w2_ref, b2_ref, w_f1_ref, b_f1_ref, w_f2_ref, b_f2_ref,
                    out_ref, cat_ref):
    f32, bf16 = jnp.float32, jnp.bfloat16
    lp = w_t1_ref.shape[1]

    a = jnp.maximum(jnp.dot(hs_ref[...].astype(bf16), w_t1_ref[...],
                            preferred_element_type=f32) + b_t1_ref[...], 0.0)
    h = jnp.maximum(hm_ref[...] * w_h1_ref[...] + b_h1_ref[...], 0.0)

    cat_ref[:, :lp] = a.astype(bf16)
    cat_ref[:, lp:] = h.astype(bf16)

    zc = jnp.dot(cat_ref[...], w2_ref[...],
                 preferred_element_type=f32) + b2_ref[...]          # (tn, Lp)
    y = jnp.maximum(jnp.dot(zc.astype(bf16), w_f1_ref[...],
                            preferred_element_type=f32) + b_f1_ref[...], 0.0)
    y = jnp.dot(y.astype(bf16), w_f2_ref[...],
                preferred_element_type=f32) + b_f2_ref[...]
    out_ref[...] = y.astype(out_ref.dtype)


# ----------------------------------------------------------------------------
# One-time weight preparation (pad latent dim to 128 lanes, fuse layers, cast).
# Zero padding is exact: padded lanes / rows contribute nothing.
# ----------------------------------------------------------------------------
def prepare_params(p, *, fuse_from_latent=None):
    D, L = p["w_t1"].shape
    Lp = _round_up(L, 128)
    fuse = (D <= 2 * Lp) if fuse_from_latent is None else bool(fuse_from_latent)
    f32, bf16 = jnp.float32, jnp.bfloat16

    def pad_cols(a, to):
        return jnp.pad(a, ((0, 0), (0, to - a.shape[1])))

    def pad_rows(a, to):
        return jnp.pad(a, ((0, to - a.shape[0]), (0, 0)))

    w_t1 = pad_cols(p["w_t1"], Lp).astype(bf16)             # (D, Lp)
    b_t1 = pad_cols(p["b_t1"], Lp).astype(f32)              # (1, Lp)
    w_h1 = pad_cols(p["w_h1"], Lp).astype(f32)              # (1, Lp)  VPU path
    b_h1 = pad_cols(p["b_h1"], Lp).astype(f32)              # (1, Lp)

    w_t2 = pad_cols(pad_rows(p["w_t2"], Lp), Lp).astype(f32)     # (Lp, Lp)
    w_h2 = pad_cols(pad_rows(p["w_h2"], Lp), Lp).astype(f32)     # (Lp, Lp)
    w2 = jnp.concatenate([w_t2, w_h2], axis=0)                   # (2Lp, Lp) f32
    b2 = pad_cols(p["b_t2"] + p["b_h2"], Lp).astype(f32)         # (1, Lp)

    w_f1 = pad_rows(p["w_f1"], Lp).astype(f32)                   # (Lp, D)
    b_f1 = p["b_f1"].astype(f32)                                 # (1, D)
    w_f2 = p["w_f2"].astype(bf16)                                # (D, D)
    b_f2 = p["b_f2"].astype(f32)                                 # (1, D)

    if fuse:
        # zc = cat @ [W_t2; W_h2] + (b_t2+b_h2); y1 = zc @ W_f1 + b_f1 (no ReLU
        # between) -> fold:  y1 = cat @ W_big + b_big.  Products in f32, one
        # bf16 cast (avoids double bf16 rounding).
        w_big = jnp.dot(w2, w_f1, preferred_element_type=f32).astype(bf16)  # (2Lp, D)
        b_big = jnp.dot(b2, w_f1, preferred_element_type=f32) + b_f1        # (1, D)
        weights = [w_t1, b_t1, w_h1, b_h1, w_big, b_big, w_f2, b_f2]
    else:
        weights = [w_t1, b_t1, w_h1, b_h1,
                   w2.astype(bf16), b2, w_f1.astype(bf16), b_f1, w_f2, b_f2]
    return weights, Lp, fuse


# ----------------------------------------------------------------------------
# Tiling heuristics + VMEM budget.
# ----------------------------------------------------------------------------
def _choose_tile_n(N, D, num_cores):
    # Cap tile so the double-buffered f32 in/out token tiles stay ~<= 16 MiB.
    cap = (16 * 1024 * 1024) // (16 * D)
    cap = max(256, min(2048, (cap // 8) * 8))
    n8 = _round_up(N, 8)
    if num_cores >= 2:
        # Even grid length so a megacore ("parallel" axis) keeps both TCs busy.
        steps = 2 * max(1, pl.cdiv(N, 2 * cap))
        return min(cap, _round_up(pl.cdiv(N, steps), 8))
    # Single TensorCore (v5e/v6e): one full tile for small N, cap for large N.
    return min(cap, n8)


def _vmem_limit_bytes(tile_n, D, lp, out_dtype, weights):
    # (tile_n, 1) heatmap tile is laid out 128 lanes wide in VMEM.
    in_bytes = tile_n * D * 4 + tile_n * 128 * 4
    out_bytes = tile_n * D * jnp.dtype(out_dtype).itemsize
    w_bytes = sum(int(w.size) * w.dtype.itemsize for w in weights)
    cat_bytes = tile_n * 2 * lp * 2
    need = 2 * (in_bytes + out_bytes) + 2 * w_bytes + cat_bytes
    # 2x headroom for kernel intermediates / Mosaic scratch; cap well below
    # v7x's 64 MiB physical VMEM.
    return int(min(max(2 * need, 16 * 1024 * 1024), 32 * 1024 * 1024))


# ----------------------------------------------------------------------------
# Forward wrapper (expects pre-prepared weights).
# ----------------------------------------------------------------------------
def _forward(hidden_states, heatmap_values, weights, *, lp, fused,
             tile_n=None, num_cores=None, out_dtype=None):
    N, D = hidden_states.shape
    assert heatmap_values.shape == (N, 1)
    out_dtype = out_dtype or hidden_states.dtype

    if num_cores is None:
        num_cores = _num_tensorcores()
    if tile_n is None:
        tile_n = _choose_tile_n(N, D, num_cores)
    assert tile_n % 8 == 0, "tile_n must be a multiple of 8 (sublane tiling)"

    # Pad the token dim so every grid step is full-sized (sliced off at the end).
    Np = _round_up(N, tile_n)
    if Np != N:
        hidden_states = jnp.pad(hidden_states, ((0, Np - N), (0, 0)))
        heatmap_values = jnp.pad(heatmap_values, ((0, Np - N), (0, 0)))

    grid = (Np // tile_n,)
    row_map = lambda i: (i, 0)
    rep_map = lambda i: (0, 0)
    weight_specs = [pl.BlockSpec(w.shape, rep_map) for w in weights]

    kernel = _kernel_fused if fused else _kernel_unfused

    if fused:
        mm = D * lp + (2 * lp) * D + D * D
    else:
        mm = D * lp + (2 * lp) * lp + lp * D + D * D
    flops = 2 * Np * mm
    bytes_accessed = (
        hidden_states.size * hidden_states.dtype.itemsize
        + heatmap_values.size * heatmap_values.dtype.itemsize
        + Np * D * jnp.dtype(out_dtype).itemsize
        + sum(int(w.size) * w.dtype.itemsize for w in weights)
    )

    out = pl.pallas_call(
        kernel,
        out_shape=jax.ShapeDtypeStruct((Np, D), out_dtype),
        grid_spec=pltpu.PrefetchScalarGridSpec(
            num_scalar_prefetch=0,
            grid=grid,
            in_specs=[
                pl.BlockSpec((tile_n, D), row_map),    # hidden_states tile
                pl.BlockSpec((tile_n, 1), row_map),    # heatmap tile
                *weight_specs,                         # replicated weights
            ],
            out_specs=pl.BlockSpec((tile_n, D), row_map),
            scratch_shapes=[pltpu.VMEM((tile_n, 2 * lp), jnp.bfloat16)],  # cat
        ),
        compiler_params=pltpu.CompilerParams(
            dimension_semantics=("parallel",),
            vmem_limit_bytes=_vmem_limit_bytes(tile_n, D, lp, out_dtype, weights),
        ),
        cost_estimate=pl.CostEstimate(
            flops=flops, transcendentals=0, bytes_accessed=int(bytes_accessed)
        ),
    )(hidden_states, heatmap_values, *weights)

    return out if Np == N else out[:N]


def make_injector(params, *, tile_n=None, num_cores=None, out_dtype=None):
    """Prepare weights once (hoisted out of the per-call path) and return a
    jitted forward(hidden_states, heatmap_values)."""
    weights, lp, fused = prepare_params(params)
    fwd = functools.partial(_forward, lp=lp, fused=fused, tile_n=tile_n,
                            num_cores=num_cores, out_dtype=out_dtype)
    jitted = jax.jit(lambda hs, hm, ws: fwd(hs, hm, ws))
    return lambda hs, hm: jitted(hs, hm, weights)


# ----------------------------------------------------------------------------
# Deterministic synthetic init (nn.Linear fan-in init, pre-transposed to (in, out)).
# ----------------------------------------------------------------------------
def init_params(key, hidden_dim, latent_dim):
    def linear(key, fan_in, fan_out):
        kw, kb = jax.random.split(key)
        bound = 1.0 / jnp.sqrt(float(fan_in))
        w = jax.random.uniform(kw, (fan_in, fan_out), jnp.float32, -bound, bound)
        b = jax.random.uniform(kb, (1, fan_out), jnp.float32, -bound, bound)
        return w, b

    keys = jax.random.split(key, 6)
    w_t1, b_t1 = linear(keys[0], hidden_dim, latent_dim)   # to_latent[0]
    w_t2, b_t2 = linear(keys[1], latent_dim, latent_dim)   # to_latent[2]
    w_h1, b_h1 = linear(keys[2], 1, latent_dim)            # heatmap_proj[0]
    w_h2, b_h2 = linear(keys[3], latent_dim, latent_dim)   # heatmap_proj[2]
    w_f1, b_f1 = linear(keys[4], latent_dim, hidden_dim)   # from_latent[0]
    w_f2, b_f2 = linear(keys[5], hidden_dim, hidden_dim)   # from_latent[2]
    return dict(
        w_t1=w_t1, b_t1=b_t1, w_t2=w_t2, b_t2=b_t2,
        w_h1=w_h1, b_h1=b_h1, w_h2=w_h2, b_h2=b_h2,
        w_f1=w_f1, b_f1=b_f1, w_f2=w_f2, b_f2=b_f2,
    )


def reference_forward(hidden_states, heatmap_values, p):
    """Pure-JAX f32 reference mirroring the PyTorch module (unfused, unpadded)."""
    z = jnp.maximum(hidden_states @ p["w_t1"] + p["b_t1"], 0.0) @ p["w_t2"] + p["b_t2"]
    h = jnp.maximum(heatmap_values @ p["w_h1"] + p["b_h1"], 0.0) @ p["w_h2"] + p["b_h2"]
    zc = z + h
    y = jnp.maximum(zc @ p["w_f1"] + p["b_f1"], 0.0) @ p["w_f2"] + p["b_f2"]
    return y


if __name__ == "__main__":
    N, hidden_dim = 512, 256
    latent_dim = hidden_dim // 4          # module default: hidden_dim // 4

    key = jax.random.PRNGKey(0)
    k_hs, k_hm, k_p = jax.random.split(key, 3)

    hidden_states = jax.random.normal(k_hs, (N, hidden_dim), jnp.float32)
    heatmap_values = jax.random.uniform(k_hm, (N, 1), jnp.float32)
    params = init_params(k_p, hidden_dim, latent_dim)

    forward = make_injector(params)       # one-time weight prep (pad/fuse/bf16)
    out = forward(hidden_states, heatmap_values)
    out = jax.block_until_ready(out)

    ref = reference_forward(hidden_states, heatmap_values, params)
    assert out.shape == (N, hidden_dim)
    # bf16 matmul operands (f32 accumulation) -> loosened tolerance vs f32 reference.
    assert jnp.allclose(out, ref, atol=2e-2, rtol=2e-2), "Pallas output mismatch vs reference"

    print("KERNEL_OK")
</pallas_src>

<mosaic_0001>
module attributes {stable_mosaic.version = 11 : i64} {
  func.func @_kernel_fused(%arg0: i32, %arg1: memref<512x256xf32, #tpu.memory_space<vmem>>, %arg2: memref<512x1xf32, #tpu.memory_space<vmem>>, %arg3: memref<256x128xbf16, #tpu.memory_space<vmem>>, %arg4: memref<1x128xf32, #tpu.memory_space<vmem>>, %arg5: memref<1x128xf32, #tpu.memory_space<vmem>>, %arg6: memref<1x128xf32, #tpu.memory_space<vmem>>, %arg7: memref<256x256xbf16, #tpu.memory_space<vmem>>, %arg8: memref<1x256xf32, #tpu.memory_space<vmem>>, %arg9: memref<256x256xbf16, #tpu.memory_space<vmem>>, %arg10: memref<1x256xf32, #tpu.memory_space<vmem>>, %arg11: memref<512x256xf32, #tpu.memory_space<vmem>>, %arg12: memref<512x256xbf16, #tpu.memory_space<vmem>>) attributes {dimension_semantics = [#tpu.dimension_semantics<parallel>], iteration_bounds = array<i64: 1>, scalar_prefetch = 0 : i64, scratch_operands = 1 : i64, tpu.core_type = #tpu.core_type<tc>, window_params = [{transform_indices = @transform_0, window_bounds = array<i64: 512, 256>}, {transform_indices = @transform_1, window_bounds = array<i64: 512, 1>}, {pipeline_mode = #tpu.pipeline_mode<synchronous>, transform_indices = @transform_2, window_bounds = array<i64: 256, 128>}, {pipeline_mode = #tpu.pipeline_mode<synchronous>, transform_indices = @transform_3, window_bounds = array<i64: 1, 128>}, {pipeline_mode = #tpu.pipeline_mode<synchronous>, transform_indices = @transform_4, window_bounds = array<i64: 1, 128>}, {pipeline_mode = #tpu.pipeline_mode<synchronous>, transform_indices = @transform_5, window_bounds = array<i64: 1, 128>}, {pipeline_mode = #tpu.pipeline_mode<synchronous>, transform_indices = @transform_6, window_bounds = array<i64: 256, 256>}, {pipeline_mode = #tpu.pipeline_mode<synchronous>, transform_indices = @transform_7, window_bounds = array<i64: 1, 256>}, {pipeline_mode = #tpu.pipeline_mode<synchronous>, transform_indices = @transform_8, window_bounds = array<i64: 256, 256>}, {pipeline_mode = #tpu.pipeline_mode<synchronous>, transform_indices = @transform_9, window_bounds = array<i64: 1, 256>}, {transform_indices = @transform_10, window_bounds = array<i64: 512, 256>}]} {
    %c0 = arith.constant 0 : index
    %c0_0 = arith.constant 0 : index
    %0 = vector.load %arg1[%c0, %c0_0] : memref<512x256xf32, #tpu.memory_space<vmem>>, vector<512x256xf32>
    %1 = arith.truncf %0 : vector<512x256xf32> to vector<512x256xbf16>
    %c0_1 = arith.constant 0 : index
    %c0_2 = arith.constant 0 : index
    %2 = vector.load %arg3[%c0_1, %c0_2] : memref<256x128xbf16, #tpu.memory_space<vmem>>, vector<256x128xbf16>
    %cst = arith.constant dense<0.000000e+00> : vector<512x128xf32>
    %3 = tpu.matmul %1, %2, %cst {dimension_numbers = #tpu.dot_dimension_numbers<[1], [0], [0], [1], [0, 0, 1, 1], [], []>} : vector<512x256xbf16>, vector<256x128xbf16>, vector<512x128xf32> -> vector<512x128xf32>
    %c0_3 = arith.constant 0 : index
    %c0_4 = arith.constant 0 : index
    %4 = vector.load %arg4[%c0_3, %c0_4] : memref<1x128xf32, #tpu.memory_space<vmem>>, vector<1x128xf32>
    %5 = vector.broadcast %4 : vector<1x128xf32> to vector<512x128xf32>
    %6 = arith.addf %3, %5 : vector<512x128xf32>
    %cst_5 = arith.constant 0.000000e+00 : f32
    %7 = vector.broadcast %cst_5 : f32 to vector<512x128xf32>
    %8 = arith.maximumf %6, %7 : vector<512x128xf32>
    %c0_6 = arith.constant 0 : index
    %c0_7 = arith.constant 0 : index
    %9 = vector.load %arg2[%c0_6, %c0_7] : memref<512x1xf32, #tpu.memory_space<vmem>>, vector<512x1xf32>
    %c0_8 = arith.constant 0 : index
    %c0_9 = arith.constant 0 : index
    %10 = vector.load %arg5[%c0_8, %c0_9] : memref<1x128xf32, #tpu.memory_space<vmem>>, vector<1x128xf32>
    %11 = vector.broadcast %9 : vector<512x1xf32> to vector<512x128xf32>
    %12 = vector.broadcast %10 : vector<1x128xf32> to vector<512x128xf32>
    %13 = arith.mulf %11, %12 : vector<512x128xf32>
    %c0_10 = arith.constant 0 : index
    %c0_11 = arith.constant 0 : index
    %14 = vector.load %arg6[%c0_10, %c0_11] : memref<1x128xf32, #tpu.memory_space<vmem>>, vector<1x128xf32>
    %15 = vector.broadcast %14 : vector<1x128xf32> to vector<512x128xf32>
    %16 = arith.addf %13, %15 : vector<512x128xf32>
    %cst_12 = arith.constant 0.000000e+00 : f32
    %17 = vector.broadcast %cst_12 : f32 to vector<512x128xf32>
    %18 = arith.maximumf %16, %17 : vector<512x128xf32>
    %19 = arith.truncf %8 : vector<512x128xf32> to vector<512x128xbf16>
    %c0_13 = arith.constant 0 : index
    %c0_14 = arith.constant 0 : index
    %20 = vector.load %arg12[%c0_13, %c0_14] : memref<512x256xbf16, #tpu.memory_space<vmem>>, vector<512x128xbf16>
    tpu.vector_store %arg12[%c0_13, %c0_14], %19 {strides = array<i32>} : memref<512x256xbf16, #tpu.memory_space<vmem>>, vector<512x128xbf16>,
    %21 = arith.truncf %18 : vector<512x128xf32> to vector<512x128xbf16>
    %c0_15 = arith.constant 0 : index
    %c128 = arith.constant 128 : index
    %22 = vector.load %arg12[%c0_15, %c128] : memref<512x256xbf16, #tpu.memory_space<vmem>>, vector<512x128xbf16>
    tpu.vector_store %arg12[%c0_15, %c128], %21 {strides = array<i32>} : memref<512x256xbf16, #tpu.memory_space<vmem>>, vector<512x128xbf16>,
    %c0_16 = arith.constant 0 : index
    %c0_17 = arith.constant 0 : index
    %23 = vector.load %arg12[%c0_16, %c0_17] : memref<512x256xbf16, #tpu.memory_space<vmem>>, vector<512x256xbf16>
    %c0_18 = arith.constant 0 : index
    %c0_19 = arith.constant 0 : index
    %24 = vector.load %arg7[%c0_18, %c0_19] : memref<256x256xbf16, #tpu.memory_space<vmem>>, vector<256x256xbf16>
    %cst_20 = arith.constant dense<0.000000e+00> : vector<512x256xf32>
    %25 = tpu.matmul %23, %24, %cst_20 {dimension_numbers = #tpu.dot_dimension_numbers<[1], [0], [0], [1], [0, 0, 1, 1], [], []>} : vector<512x256xbf16>, vector<256x256xbf16>, vector<512x256xf32> -> vector<512x256xf32>
    %c0_21 = arith.constant 0 : index
    %c0_22 = arith.constant 0 : index
    %26 = vector.load %arg8[%c0_21, %c0_22] : memref<1x256xf32, #tpu.memory_space<vmem>>, vector<1x256xf32>
    %27 = vector.broadcast %26 : vector<1x256xf32> to vector<512x256xf32>
    %28 = arith.addf %25, %27 : vector<512x256xf32>
    %cst_23 = arith.constant 0.000000e+00 : f32
    %29 = vector.broadcast %cst_23 : f32 to vector<512x256xf32>
    %30 = arith.maximumf %28, %29 : vector<512x256xf32>
    %31 = arith.truncf %30 : vector<512x256xf32> to vector<512x256xbf16>
    %c0_24 = arith.constant 0 : index
    %c0_25 = arith.constant 0 : index
    %32 = vector.load %arg9[%c0_24, %c0_25] : memref<256x256xbf16, #tpu.memory_space<vmem>>, vector<256x256xbf16>
    %cst_26 = arith.constant dense<0.000000e+00> : vector<512x256xf32>
    %33 = tpu.matmul %31, %32, %cst_26 {dimension_numbers = #tpu.dot_dimension_numbers<[1], [0], [0], [1], [0, 0, 1, 1], [], []>} : vector<512x256xbf16>, vector<256x256xbf16>, vector<512x256xf32> -> vector<512x256xf32>
    %c0_27 = arith.constant 0 : index
    %c0_28 = arith.constant 0 : index
    %34 = vector.load %arg10[%c0_27, %c0_28] : memref<1x256xf32, #tpu.memory_space<vmem>>, vector<1x256xf32>
    %35 = vector.broadcast %34 : vector<1x256xf32> to vector<512x256xf32>
    %36 = arith.addf %33, %35 : vector<512x256xf32>
    %c0_29 = arith.constant 0 : index
    %c0_30 = arith.constant 0 : index
    %37 = vector.load %arg11[%c0_29, %c0_30] : memref<512x256xf32, #tpu.memory_space<vmem>>, vector<512x256xf32>
    tpu.vector_store %arg11[%c0_29, %c0_30], %36 {strides = array<i32>} : memref<512x256xf32, #tpu.memory_space<vmem>>, vector<512x256xf32>,
    return
  }
  func.func @transform_0(%arg0: i32) -> (i32, i32) {
    %c0_i32 = arith.constant 0 : i32
    %c0_i32_0 = arith.constant 0 : i32
    return %arg0, %c0_i32 : i32, i32
  }
  func.func @transform_1(%arg0: i32) -> (i32, i32) {
    %c0_i32 = arith.constant 0 : i32
    %c0_i32_0 = arith.constant 0 : i32
    return %arg0, %c0_i32 : i32, i32
  }
  func.func @transform_2(%arg0: i32) -> (i32, i32) {
    %c0_i32 = arith.constant 0 : i32
    %c0_i32_0 = arith.constant 0 : i32
    %c0_i32_1 = arith.constant 0 : i32
    return %c0_i32, %c0_i32_0 : i32, i32
  }
  func.func @transform_3(%arg0: i32) -> (i32, i32) {
    %c0_i32 = arith.constant 0 : i32
    %c0_i32_0 = arith.constant 0 : i32
    %c0_i32_1 = arith.constant 0 : i32
    return %c0_i32, %c0_i32_0 : i32, i32
  }
  func.func @transform_4(%arg0: i32) -> (i32, i32) {
    %c0_i32 = arith.constant 0 : i32
    %c0_i32_0 = arith.constant 0 : i32
    %c0_i32_1 = arith.constant 0 : i32
    return %c0_i32, %c0_i32_0 : i32, i32
  }
  func.func @transform_5(%arg0: i32) -> (i32, i32) {
    %c0_i32 = arith.constant 0 : i32
    %c0_i32_0 = arith.constant 0 : i32
    %c0_i32_1 = arith.constant 0 : i32
    return %c0_i32, %c0_i32_0 : i32, i32
  }
  func.func @transform_6(%arg0: i32) -> (i32, i32) {
    %c0_i32 = arith.constant 0 : i32
    %c0_i32_0 = arith.constant 0 : i32
    %c0_i32_1 = arith.constant 0 : i32
    return %c0_i32, %c0_i32_0 : i32, i32
  }
  func.func @transform_7(%arg0: i32) -> (i32, i32) {
    %c0_i32 = arith.constant 0 : i32
    %c0_i32_0 = arith.constant 0 : i32
    %c0_i32_1 = arith.constant 0 : i32
    return %c0_i32, %c0_i32_0 : i32, i32
  }
  func.func @transform_8(%arg0: i32) -> (i32, i32) {
    %c0_i32 = arith.constant 0 : i32
    %c0_i32_0 = arith.constant 0 : i32
    %c0_i32_1 = arith.constant 0 : i32
    return %c0_i32, %c0_i32_0 : i32, i32
  }
  func.func @transform_9(%arg0: i32) -> (i32, i32) {
    %c0_i32 = arith.constant 0 : i32
    %c0_i32_0 = arith.constant 0 : i32
    %c0_i32_1 = arith.constant 0 : i32
    return %c0_i32, %c0_i32_0 : i32, i32
  }
  func.func @transform_10(%arg0: i32) -> (i32, i32) {
    %c0_i32 = arith.constant 0 : i32
    %c0_i32_0 = arith.constant 0 : i32
    return %arg0, %c0_i32 : i32, i32
  }
}

</mosaic_0001>

<bundles_post_ra>
// kernel: _lambda_.1
= control target key start
LH: loop header
LB: loop body
LE: loop exit
PB: predicated region body
PF: predicated region fallthrough
CT: control target
= control target key end

     0   :  { %15 = vsyncpa [#allocation4], 0  ;;  %s6451_s0 = inlined_call_operand.hbm [shape: f32[512,256], index: 0, kind: input, shape index: {}]   ;;  %s6452_s1 = inlined_call_operand.vmem [shape: f32[512,1], index: 1, kind: input, shape index: {}]   ;;  %s6453_s2 = inlined_call_operand.hbm [shape: bf16[256,128], index: 2, kind: input, shape index: {}]   ;;  %s6454_s3 = inlined_call_operand.hbm [shape: f32[1,128], index: 3, kind: input, shape index: {}]   ;;  %s6455_s4 = inlined_call_operand.hbm [shape: f32[1,128], index: 4, kind: input, shape index: {}]   ;;  %s6456_s5 = inlined_call_operand.hbm [shape: f32[1,128], index: 5, kind: input, shape index: {}]   ;;  %s6457_s6 = inlined_call_operand.vmem [shape: bf16[256,256], index: 6, kind: input, shape index: {}]   ;;  %s6458_s7 = inlined_call_operand.vmem [shape: f32[1,256], index: 7, kind: input, shape index: {}]   ;;  %s6459_s8 = inlined_call_operand.vmem [shape: bf16[256,256], index: 8, kind: input, shape index: {}]   ;;  %s6460_s9 = inlined_call_operand.vmem [shape: f32[1,256], index: 9, kind: input, shape index: {}]   ;;  %s6461_s10 = inlined_call_operand.hbm [shape: f32[512,256], index: 10, kind: output, shape index: {}]  }
   0x1   :  { %16 = vsyncpa [#allocation7], 0 }
   0x2   :  { %17 = vsyncpa [#allocation10], 0  ;;  %s38_s15 = sshll.u32 %s6453_s2, 4  ;;  %s39_s15 = int_to_ptr.hbm [resolvable:$true] %s38_s15 }
   0x3   :  { %18 = vsyncpa [#allocation5], 0  ;;  %s5055_s16 = smov [#allocation6]   ;;  %s63_s20 = sshll.u32 %s6455_s4, 4  ;;  %s64_s20 = int_to_ptr.hbm [resolvable:$true] %s63_s20 }
   0x4   :  { %s40_s17 = sshll.u32 %s5055_s16, 4  ;;  %s5056_s21 = smov 64   ;;  %s41_s17 = int_to_ptr.vmem [resolvable:$true] %s40_s17 }
   0x5   :  { %s5057_s22 = smov 4   ;;  %s5058_s23 = smov [#allocation9]  }
   0x6   :  { %46 = dma.hbm_to_vmem [thread:$0]  %s39_s15, 2048, %s41_s17, [#allocation7], %s5056_s21, %s5056_s21, %s5057_s22  }
   0x7   :  { %s65_s24 = sshll.u32 %s5058_s23, 4  ;;  %s23_s27 = sshll.u32 %s6451_s0, 4  ;;  %s66_s24 = int_to_ptr.vmem [resolvable:$true] %s65_s24  ;;  %s24_s27 = int_to_ptr.hbm [resolvable:$true] %s23_s27 }
   0x8   :  { %68 = dma.hbm_to_vmem [thread:$0]  %s64_s20, 16, %s66_s24, [#allocation10]  }
   0x9   :  { %s5059_s2 = smov [#allocation3]   ;;  %s52_s4 = sshll.u32 %s6454_s3, 4  ;;  %s53_s4 = int_to_ptr.hbm [resolvable:$true] %s52_s4 }
   0xa   :  { %s25_s28 = sshll.u32 %s5059_s2, 4  ;;  %s5060_s11 = smov 256   ;;  %s26_s28 = int_to_ptr.vmem [resolvable:$true] %s25_s28 }
   0xb   :  { %s5061_s12 = smov 16   ;;  %s5062_s13 = smov [#allocation8]  }
   0xc   :  { %31 = dma.hbm_to_vmem [thread:$0]  %s24_s27, 16384, %s26_s28, [#allocation4], %s5060_s11, %s5060_s11, %s5061_s12  }
   0xd   :  { %s54_s14 = sshll.u32 %s5062_s13, 4  ;;  %s74_s16 = sshll.u32 %s6456_s5, 4  ;;  %s55_s14 = int_to_ptr.vmem [resolvable:$true] %s54_s14  ;;  %s75_s16 = int_to_ptr.hbm [resolvable:$true] %s74_s16 }
   0xe   :  { %57 = dma.hbm_to_vmem [thread:$0]  %s53_s4, 16, %s55_s14, [#allocation7]  }
   0xf   :  { %s5063_s17 = smov [#allocation11]  }
  0x10   :  { %s76_s18 = sshll.u32 %s5063_s17, 4  ;;  %s77_s18 = int_to_ptr.vmem [resolvable:$true] %s76_s18 }
  0x11   :  { %79 = dma.hbm_to_vmem [thread:$0]  %s75_s16, 16, %s77_s18, [#allocation10]  }
  0x12   :  { %5047 = dma.done.wait [#allocation4], 16384  }
  0x13   :  { %5048 = vsyncadd [#allocation4], 4294950912 }
  0x14   :  { %5049 = dma.done.wait [#allocation7], 2064  }
  0x15   :  { %5050 = vsyncadd [#allocation7], 4294965232 }
  0x16   :  { %5051 = dma.done.wait [#allocation10], 32  }
  0x17   :  { %5052 = vsyncadd [#allocation10], 4294967264  ;;  %v5064_v0 = vmov 0   ;;  %v836_v1 = vld [vmem:[%s6452_s1 + $0x10] sm:$0xff]  ;;  %v834_v2 = vld [vmem:[%s6452_s1] sm:$0xff] }
  0x18   :  { %4895 = vset.pattern.permute.xlu1 %v5064_v0  ;;  %4894 = vset.pattern.permute.xlu0 %v5064_v0  ;;  %v4730_v3 = vld [vmem:[#allocation6 + $0x38] sm:$0xff]  ;;  %v4729_v5 = vld [vmem:[#allocation6 + $0x30] sm:$0xff]  ;;  %v835_v8 = vld [vmem:[%s6452_s1 + $0x8] sm:$0xff] }
  0x19   :  { %4896 = vset.pattern.permute.xlu2 %v5064_v0  ;;  %911 = vperm.xlu1 %4895, %v836_v1   ;;  %v4738_v4 = vld [vmem:[#allocation6 + $0x78] sm:$0xff]  ;;  %v4737_v6 = vld [vmem:[#allocation6 + $0x70] sm:$0xff]  ;;  %v4728_v9 = vld [vmem:[#allocation6 + $0x28] sm:$0xff] }
  0x1a   :  { %901 = vperm.xlu0 %4894, %v834_v2   ;;  %432 = vmatpush.bf16.msra.mxu0 %v4730_v3  ;;  %v837_v7 = vld [vmem:[%s6452_s1 + $0x18] sm:$0xff]  ;;  %v4736_v10 = vld [vmem:[#allocation6 + $0x68] sm:$0xff]  ;;  %v838_v11 = vld [vmem:[%s6452_s1 + $0x20] sm:$0xff] }
  0x1b   :  { %4867 = vmatpush.bf16.msra.mxu2 %v4730_v3  ;;  %601 = vmatpush.bf16.msra.mxu1 %v4738_v4  ;;  %v4727_v12 = vld [vmem:[#allocation6 + $0x20] sm:$0xff]  ;;  %v841_v14 = vld [vmem:[%s6452_s1 + $0x38] sm:$0xff]  ;;  %v840_v15 = vld [vmem:[%s6452_s1 + $0x30] sm:$0xff] }
  0x1c   :  { %4875 = vmatpush.bf16.msra.mxu3 %v4738_v4  ;;  %v4735_v13 = vld [vmem:[#allocation6 + $0x60] sm:$0xff]  ;;  %921 = vperm.xlu2 %4896, %v838_v11   ;;  %v4726_v16 = vld [vmem:[#allocation6 + $0x18] sm:$0xff]  ;;  %v839_v18 = vld [vmem:[%s6452_s1 + $0x28] sm:$0xff] }
  0x1d   :  { %v4734_v17 = vld [vmem:[#allocation6 + $0x58] sm:$0xff]  ;;  %v4725_v19 = vld [vmem:[#allocation6 + $0x10] sm:$0xff]  ;;  %v843_v22 = vld [vmem:[%s6452_s1 + $0x48] sm:$0xff] }
  0x1e   :  { %433 = vmatpush.bf16.msra.mxu0 %v4729_v5  ;;  %v4733_v20 = vld [vmem:[#allocation6 + $0x50] sm:$0xff]  ;;  %v4724_v23 = vld [vmem:[#allocation6 + $0x8] sm:$0xff]  ;;  %v4723_v25 = vld [vmem:[#allocation6] sm:$0xff] }
  0x1f   :  { %4868 = vmatpush.bf16.msra.mxu2 %v4729_v5  ;;  %602 = vmatpush.bf16.msra.mxu1 %v4737_v6  ;;  %v844_v21 = vld [vmem:[%s6452_s1 + $0x50] sm:$0xff]  ;;  %v4732_v24 = vld [vmem:[#allocation6 + $0x48] sm:$0xff]  ;;  %v4818_v27 = vld [vmem:[%s6457_s6 + $0x74] sm:$0xf0] }
  0x20   :  { %4876 = vmatpush.bf16.msra.mxu3 %v4737_v6  ;;  %v4525_v26 = vld [vmem:[%s6457_s6 + $0x70] sm:$0xf]  ;;  %v4731_v28 = vld [vmem:[#allocation6 + $0x40] sm:$0xff]  ;;  %v4834_v30 = vld [vmem:[%s6457_s6 + $0xf4] sm:$0xf0] }
  0x21   :  { %916 = vperm.xlu1 %4895, %v837_v7   ;;  %v4589_v29 = vld [vmem:[%s6457_s6 + $0xf0] sm:$0xf]  ;;  %v842_v31 = vld [vmem:[%s6452_s1 + $0x40] sm:$0xff]  ;;  %v109_v36 = vld [vmem:[#allocation3 + $0x8] sm:$0xff]  ;;  %v4526_v40 = vor.u32 %v4818_v27, %v4525_v26 }
  0x22   :  { %906 = vperm.xlu0 %4894, %v835_v8   ;;  %434 = vmatpush.bf16.msra.mxu0 %v4728_v9  ;;  %v108_v32 = vld [vmem:[#allocation3] sm:$0xff]  ;;  %v110_v33 = vld [vmem:[#allocation3 + $0x10] sm:$0xff]  ;;  %v111_v37 = vld [vmem:[#allocation3 + $0x18] sm:$0xff]  ;;  %v4590_v41 = vor.u32 %v4834_v30, %v4589_v29 }
  0x23   :  { %4869 = vmatpush.bf16.msra.mxu2 %v4728_v9  ;;  %603 = vmatpush.bf16.msra.mxu1 %v4736_v10  ;;  %v172_v34 = vld [vmem:[#allocation3 + $0x200] sm:$0xff]  ;;  %v174_v35 = vld [vmem:[#allocation3 + $0x210] sm:$0xff]  ;;  %v173_v38 = vld [vmem:[#allocation3 + $0x208] sm:$0xff]  ;;  %v236_v48 = vpack.c.bf16 %v110_v33, %v108_v32  ;;  %v237_v50 = vpack.c.bf16 %v111_v37, %v109_v36 }
  0x24   :  { %4877 = vmatpush.bf16.msra.mxu3 %v4736_v10  ;;  %926 = vperm.xlu2 %4896, %v839_v18   ;;  %v175_v39 = vld [vmem:[#allocation3 + $0x218] sm:$0xff]  ;;  %v4817_v42 = vld [vmem:[%s6457_s6 + $0x74] sm:$0xf]  ;;  %v847_v46 = vld [vmem:[%s6452_s1 + $0x68] sm:$0xff]  ;;  %v268_v49 = vpack.c.bf16 %v174_v35, %v172_v34 }
  0x25   :  { %v4527_v43 = vld [vmem:[%s6457_s6 + $0x78] sm:$0xf0]  ;;  %v4833_v44 = vld [vmem:[%s6457_s6 + $0xf4] sm:$0xf]  ;;  %v846_v47 = vld [vmem:[%s6452_s1 + $0x60] sm:$0xff]  ;;  %v269_v51 = vpack.c.bf16 %v175_v39, %v173_v38 }
  0x26   :  { %435 = vmatpush.bf16.msra.mxu0 %v4727_v12  ;;  %v4591_v45 = vld [vmem:[%s6457_s6 + $0xf8] sm:$0xf0]  ;;  %v4530_v52 = vor.u32 %v4817_v42, %v4527_v43  ;;  %v4517_v55 = vld [vmem:[%s6457_s6 + $0x60] sm:$0xf]  ;;  %v4816_v56 = vld [vmem:[%s6457_s6 + $0x64] sm:$0xf0] }
  0x27   :  { %4870 = vmatpush.bf16.msra.mxu2 %v4727_v12  ;;  %604 = vmatpush.bf16.msra.mxu1 %v4735_v13  ;;  %v4594_v53 = vor.u32 %v4833_v44, %v4591_v45  ;;  %v845_v54 = vld [vmem:[%s6452_s1 + $0x58] sm:$0xff]  ;;  %v4581_v57 = vld [vmem:[%s6457_s6 + $0xe0] sm:$0xf]  ;;  %v4518_v58 = vor.u32 %v4816_v56, %v4517_v55  ;;  %v4832_v59 = vld [vmem:[%s6457_s6 + $0xe4] sm:$0xf0] }
  0x28   :  { %4878 = vmatpush.bf16.msra.mxu3 %v4735_v13  ;;  %v4815_v60 = vld [vmem:[%s6457_s6 + $0x64] sm:$0xf]  ;;  %v4519_v61 = vld [vmem:[%s6457_s6 + $0x68] sm:$0xf0]  ;;  %v4582_v62 = vor.u32 %v4832_v59, %v4581_v57  ;;  %v849_v1 = vld [vmem:[%s6452_s1 + $0x78] sm:$0xff] }
  0x29   :  { %936 = vperm.xlu1 %4895, %v841_v14   ;;  %v4522_v63 = vor.u32 %v4815_v60, %v4519_v61  ;;  %v850_v0 = vld [vmem:[%s6452_s1 + $0x80] sm:$0xff]  ;;  %v4583_v3 = vld [vmem:[%s6457_s6 + $0xe8] sm:$0xf0]  ;;  %v114_v5 = vld [vmem:[#allocation3 + $0x30] sm:$0xff] }
  0x2a   :  { %931 = vperm.xlu0 %4894, %v840_v15   ;;  %436 = vmatpush.bf16.msra.mxu0 %v4726_v16  ;;  %v4831_v2 = vld [vmem:[%s6457_s6 + $0xe4] sm:$0xf]  ;;  %v848_v6 = vld [vmem:[%s6452_s1 + $0x70] sm:$0xff]  ;;  %v113_v10 = vld [vmem:[#allocation3 + $0x28] sm:$0xff] }
  0x2b   :  { %4871 = vmatpush.bf16.msra.mxu2 %v4726_v16  ;;  %605 = vmatpush.bf16.msra.mxu1 %v4734_v17  ;;  %v112_v4 = vld [vmem:[#allocation3 + $0x20] sm:$0xff]  ;;  %v4586_v7 = vor.u32 %v4831_v2, %v4583_v3  ;;  %v178_v9 = vld [vmem:[#allocation3 + $0x230] sm:$0xff]  ;;  %v115_v11 = vld [vmem:[#allocation3 + $0x38] sm:$0xff] }
  0x2c   :  { %4879 = vmatpush.bf16.msra.mxu3 %v4734_v17  ;;  %941 = vperm.xlu2 %4896, %v842_v31   ;;  %v176_v8 = vld [vmem:[#allocation3 + $0x220] sm:$0xff]  ;;  %v177_v12 = vld [vmem:[#allocation3 + $0x228] sm:$0xff]  ;;  %v179_v13 = vld [vmem:[#allocation3 + $0x238] sm:$0xff]  ;;  %v238_v16 = vpack.c.bf16 %v114_v5, %v112_v4  ;;  %v239_v18 = vpack.c.bf16 %v115_v11, %v113_v10 }
  0x2d   :  { %v853_v14 = vld [vmem:[%s6452_s1 + $0x98] sm:$0xff]  ;;  %v852_v15 = vld [vmem:[%s6452_s1 + $0x90] sm:$0xff]  ;;  %v270_v17 = vpack.c.bf16 %v178_v9, %v176_v8  ;;  %v180_v26 = vld [vmem:[#allocation3 + $0x240] sm:$0xff] }
  0x2e   :  { %437 = vmatpush.bf16.msra.mxu0 %v4725_v19  ;;  %v182_v27 = vld [vmem:[#allocation3 + $0x250] sm:$0xff]  ;;  %v119_v29 = vld [vmem:[#allocation3 + $0x58] sm:$0xff]  ;;  %v181_v30 = vld [vmem:[#allocation3 + $0x248] sm:$0xff] }
  0x2f   :  { %4872 = vmatpush.bf16.msra.mxu2 %v4725_v19  ;;  %606 = vmatpush.bf16.msra.mxu1 %v4733_v20  ;;  %v271_v19 = vpack.c.bf16 %v179_v13, %v177_v12  ;;  %v183_v31 = vld [vmem:[#allocation3 + $0x258] sm:$0xff]  ;;  %v859_v32 = vld [vmem:[%s6452_s1 + $0xc8] sm:$0xff]  ;;  %v858_v33 = vld [vmem:[%s6452_s1 + $0xc0] sm:$0xff]  ;;  %v272_v35 = vpack.c.bf16 %v182_v27, %v180_v26 }
  0x30   :  { %4880 = vmatpush.bf16.msra.mxu3 %v4733_v20  ;;  %v851_v20 = vld [vmem:[%s6452_s1 + $0x88] sm:$0xff]  ;;  %v273_v37 = vpack.c.bf16 %v183_v31, %v181_v30  ;;  %v857_v38 = vld [vmem:[%s6452_s1 + $0xb8] sm:$0xff]  ;;  %v4509_v39 = vld [vmem:[%s6457_s6 + $0x50] sm:$0xf] }
  0x31   :  { %951 = vperm.xlu1 %4895, %v844_v21   ;;  %v856_v21 = vld [vmem:[%s6452_s1 + $0xb0] sm:$0xff]  ;;  %v4830_v43 = vld [vmem:[%s6457_s6 + $0xd4] sm:$0xf0]  ;;  %v4511_v45 = vld [vmem:[%s6457_s6 + $0x58] sm:$0xf0] }
  0x32   :  { %946 = vperm.xlu0 %4894, %v843_v22   ;;  %438 = vmatpush.bf16.msra.mxu0 %v4724_v23  ;;  %v855_v22 = vld [vmem:[%s6452_s1 + $0xa8] sm:$0xff]  ;;  %v4813_v44 = vld [vmem:[%s6457_s6 + $0x54] sm:$0xf]  ;;  %v184_v56 = vld [vmem:[#allocation3 + $0x260] sm:$0xff] }
  0x33   :  { %4873 = vmatpush.bf16.msra.mxu2 %v4724_v23  ;;  %607 = vmatpush.bf16.msra.mxu1 %v4732_v24  ;;  %v116_v23 = vld [vmem:[#allocation3 + $0x40] sm:$0xff]  ;;  %v186_v57 = vld [vmem:[#allocation3 + $0x270] sm:$0xff]  ;;  %v123_v59 = vld [vmem:[#allocation3 + $0x78] sm:$0xff] }
  0x34   :  { %4881 = vmatpush.bf16.msra.mxu3 %v4732_v24  ;;  %956 = vperm.xlu2 %4896, %v845_v54   ;;  %v118_v24 = vld [vmem:[#allocation3 + $0x50] sm:$0xff]  ;;  %v185_v60 = vld [vmem:[#allocation3 + $0x268] sm:$0xff]  ;;  %v187_v61 = vld [vmem:[#allocation3 + $0x278] sm:$0xff] }
  0x35   :  { %v240_v34 = vpack.c.bf16 %v118_v24, %v116_v23  ;;  %v860_v54 = vld [vmem:[%s6452_s1 + $0xd0] sm:$0xff]  ;;  %v275_v3 = vpack.c.bf16 %v187_v61, %v185_v60  ;;  %v863_v4 = vld [vmem:[%s6452_s1 + $0xe8] sm:$0xff]  ;;  %v866_v9 = vld [vmem:[%s6452_s1 + $0x100] sm:$0xff] }
  0x36   :  { %439 = vmatpush.bf16.msra.mxu0 %v4723_v25  ;;  %v868_v5 = vld [vmem:[%s6452_s1 + $0x110] sm:$0xff]  ;;  %v188_v10 = vld [vmem:[#allocation3 + $0x280] sm:$0xff]  ;;  %v125_v12 = vld [vmem:[#allocation3 + $0x88] sm:$0xff] }
  0x37   :  { %4874 = vmatpush.bf16.msra.mxu2 %v4723_v25  ;;  %608 = vmatpush.bf16.msra.mxu1 %v4731_v28  ;;  %v854_v25 = vld [vmem:[%s6452_s1 + $0xa0] sm:$0xff]  ;;  %v126_v8 = vld [vmem:[#allocation3 + $0x90] sm:$0xff]  ;;  %v127_v13 = vld [vmem:[#allocation3 + $0x98] sm:$0xff] }
  0x38   :  { %4882 = vmatpush.bf16.msra.mxu3 %v4731_v28  ;;  %v117_v28 = vld [vmem:[#allocation3 + $0x48] sm:$0xff]  ;;  %v190_v11 = vld [vmem:[#allocation3 + $0x290] sm:$0xff]  ;;  %v5325_v23 = vld [vmem:[#allocation9] ss:$0 sm:$0xff] }
  0x39   :  { %966 = vperm.xlu1 %4895, %v847_v46   ;;  %440 = vmatmul.bf16.vlgmr.msra.gmra.mxu0 %v236_v48  ;;  %v241_v36 = vpack.c.bf16 %v119_v29, %v117_v28  ;;  %v862_v48 = vld [vmem:[%s6452_s1 + $0xe0] sm:$0xff]  ;;  %v873_v27 = vld [vmem:[%s6452_s1 + $0x138] sm:$0xff] }
  0x3a   :  { %961 = vperm.xlu0 %4894, %v846_v47   ;;  %520 = vmatmul.bf16.vlgmr.msra.gmra.mxu2 %v268_v49  ;;  %v4514_v47 = vor.u32 %v4813_v44, %v4511_v45  ;;  %v861_v49 = vld [vmem:[%s6452_s1 + $0xd8] sm:$0xff]  ;;  %v4501_v24 = vld [vmem:[%s6457_s6 + $0x40] sm:$0xf]  ;;  %v5339_v30 = vld [vmem:[#allocation11] ss:$0 sm:$0xff] }
  0x3b   :  { %2256 = vmatpush.bf16.msrb.mxu2 %v4526_v40  ;;  %609 = vmatmul.bf16.vlgmr.msra.gmra.mxu1 %v237_v50  ;;  %v4814_v40 = vld [vmem:[%s6457_s6 + $0x54] sm:$0xf0]  ;;  %v4829_v50 = vld [vmem:[%s6457_s6 + $0xd4] sm:$0xf]  ;;  %v874_v26 = vld [vmem:[%s6452_s1 + $0x140] sm:$0xff] }
  0x3c   :  { %2425 = vmatpush.bf16.msrb.mxu3 %v4590_v41  ;;  %2594 = vmatpush.bf16.msrb.mxu0 %v4530_v52  ;;  %v4573_v41 = vld [vmem:[%s6457_s6 + $0xd0] sm:$0xf]  ;;  %v4510_v42 = vor.u32 %v4814_v40, %v4509_v39  ;;  %v120_v52 = vld [vmem:[#allocation3 + $0x60] sm:$0xff]  ;;  %v877_v40 = vld [vmem:[%s6452_s1 + $0x158] sm:$0xff] }
  0x3d   :  { %689 = vmatmul.bf16.vlgmr.msra.gmra.mxu3 %v269_v51  ;;  %2763 = vmatpush.bf16.msrb.mxu1 %v4594_v53  ;;  %v4574_v46 = vor.u32 %v4830_v43, %v4573_v41  ;;  %v4575_v51 = vld [vmem:[%s6457_s6 + $0xd8] sm:$0xf0]  ;;  %v122_v53 = vld [vmem:[#allocation3 + $0x70] sm:$0xff]  ;;  %v193_v43 = vld [vmem:[#allocation3 + $0x2a8] sm:$0xff] }
  0x3e   :  { %971 = vperm.xlu2 %4896, %v848_v6   ;;  %v4578_v55 = vor.u32 %v4829_v50, %v4575_v51  ;;  %v867_v6 = vld [vmem:[%s6452_s1 + $0x108] sm:$0xff]  ;;  %v876_v41 = vld [vmem:[%s6452_s1 + $0x150] sm:$0xff]  ;;  %v195_v44 = vld [vmem:[#allocation3 + $0x2b8] sm:$0xff] }
  0x3f   :  { %2257 = vmatpush.bf16.msrb.mxu2 %v4518_v58  ;;  %v121_v58 = vld [vmem:[#allocation3 + $0x68] sm:$0xff] }
  0x40   :  { %2426 = vmatpush.bf16.msrb.mxu3 %v4582_v62  ;;  %2595 = vmatpush.bf16.msrb.mxu0 %v4522_v63  ;;  %v865_v62 = vld [vmem:[%s6452_s1 + $0xf8] sm:$0xff]  ;;  %v864_v63 = vld [vmem:[%s6452_s1 + $0xf0] sm:$0xff]  ;;  %v243_v2 = vpack.c.bf16 %v123_v59, %v121_v58 }
  0x41   :  { %981 = vperm.xlu1 %4895, %v850_v0   ;;  %2764 = vmatpush.bf16.msrb.mxu1 %v4586_v7  ;;  %v242_v0 = vpack.c.bf16 %v122_v53, %v120_v52  ;;  %v124_v7 = vld [vmem:[#allocation3 + $0x80] sm:$0xff]  ;;  %v4503_v53 = vld [vmem:[%s6457_s6 + $0x48] sm:$0xf0] }
  0x42   :  { %976 = vperm.xlu0 %4894, %v849_v1   ;;  %v274_v1 = vpack.c.bf16 %v186_v57, %v184_v56  ;;  %v279_v57 = vpack.c.bf16 %v195_v44, %v193_v43 }
  0x43   :  { %2258 = vmatpush.bf16.msrb.mxu2 %v4510_v42  ;;  %v131_v42 = vld [vmem:[#allocation3 + $0xb8] sm:$0xff] }
  0x44   :  { %2427 = vmatpush.bf16.msrb.mxu3 %v4574_v46  ;;  %2596 = vmatpush.bf16.msrb.mxu0 %v4514_v47  ;;  %v4565_v46 = vld [vmem:[%s6457_s6 + $0xc0] sm:$0xf]  ;;  %v4828_v47 = vld [vmem:[%s6457_s6 + $0xc4] sm:$0xf0] }
  0x45   :  { %2765 = vmatpush.bf16.msrb.mxu1 %v4578_v55  ;;  %v4566_v52 = vor.u32 %v4828_v47, %v4565_v46  ;;  %v4567_v55 = vld [vmem:[%s6457_s6 + $0xc8] sm:$0xf0] }
  0x46   :  { %986 = vperm.xlu2 %4896, %v851_v20   ;;  %v245_v20 = vpack.c.bf16 %v127_v13, %v125_v12 }
  0x48   :  { %2428 = vmatpush.bf16.msrb.mxu3 %v4566_v52 }
  0x49   :  { %996 = vperm.xlu1 %4895, %v853_v14   ;;  %445 = vmatmul.bf16.gmra.mxu0 %v238_v16  ;;  %v189_v14 = vld [vmem:[#allocation3 + $0x288] sm:$0xff] }
  0x4a   :  { %991 = vperm.xlu0 %4894, %v852_v15   ;;  %525 = vmatmul.bf16.gmra.mxu2 %v270_v17  ;;  %v191_v15 = vld [vmem:[#allocation3 + $0x298] sm:$0xff]  ;;  %v871_v16 = vld [vmem:[%s6452_s1 + $0x128] sm:$0xff]  ;;  %v870_v17 = vld [vmem:[%s6452_s1 + $0x120] sm:$0xff] }
  0x4b   :  { %614 = vmatmul.bf16.gmra.mxu1 %v239_v18  ;;  %v244_v18 = vpack.c.bf16 %v126_v8, %v124_v7  ;;  %v880_v7 = vld [vmem:[%s6452_s1 + $0x170] sm:$0xff]  ;;  %v879_v8 = vld [vmem:[%s6452_s1 + $0x168] sm:$0xff] }
  0x4d   :  { %694 = vmatmul.bf16.gmra.mxu3 %v271_v19  ;;  %v276_v19 = vpack.c.bf16 %v190_v11, %v188_v10 }
  0x4e   :  { %1001 = vperm.xlu2 %4896, %v854_v25   ;;  %v4812_v25 = vld [vmem:[%s6457_s6 + $0x44] sm:$0xf0] }
  0x4f   :  { %v4502_v29 = vor.u32 %v4812_v25, %v4501_v24  ;;  %v133_v24 = vld [vmem:[#allocation3 + $0xc8] sm:$0xff] }
  0x51   :  { %1011 = vperm.xlu1 %4895, %v856_v21   ;;  %v277_v21 = vpack.c.bf16 %v191_v15, %v189_v14  ;;  %2259 = vmatpush.bf16.msrb.mxu2 %v4502_v29  ;;  %v197_v29 = vld [vmem:[#allocation3 + $0x2c8] sm:$0xff] }
  0x52   :  { %1006 = vperm.xlu0 %4894, %v855_v22   ;;  %v869_v22 = vld [vmem:[%s6452_s1 + $0x118] sm:$0xff] }
  0x56   :  { %1016 = vperm.xlu2 %4896, %v857_v38   ;;  %v129_v38 = vld [vmem:[#allocation3 + $0xa8] sm:$0xff] }
  0x57   :  { %v247_v56 = vpack.c.bf16 %v131_v42, %v129_v38 }
  0x59   :  { %1026 = vperm.xlu1 %4895, %v859_v32   ;;  %450 = vmatmul.bf16.gmra.mxu0 %v240_v34  ;;  %v130_v34 = vld [vmem:[#allocation3 + $0xb0] sm:$0xff] }
  0x5a   :  { %1021 = vperm.xlu0 %4894, %v858_v33   ;;  %530 = vmatmul.bf16.gmra.mxu2 %v272_v35  ;;  %v128_v33 = vld [vmem:[#allocation3 + $0xa0] sm:$0xff]  ;;  %v872_v35 = vld [vmem:[%s6452_s1 + $0x130] sm:$0xff] }
  0x5b   :  { %619 = vmatmul.bf16.gmra.mxu1 %v241_v36  ;;  %v192_v36 = vld [vmem:[#allocation3 + $0x2a0] sm:$0xff] }
  0x5d   :  { %699 = vmatmul.bf16.gmra.mxu3 %v273_v37  ;;  %v194_v37 = vld [vmem:[#allocation3 + $0x2b0] sm:$0xff] }
  0x5e   :  { %1031 = vperm.xlu2 %4896, %v860_v54   ;;  %v278_v50 = vpack.c.bf16 %v194_v37, %v192_v36  ;;  %v4827_v54 = vld [vmem:[%s6457_s6 + $0xc4] sm:$0xf] }
  0x5f   :  { %v4570_v60 = vor.u32 %v4827_v54, %v4567_v55  ;;  %v882_v36 = vld [vmem:[%s6452_s1 + $0x180] sm:$0xff] }
  0x61   :  { %1041 = vperm.xlu1 %4895, %v862_v48   ;;  %v4811_v48 = vld [vmem:[%s6457_s6 + $0x44] sm:$0xf]  ;;  %2766 = vmatpush.bf16.msrb.mxu1 %v4570_v60 }
  0x62   :  { %1036 = vperm.xlu0 %4894, %v861_v49   ;;  %v246_v49 = vpack.c.bf16 %v130_v34, %v128_v33  ;;  %v4506_v59 = vor.u32 %v4811_v48, %v4503_v53  ;;  %v881_v48 = vld [vmem:[%s6452_s1 + $0x178] sm:$0xff] }
  0x64   :  { %2597 = vmatpush.bf16.msrb.mxu0 %v4506_v59 }
  0x66   :  { %1046 = vperm.xlu2 %4896, %v863_v4  }
  0x69   :  { %1056 = vperm.xlu1 %4895, %v865_v62   ;;  %455 = vmatmul.bf16.gmra.mxu0 %v242_v0  ;;  %v875_v62 = vld [vmem:[%s6452_s1 + $0x148] sm:$0xff] }
  0x6a   :  { %1051 = vperm.xlu0 %4894, %v864_v63   ;;  %535 = vmatmul.bf16.gmra.mxu2 %v274_v1 }
  0x6b   :  { %624 = vmatmul.bf16.gmra.mxu1 %v243_v2 }
  0x6d   :  { %704 = vmatmul.bf16.gmra.mxu3 %v275_v3 }
  0x6e   :  { %1061 = vperm.xlu2 %4896, %v866_v9  }
  0x71   :  { %1071 = vperm.xlu1 %4895, %v868_v5  }
  0x72   :  { %1066 = vperm.xlu0 %4894, %v867_v6  }
  0x76   :  { %1076 = vperm.xlu2 %4896, %v869_v22   ;;  %v922_v28 = vpop.permute.xlu2 %921  ;;  %v198_v22 = vld [vmem:[#allocation3 + $0x2d0] sm:$0xff] }
  0x77   :  { %v1226_v31 = vmul.f32 %v5325_v23, %v922_v28  ;;  %v135_v28 = vld [vmem:[#allocation3 + $0xd8] sm:$0xff] }
  0x79   :  { %1086 = vperm.xlu1 %4895, %v871_v16   ;;  %460 = vmatmul.bf16.gmra.mxu0 %v244_v18  ;;  %v1294_v32 = vadd.f32 %v5339_v30, %v1226_v31  ;;  %v132_v16 = vld [vmem:[#allocation3 + $0xc0] sm:$0xff]  ;;  %v199_v31 = vld [vmem:[#allocation3 + $0x2d8] sm:$0xff] }
  0x7a   :  { %1081 = vperm.xlu0 %4894, %v870_v17   ;;  %540 = vmatmul.bf16.gmra.mxu2 %v276_v19  ;;  %v134_v17 = vld [vmem:[#allocation3 + $0xd0] sm:$0xff]  ;;  %v878_v18 = vld [vmem:[%s6452_s1 + $0x160] sm:$0xff] }
  0x7b   :  { %629 = vmatmul.bf16.gmra.mxu1 %v245_v20  ;;  %v1358_v39 = vmax.f32 %v1294_v32, 0.0  ;;  %v248_v37 = vpack.c.bf16 %v134_v17, %v132_v16  ;;  %v201_v16 = vld [vmem:[#allocation3 + $0x2e8] sm:$0xff]  ;;  %v203_v17 = vld [vmem:[#allocation3 + $0x2f8] sm:$0xff] }
  0x7d   :  { %709 = vmatmul.bf16.gmra.mxu3 %v277_v21  ;;  %v1550_v45 = vpack.c.bf16 %v1358_v39, %v1358_v39  ;;  %v196_v21 = vld [vmem:[#allocation3 + $0x2c0] sm:$0xff]  ;;  %v249_v39 = vpack.c.bf16 %v135_v28, %v133_v24 }
  0x7e   :  { %1091 = vperm.xlu2 %4896, %v872_v35   ;;  %v927_v51 = vpop.permute.xlu2 %926  ;;  %v883_v35 = vld [vmem:[%s6452_s1 + $0x188] sm:$0xff]  ;;  %v280_v38 = vpack.c.bf16 %v198_v22, %v196_v21  ;;  %v4557_v21 = vld [vmem:[%s6457_s6 + $0xb0] sm:$0xf]  ;;  %v4826_v22 = vld [vmem:[%s6457_s6 + $0xb4] sm:$0xf0] }
  0x7f   :  { %1614 = vst [vmem:[#allocation2 + $0x24] sm:$0xf] %v1550_v45  ;;  %v1227_v58 = vmul.f32 %v5325_v23, %v927_v51 }
  0x81   :  { %1101 = vperm.xlu1 %4895, %v874_v26   ;;  %v1295_v61 = vadd.f32 %v5339_v30, %v1227_v58 }
  0x82   :  { %1096 = vperm.xlu0 %4894, %v873_v27  }
  0x83   :  { %v1359_v1 = vmax.f32 %v1295_v61, 0.0 }
  0x85   :  { %v1551_v4 = vpack.c.bf16 %v1359_v1, %v1359_v1  ;;  %v138_v1 = vld [vmem:[#allocation3 + $0xf0] sm:$0xff] }
  0x86   :  { %1106 = vperm.xlu2 %4896, %v875_v62   ;;  %v942_v9 = vpop.permute.xlu2 %941 }
  0x87   :  { %1615 = vst [vmem:[#allocation2 + $0x2c] sm:$0xf] %v1551_v4  ;;  %v1230_v10 = vmul.f32 %v5325_v23, %v942_v9 }
  0x89   :  { %1116 = vperm.xlu1 %4895, %v877_v40   ;;  %465 = vmatmul.bf16.gmra.mxu0 %v246_v49  ;;  %v1298_v13 = vadd.f32 %v5339_v30, %v1230_v10  ;;  %v281_v40 = vpack.c.bf16 %v199_v31, %v197_v29  ;;  %v4558_v29 = vor.u32 %v4826_v22, %v4557_v21 }
  0x8a   :  { %1111 = vperm.xlu0 %4894, %v876_v41   ;;  %545 = vmatmul.bf16.gmra.mxu2 %v278_v50 }
  0x8b   :  { %634 = vmatmul.bf16.gmra.mxu1 %v247_v56  ;;  %v912_v63 = vpop.permute.xlu1 %911  ;;  %v1362_v25 = vmax.f32 %v1298_v13, 0.0  ;;  %v886_v56 = vld [vmem:[%s6452_s1 + $0x1a0] sm:$0xff]  ;;  %2429 = vmatpush.bf16.msrb.mxu3 %v4558_v29 }
  0x8c   :  { %v902_v0 = vpop.permute.xlu0 %901  ;;  %v1224_v2 = vmul.f32 %v5325_v23, %v912_v63  ;;  %v4493_v63 = vld [vmem:[%s6457_s6 + $0x30] sm:$0xf] }
  0x8d   :  { %714 = vmatmul.bf16.gmra.mxu3 %v279_v57  ;;  %v1222_v3 = vmul.f32 %v5325_v23, %v902_v0  ;;  %v1554_v32 = vpack.c.bf16 %v1362_v25, %v1362_v25  ;;  %v885_v57 = vld [vmem:[%s6452_s1 + $0x198] sm:$0xff]  ;;  %v136_v0 = vld [vmem:[#allocation3 + $0xe0] sm:$0xff] }
  0x8e   :  { %v1292_v5 = vadd.f32 %v5339_v30, %v1224_v2  ;;  %1121 = vperm.xlu2 %4896, %v878_v18   ;;  %v957_v41 = vpop.permute.xlu2 %956  ;;  %v4810_v2 = vld [vmem:[%s6457_s6 + $0x34] sm:$0xf0] }
  0x8f   :  { %v1290_v6 = vadd.f32 %v5339_v30, %v1222_v3  ;;  %1618 = vst [vmem:[#allocation2 + $0x44] sm:$0xf] %v1554_v32  ;;  %v1233_v44 = vmul.f32 %v5325_v23, %v957_v41  ;;  %v4494_v9 = vor.u32 %v4810_v2, %v4493_v63  ;;  %v283_v32 = vpack.c.bf16 %v203_v17, %v201_v16  ;;  %v206_v2 = vld [vmem:[#allocation3 + $0x310] sm:$0xff] }
  0x90   :  { %v1356_v11 = vmax.f32 %v1292_v5, 0.0  ;;  %v200_v5 = vld [vmem:[#allocation3 + $0x2e0] sm:$0xff] }
  0x91   :  { %v1354_v12 = vmax.f32 %v1290_v6, 0.0  ;;  %1131 = vperm.xlu1 %4895, %v880_v7   ;;  %v1301_v47 = vadd.f32 %v5339_v30, %v1233_v44  ;;  %v202_v6 = vld [vmem:[#allocation3 + $0x2f0] sm:$0xff]  ;;  %2260 = vmatpush.bf16.msrb.mxu2 %v4494_v9  ;;  %v887_v44 = vld [vmem:[%s6452_s1 + $0x1a8] sm:$0xff] }
  0x92   :  { %1126 = vperm.xlu0 %4894, %v879_v8   ;;  %v1548_v14 = vpack.c.bf16 %v1356_v11, %v1356_v11  ;;  %v884_v8 = vld [vmem:[%s6452_s1 + $0x190] sm:$0xff]  ;;  %v205_v9 = vld [vmem:[#allocation3 + $0x308] sm:$0xff] }
  0x93   :  { %v1546_v15 = vpack.c.bf16 %v1354_v12, %v1354_v12  ;;  %v917_v19 = vpop.permute.xlu1 %916  ;;  %v1365_v53 = vmax.f32 %v1301_v47, 0.0  ;;  %v137_v12 = vld [vmem:[#allocation3 + $0xe8] sm:$0xff] }
  0x94   :  { %v907_v20 = vpop.permute.xlu0 %906  ;;  %1612 = vst [vmem:[#allocation2 + $0x14] sm:$0xf] %v1548_v14  ;;  %v1225_v26 = vmul.f32 %v5325_v23, %v917_v19  ;;  %v250_v19 = vpack.c.bf16 %v138_v1, %v136_v0  ;;  %v204_v1 = vld [vmem:[#allocation3 + $0x300] sm:$0xff] }
  0x95   :  { %v1223_v27 = vmul.f32 %v5325_v23, %v907_v20  ;;  %1610 = vst [vmem:[#allocation2 + $0x4] sm:$0xf] %v1546_v15  ;;  %v1557_v58 = vpack.c.bf16 %v1365_v53, %v1365_v53  ;;  %v139_v15 = vld [vmem:[#allocation3 + $0xf8] sm:$0xff]  ;;  %v282_v20 = vpack.c.bf16 %v202_v6, %v200_v5 }
  0x96   :  { %v1293_v33 = vadd.f32 %v5339_v30, %v1225_v26  ;;  %1136 = vperm.xlu2 %4896, %v881_v48   ;;  %v889_v26 = vld [vmem:[%s6452_s1 + $0x1b8] sm:$0xff]  ;;  %v251_v31 = vpack.c.bf16 %v139_v15, %v137_v12  ;;  %v5476_v12 = vld [vmem:[#allocation8] ss:$0 sm:$0xff] }
  0x97   :  { %v1291_v34 = vadd.f32 %v5339_v30, %v1223_v27  ;;  %1621 = vst [vmem:[#allocation2 + $0x5c] sm:$0xf] %v1557_v58  ;;  %v888_v27 = vld [vmem:[%s6452_s1 + $0x1b0] sm:$0xff] }
  0x98   :  { %v1357_v42 = vmax.f32 %v1293_v33, 0.0  ;;  %v972_v59 = vpop.permute.xlu2 %971 }
  0x99   :  { %v1355_v43 = vmax.f32 %v1291_v34, 0.0  ;;  %1146 = vperm.xlu1 %4895, %v883_v35   ;;  %470 = vmatmul.bf16.gmra.mxu0 %v248_v37  ;;  %v1236_v62 = vmul.f32 %v5325_v23, %v972_v59  ;;  %v4809_v37 = vld [vmem:[%s6457_s6 + $0x34] sm:$0xf] }
  0x9a   :  { %1141 = vperm.xlu0 %4894, %v882_v36   ;;  %v1549_v45 = vpack.c.bf16 %v1357_v42, %v1357_v42  ;;  %550 = vmatmul.bf16.gmra.mxu2 %v280_v38  ;;  %v4495_v38 = vld [vmem:[%s6457_s6 + $0x38] sm:$0xf0] }
  0x9b   :  { %v1547_v46 = vpack.c.bf16 %v1355_v43, %v1355_v43  ;;  %639 = vmatmul.bf16.gmra.mxu1 %v249_v39  ;;  %v937_v49 = vpop.permute.xlu1 %936  ;;  %v1304_v7 = vadd.f32 %v5339_v30, %v1236_v62  ;;  %v4825_v39 = vld [vmem:[%s6457_s6 + $0xb4] sm:$0xf]  ;;  %v4498_v47 = vor.u32 %v4809_v37, %v4495_v38 }
  0x9c   :  { %v932_v50 = vpop.permute.xlu0 %931  ;;  %1613 = vst [vmem:[#allocation2 + $0x1c] sm:$0xf] %v1549_v45  ;;  %v1229_v51 = vmul.f32 %v5325_v23, %v937_v49  ;;  %v142_v62 = vld [vmem:[#allocation3 + $0x110] sm:$0xff] }
  0x9d   :  { %719 = vmatmul.bf16.gmra.mxu3 %v281_v40  ;;  %v1228_v52 = vmul.f32 %v5325_v23, %v932_v50  ;;  %1611 = vst [vmem:[#allocation2 + $0xc] sm:$0xf] %v1547_v46  ;;  %v1368_v18 = vmax.f32 %v1304_v7, 0.0  ;;  %v4559_v40 = vld [vmem:[%s6457_s6 + $0xb8] sm:$0xf0]  ;;  %2598 = vmatpush.bf16.msrb.mxu0 %v4498_v47  ;;  %v141_v7 = vld [vmem:[#allocation3 + $0x108] sm:$0xff] }
  0x9e   :  { %v1297_v54 = vadd.f32 %v5339_v30, %v1229_v51  ;;  %1151 = vperm.xlu2 %4896, %v884_v8   ;;  %v4562_v48 = vor.u32 %v4825_v39, %v4559_v40  ;;  %v143_v8 = vld [vmem:[#allocation3 + $0x118] sm:$0xff] }
  0x9f   :  { %v1296_v55 = vadd.f32 %v5339_v30, %v1228_v52  ;;  %v1560_v28 = vpack.c.bf16 %v1368_v18, %v1368_v18  ;;  %v895_v18 = vld [vmem:[%s6452_s1 + $0x1e8] sm:$0xff] }
  0xa0   :  { %v1361_v60 = vmax.f32 %v1297_v54, 0.0  ;;  %v987_v33 = vpop.permute.xlu2 %986  ;;  %v892_v54 = vld [vmem:[%s6452_s1 + $0x1d0] sm:$0xff]  ;;  %2767 = vmatpush.bf16.msrb.mxu1 %v4562_v48 }
  0xa1   :  { %v1360_v61 = vmax.f32 %v1296_v55, 0.0  ;;  %1161 = vperm.xlu1 %4895, %v886_v56   ;;  %1624 = vst [vmem:[#allocation2 + $0x74] sm:$0xf] %v1560_v28  ;;  %v1239_v36 = vmul.f32 %v5325_v23, %v987_v33  ;;  %v891_v55 = vld [vmem:[%s6452_s1 + $0x1c8] sm:$0xff] }
  0xa2   :  { %1156 = vperm.xlu0 %4894, %v885_v57   ;;  %v1553_v3 = vpack.c.bf16 %v1361_v60, %v1361_v60 }
  0xa3   :  { %v1552_v4 = vpack.c.bf16 %v1360_v61, %v1360_v61  ;;  %v952_v10 = vpop.permute.xlu1 %951  ;;  %v1307_v43 = vadd.f32 %v5339_v30, %v1239_v36  ;;  %v140_v61 = vld [vmem:[#allocation3 + $0x100] sm:$0xff]  ;;  %v893_v36 = vld [vmem:[%s6452_s1 + $0x1d8] sm:$0xff] }
  0xa4   :  { %v947_v11 = vpop.permute.xlu0 %946  ;;  %1617 = vst [vmem:[#allocation2 + $0x3c] sm:$0xf] %v1553_v3  ;;  %v1232_v13 = vmul.f32 %v5325_v23, %v952_v10  ;;  %v252_v15 = vpack.c.bf16 %v142_v62, %v140_v61  ;;  %v146_v61 = vld [vmem:[#allocation3 + $0x130] sm:$0xff] }
  0xa5   :  { %v1231_v14 = vmul.f32 %v5325_v23, %v947_v11  ;;  %1616 = vst [vmem:[#allocation2 + $0x34] sm:$0xf] %v1552_v4  ;;  %v1371_v51 = vmax.f32 %v1307_v43, 0.0  ;;  %v890_v4 = vld [vmem:[%s6452_s1 + $0x1c0] sm:$0xff] }
  0xa6   :  { %v1300_v24 = vadd.f32 %v5339_v30, %v1232_v13  ;;  %1166 = vperm.xlu2 %4896, %v887_v44   ;;  %v207_v13 = vld [vmem:[#allocation3 + $0x318] sm:$0xff] }
  0xa7   :  { %v1299_v25 = vadd.f32 %v5339_v30, %v1231_v14  ;;  %v1563_v56 = vpack.c.bf16 %v1371_v51, %v1371_v51 }
  0xa8   :  { %v1364_v34 = vmax.f32 %v1300_v24, 0.0  ;;  %v1002_v57 = vpop.permute.xlu2 %1001  ;;  %v253_v24 = vpack.c.bf16 %v143_v8, %v141_v7 }
  0xa9   :  { %v1363_v35 = vmax.f32 %v1299_v25, 0.0  ;;  %1176 = vperm.xlu1 %4895, %v889_v26   ;;  %475 = vmatmul.bf16.gmra.mxu0 %v250_v19  ;;  %1627 = vst [vmem:[#allocation2 + $0x8c] sm:$0xf] %v1563_v56  ;;  %v1242_v60 = vmul.f32 %v5325_v23, %v1002_v57  ;;  %v894_v19 = vld [vmem:[%s6452_s1 + $0x1e0] sm:$0xff]  ;;  %v285_v25 = vpack.c.bf16 %v207_v13, %v205_v9  ;;  %v145_v9 = vld [vmem:[#allocation3 + $0x128] sm:$0xff] }
  0xaa   :  { %1171 = vperm.xlu0 %4894, %v888_v27   ;;  %v1556_v41 = vpack.c.bf16 %v1364_v34, %v1364_v34  ;;  %555 = vmatmul.bf16.gmra.mxu2 %v282_v20  ;;  %v284_v20 = vpack.c.bf16 %v206_v2, %v204_v1 }
  0xab   :  { %v1555_v42 = vpack.c.bf16 %v1363_v35, %v1363_v35  ;;  %644 = vmatmul.bf16.gmra.mxu1 %v251_v31  ;;  %v967_v45 = vpop.permute.xlu1 %966  ;;  %v1310_v3 = vadd.f32 %v5339_v30, %v1242_v60  ;;  %v144_v60 = vld [vmem:[#allocation3 + $0x120] sm:$0xff] }
  0xac   :  { %v962_v46 = vpop.permute.xlu0 %961  ;;  %1620 = vst [vmem:[#allocation2 + $0x54] sm:$0xf] %v1556_v41  ;;  %v1235_v49 = vmul.f32 %v5325_v23, %v967_v45 }
  0xad   :  { %724 = vmatmul.bf16.gmra.mxu3 %v283_v32  ;;  %v1234_v50 = vmul.f32 %v5325_v23, %v962_v46  ;;  %1619 = vst [vmem:[#allocation2 + $0x4c] sm:$0xf] %v1555_v42  ;;  %v1374_v14 = vmax.f32 %v1310_v3, 0.0 }
  0xae   :  { %v1303_v52 = vadd.f32 %v5339_v30, %v1235_v49  ;;  %1181 = vperm.xlu2 %4896, %v890_v4   ;;  %v208_v4 = vld [vmem:[#allocation3 + $0x320] sm:$0xff] }
  0xaf   :  { %v1302_v53 = vadd.f32 %v5339_v30, %v1234_v50  ;;  %v1566_v21 = vpack.c.bf16 %v1374_v14, %v1374_v14  ;;  %v897_v50 = vld [vmem:[%s6452_s1 + $0x1f8] sm:$0xff] }
  0xb0   :  { %v1367_v58 = vmax.f32 %v1303_v52, 0.0  ;;  %v1017_v26 = vpop.permute.xlu2 %1016 }
  0xb1   :  { %v1366_v59 = vmax.f32 %v1302_v53, 0.0  ;;  %1191 = vperm.xlu1 %4895, %v892_v54   ;;  %1630 = vst [vmem:[#allocation2 + $0xa4] sm:$0xf] %v1566_v21  ;;  %v1245_v32 = vmul.f32 %v5325_v23, %v1017_v26  ;;  %v254_v21 = vpack.c.bf16 %v146_v61, %v144_v60 }
  0xb2   :  { %1186 = vperm.xlu0 %4894, %v891_v55   ;;  %v1559_v63 = vpack.c.bf16 %v1367_v58, %v1367_v58 }
  0xb3   :  { %v1558_v0 = vpack.c.bf16 %v1366_v59, %v1366_v59  ;;  %v982_v5 = vpop.permute.xlu1 %981  ;;  %v1313_v39 = vadd.f32 %v5339_v30, %v1245_v32  ;;  %v4485_v59 = vld [vmem:[%s6457_s6 + $0x20] sm:$0xf]  ;;  %v4824_v32 = vld [vmem:[%s6457_s6 + $0xa4] sm:$0xf0] }
  0xb4   :  { %v977_v6 = vpop.permute.xlu0 %976  ;;  %1623 = vst [vmem:[#allocation2 + $0x6c] sm:$0xf] %v1559_v63  ;;  %v1238_v10 = vmul.f32 %v5325_v23, %v982_v5  ;;  %v4808_v63 = vld [vmem:[%s6457_s6 + $0x24] sm:$0xf0]  ;;  %v210_v5 = vld [vmem:[#allocation3 + $0x330] sm:$0xff] }
  0xb5   :  { %v1237_v11 = vmul.f32 %v5325_v23, %v977_v6  ;;  %1622 = vst [vmem:[#allocation2 + $0x64] sm:$0xf] %v1558_v0  ;;  %v1377_v44 = vmax.f32 %v1313_v39, 0.0  ;;  %v896_v6 = vld [vmem:[%s6452_s1 + $0x1f0] sm:$0xff]  ;;  %s4132_s1 = sshll.u32 %s6461_s10, 4  ;;  %s4133_s1 = int_to_ptr.hbm [resolvable:$true] %s4132_s1 }
  0xb6   :  { %v1306_v16 = vadd.f32 %v5339_v30, %v1238_v10  ;;  %v441_v22 = vpop.f32.mrf.mxu0  ;;  %1196 = vperm.xlu2 %4896, %v893_v36  }
  0xb7   :  { %v1305_v17 = vadd.f32 %v5339_v30, %v1237_v11  ;;  %v442_v29 = vadd.f32 %v5476_v12, %v441_v22  ;;  %v1569_v52 = vpack.c.bf16 %v1377_v44, %v1377_v44  ;;  %v4486_v11 = vor.u32 %v4808_v63, %v4485_v59  ;;  %v4807_v44 = vld [vmem:[%s6457_s6 + $0x24] sm:$0xf] }
  0xb8   :  { %v1370_v27 = vmax.f32 %v1306_v16, 0.0  ;;  %v610_v31 = vpop.f32.mrf.mxu1  ;;  %v1032_v53 = vpop.permute.xlu2 %1031  ;;  %v286_v22 = vpack.c.bf16 %v210_v5, %v208_v4 }
  0xb9   :  { %v1369_v28 = vmax.f32 %v1305_v17, 0.0  ;;  %1206 = vperm.xlu1 %4895, %v895_v18   ;;  %v611_v35 = vadd.f32 %v610_v31, %v442_v29  ;;  %480 = vmatmul.bf16.gmra.mxu0 %v252_v15  ;;  %1633 = vst [vmem:[#allocation2 + $0xbc] sm:$0xf] %v1569_v52  ;;  %v1248_v62 = vmul.f32 %v5325_v23, %v1032_v53  ;;  %v147_v17 = vld [vmem:[#allocation3 + $0x138] sm:$0xff]  ;;  %v209_v18 = vld [vmem:[#allocation3 + $0x328] sm:$0xff] }
  0xba   :  { %1201 = vperm.xlu0 %4894, %v894_v19   ;;  %v1562_v33 = vpack.c.bf16 %v1370_v27, %v1370_v27  ;;  %560 = vmatmul.bf16.gmra.mxu2 %v284_v20  ;;  %v211_v19 = vld [vmem:[#allocation3 + $0x338] sm:$0xff]  ;;  %v4551_v52 = vld [vmem:[%s6457_s6 + $0xa8] sm:$0xf0] }
  0xbb   :  { %v1561_v34 = vpack.c.bf16 %v1369_v28, %v1369_v28  ;;  %649 = vmatmul.bf16.gmra.mxu1 %v253_v24  ;;  %v997_v37 = vpop.permute.xlu1 %996  ;;  %v770_v40 = vmax.f32 %v611_v35, 0.0  ;;  %v1316_v10 = vadd.f32 %v5339_v30, %v1248_v62  ;;  %2261 = vmatpush.bf16.msrb.mxu2 %v4486_v11  ;;  %v287_v35 = vpack.c.bf16 %v211_v19, %v209_v18 }
  0xbc   :  { %v992_v38 = vpop.permute.xlu0 %991  ;;  %1626 = vst [vmem:[#allocation2 + $0x84] sm:$0xf] %v1562_v33  ;;  %v1241_v41 = vmul.f32 %v5325_v23, %v997_v37 }
  0xbd   :  { %729 = vmatmul.bf16.gmra.mxu3 %v285_v25  ;;  %v1240_v42 = vmul.f32 %v5325_v23, %v992_v38  ;;  %1625 = vst [vmem:[#allocation2 + $0x7c] sm:$0xf] %v1561_v34  ;;  %v521_v43 = vpop.f32.mrf.mxu2  ;;  %v1418_v45 = vpack.c.bf16 %v770_v40, %v770_v40  ;;  %v1380_v24 = vmax.f32 %v1316_v10, 0.0  ;;  %v4549_v25 = vld [vmem:[%s6457_s6 + $0xa0] sm:$0xf]  ;;  %v255_v34 = vpack.c.bf16 %v147_v17, %v145_v9 }
  0xbe   :  { %v1309_v46 = vadd.f32 %v5339_v30, %v1241_v41  ;;  %v522_v48 = vadd.f32 %v5476_v12, %v521_v43  ;;  %v443_v51 = vpop.f32.mrf.mxu0  ;;  %1211 = vperm.xlu2 %4896, %v896_v6   ;;  %v4550_v38 = vor.u32 %v4824_v32, %v4549_v25 }
  0xbf   :  { %v1308_v47 = vadd.f32 %v5339_v30, %v1240_v42  ;;  %1482 = vst [vmem:[#allocation2] sm:$0xf] %v1418_v45  ;;  %v444_v57 = vadd.f32 %v5476_v12, %v443_v51  ;;  %v1572_v36 = vpack.c.bf16 %v1380_v24, %v1380_v24 }
  0xc0   :  { %v690_v49 = vpop.f32.mrf.mxu3  ;;  %v1373_v54 = vmax.f32 %v1309_v46, 0.0  ;;  %v612_v58 = vpop.f32.mrf.mxu1  ;;  %2430 = vmatpush.bf16.msrb.mxu3 %v4550_v38  ;;  %v4487_v46 = vld [vmem:[%s6457_s6 + $0x28] sm:$0xf0] }
  0xc1   :  { %v1372_v55 = vmax.f32 %v1308_v47, 0.0  ;;  %v691_v56 = vadd.f32 %v690_v49, %v522_v48  ;;  %v613_v3 = vadd.f32 %v612_v58, %v444_v57  ;;  %v1047_v37 = vpop.permute.xlu2 %1046  ;;  %1636 = vst [vmem:[#allocation2 + $0xd4] sm:$0xf] %v1572_v36  ;;  %v4823_v47 = vld [vmem:[%s6457_s6 + $0xa4] sm:$0xf] }
  0xc2   :  { %1216 = vperm.xlu0 %4894, %v897_v50   ;;  %v1565_v0 = vpack.c.bf16 %v1373_v54, %v1373_v54  ;;  %v1251_v45 = vmul.f32 %v5325_v23, %v1047_v37  ;;  %v4554_v57 = vor.u32 %v4823_v47, %v4551_v52 }
  0xc3   :  { %v1564_v1 = vpack.c.bf16 %v1372_v55, %v1372_v55  ;;  %v802_v2 = vmax.f32 %v691_v56, 0.0  ;;  %v1012_v7 = vpop.permute.xlu1 %1011  ;;  %v771_v14 = vmax.f32 %v613_v3, 0.0  ;;  %v4490_v56 = vor.u32 %v4807_v44, %v4487_v46 }
  0xc4   :  { %v1007_v8 = vpop.permute.xlu0 %1006  ;;  %1629 = vst [vmem:[#allocation2 + $0x9c] sm:$0xf] %v1565_v0  ;;  %v1244_v15 = vmul.f32 %v5325_v23, %v1012_v7  ;;  %v1319_v55 = vadd.f32 %v5339_v30, %v1251_v45  ;;  %2768 = vmatpush.bf16.msrb.mxu1 %v4554_v57 }
  0xc5   :  { %v1450_v13 = vpack.c.bf16 %v802_v2, %v802_v2  ;;  %v1243_v16 = vmul.f32 %v5325_v23, %v1007_v8  ;;  %1628 = vst [vmem:[#allocation2 + $0x94] sm:$0xf] %v1564_v1  ;;  %v523_v20 = vpop.f32.mrf.mxu2  ;;  %v1419_v26 = vpack.c.bf16 %v771_v14, %v771_v14  ;;  %2599 = vmatpush.bf16.msrb.mxu0 %v4490_v56  ;;  %v148_v14 = vld [vmem:[#allocation3 + $0x140] sm:$0xff] }
  0xc6   :  { %v1312_v27 = vadd.f32 %v5339_v30, %v1244_v15  ;;  %v524_v29 = vadd.f32 %v5476_v12, %v523_v20  ;;  %v446_v33 = vpop.f32.mrf.mxu0  ;;  %v1383_v63 = vmax.f32 %v1319_v55, 0.0  ;;  %v150_v20 = vld [vmem:[#allocation3 + $0x150] sm:$0xff] }
  0xc7   :  { %1514 = vst [vmem:[#allocation2 + $0x100] sm:$0xf] %v1450_v13  ;;  %v1311_v28 = vadd.f32 %v5339_v30, %v1243_v16  ;;  %v447_v42 = vadd.f32 %v5476_v12, %v446_v33  ;;  %v151_v33 = vld [vmem:[#allocation3 + $0x158] sm:$0xff]  ;;  %v256_v37 = vpack.c.bf16 %v150_v20, %v148_v14  ;;  %v152_v20 = vld [vmem:[#allocation3 + $0x160] sm:$0xff] }
  0xc8   :  { %v692_v31 = vpop.f32.mrf.mxu3  ;;  %1483 = vst [vmem:[#allocation2 + $0x8] sm:$0xf] %v1419_v26  ;;  %v1376_v39 = vmax.f32 %v1312_v27, 0.0  ;;  %v615_v43 = vpop.f32.mrf.mxu1  ;;  %v1575_v6 = vpack.c.bf16 %v1383_v63, %v1383_v63  ;;  %v149_v26 = vld [vmem:[#allocation3 + $0x148] sm:$0xff] }
  0xc9   :  { %v1375_v40 = vmax.f32 %v1311_v28, 0.0  ;;  %v693_v41 = vadd.f32 %v692_v31, %v524_v29  ;;  %v616_v51 = vadd.f32 %v615_v43, %v447_v42  ;;  %485 = vmatmul.bf16.gmra.mxu0 %v254_v21  ;;  %v1062_v7 = vpop.permute.xlu2 %1061  ;;  %v212_v21 = vld [vmem:[#allocation3 + $0x340] sm:$0xff]  ;;  %v257_v46 = vpack.c.bf16 %v151_v33, %v149_v26 }
  0xca   :  { %v1568_v48 = vpack.c.bf16 %v1376_v39, %v1376_v39  ;;  %565 = vmatmul.bf16.gmra.mxu2 %v286_v22  ;;  %1639 = vst [vmem:[#allocation2 + $0xec] sm:$0xf] %v1575_v6  ;;  %v1254_v15 = vmul.f32 %v5325_v23, %v1062_v7  ;;  %v214_v22 = vld [vmem:[#allocation3 + $0x350] sm:$0xff] }
  0xcb   :  { %v1567_v49 = vpack.c.bf16 %v1375_v40, %v1375_v40  ;;  %v803_v50 = vmax.f32 %v693_v41, 0.0  ;;  %654 = vmatmul.bf16.gmra.mxu1 %v255_v34  ;;  %v1027_v53 = vpop.permute.xlu1 %1026  ;;  %v772_v59 = vmax.f32 %v616_v51, 0.0  ;;  %v213_v34 = vld [vmem:[#allocation3 + $0x348] sm:$0xff]  ;;  %v288_v38 = vpack.c.bf16 %v214_v22, %v212_v21  ;;  %v4806_v22 = vld [vmem:[%s6457_s6 + $0x14] sm:$0xf0] }
  0xcc   :  { %v1022_v54 = vpop.permute.xlu0 %1021  ;;  %1632 = vst [vmem:[#allocation2 + $0xb4] sm:$0xf] %v1568_v48  ;;  %v1247_v60 = vmul.f32 %v5325_v23, %v1027_v53  ;;  %v1322_v27 = vadd.f32 %v5339_v30, %v1254_v15 }
  0xcd   :  { %734 = vmatmul.bf16.gmra.mxu3 %v287_v35  ;;  %v1451_v58 = vpack.c.bf16 %v803_v50, %v803_v50  ;;  %v1246_v61 = vmul.f32 %v5325_v23, %v1022_v54  ;;  %1631 = vst [vmem:[#allocation2 + $0xac] sm:$0xf] %v1567_v49  ;;  %v526_v62 = vpop.f32.mrf.mxu2  ;;  %v1420_v0 = vpack.c.bf16 %v772_v59, %v772_v59  ;;  %v215_v35 = vld [vmem:[#allocation3 + $0x358] sm:$0xff] }
  0xce   :  { %v1315_v1 = vadd.f32 %v5339_v30, %v1247_v60  ;;  %v527_v3 = vadd.f32 %v5476_v12, %v526_v62  ;;  %v448_v5 = vpop.f32.mrf.mxu0  ;;  %v1386_v39 = vmax.f32 %v1322_v27, 0.0  ;;  %v289_v47 = vpack.c.bf16 %v215_v35, %v213_v34  ;;  %v153_v34 = vld [vmem:[#allocation3 + $0x168] sm:$0xff] }
  0xcf   :  { %1515 = vst [vmem:[#allocation2 + $0x108] sm:$0xf] %v1451_v58  ;;  %v1314_v2 = vadd.f32 %v5339_v30, %v1246_v61  ;;  %v449_v11 = vadd.f32 %v5476_v12, %v448_v5 }
  0xd0   :  { %v695_v4 = vpop.f32.mrf.mxu3  ;;  %1484 = vst [vmem:[#allocation2 + $0x10] sm:$0xf] %v1420_v0  ;;  %v1379_v8 = vmax.f32 %v1315_v1, 0.0  ;;  %v617_v13 = vpop.f32.mrf.mxu1  ;;  %v1578_v48 = vpack.c.bf16 %v1386_v39, %v1386_v39 }
  0xd1   :  { %v1378_v9 = vmax.f32 %v1314_v2, 0.0  ;;  %v696_v10 = vadd.f32 %v695_v4, %v527_v3  ;;  %v618_v19 = vadd.f32 %v617_v13, %v449_v11  ;;  %v1077_v49 = vpop.permute.xlu2 %1076 }
  0xd2   :  { %v1571_v16 = vpack.c.bf16 %v1379_v8, %v1379_v8  ;;  %1642 = vst [vmem:[#allocation2 + $0x104] sm:$0xf] %v1578_v48  ;;  %v1257_v55 = vmul.f32 %v5325_v23, %v1077_v49  ;;  %v4541_v48 = vld [vmem:[%s6457_s6 + $0x90] sm:$0xf] }
  0xd3   :  { %v1570_v17 = vpack.c.bf16 %v1378_v9, %v1378_v9  ;;  %v804_v18 = vmax.f32 %v696_v10, 0.0  ;;  %v1042_v24 = vpop.permute.xlu1 %1041  ;;  %v773_v29 = vmax.f32 %v618_v19, 0.0  ;;  %v4477_v19 = vld [vmem:[%s6457_s6 + $0x10] sm:$0xf] }
  0xd4   :  { %v1037_v25 = vpop.permute.xlu0 %1036  ;;  %1635 = vst [vmem:[#allocation2 + $0xcc] sm:$0xf] %v1571_v16  ;;  %v1250_v31 = vmul.f32 %v5325_v23, %v1042_v24  ;;  %v1325_v62 = vadd.f32 %v5339_v30, %v1257_v55 }
  0xd5   :  { %v1452_v28 = vpack.c.bf16 %v804_v18, %v804_v18  ;;  %v1249_v32 = vmul.f32 %v5325_v23, %v1037_v25  ;;  %1634 = vst [vmem:[#allocation2 + $0xc4] sm:$0xf] %v1570_v17  ;;  %v528_v36 = vpop.f32.mrf.mxu2  ;;  %v1421_v40 = vpack.c.bf16 %v773_v29, %v773_v29  ;;  %v216_v29 = vld [vmem:[#allocation3 + $0x360] sm:$0xff] }
  0xd6   :  { %v1318_v41 = vadd.f32 %v5339_v30, %v1250_v31  ;;  %v529_v43 = vadd.f32 %v5476_v12, %v528_v36  ;;  %v451_v45 = vpop.f32.mrf.mxu0  ;;  %v1389_v4 = vmax.f32 %v1325_v62, 0.0  ;;  %v218_v31 = vld [vmem:[#allocation3 + $0x370] sm:$0xff]  ;;  %v4478_v36 = vor.u32 %v4806_v22, %v4477_v19 }
  0xd7   :  { %1516 = vst [vmem:[#allocation2 + $0x110] sm:$0xf] %v1452_v28  ;;  %v1317_v42 = vadd.f32 %v5339_v30, %v1249_v32  ;;  %v452_v53 = vadd.f32 %v5476_v12, %v451_v45  ;;  %v154_v28 = vld [vmem:[#allocation3 + $0x170] sm:$0xff] }
  0xd8   :  { %v697_v44 = vpop.f32.mrf.mxu3  ;;  %1485 = vst [vmem:[#allocation2 + $0x18] sm:$0xf] %v1421_v40  ;;  %v1382_v50 = vmax.f32 %v1318_v41, 0.0  ;;  %v620_v54 = vpop.f32.mrf.mxu1  ;;  %v1581_v11 = vpack.c.bf16 %v1389_v4, %v1389_v4  ;;  %v155_v41 = vld [vmem:[#allocation3 + $0x178] sm:$0xff]  ;;  %v258_v45 = vpack.c.bf16 %v154_v28, %v152_v20  ;;  %2262 = vmatpush.bf16.msrb.mxu2 %v4478_v36  ;;  %v4821_v4 = vld [vmem:[%s6457_s6 + $0x94] sm:$0xf] }
  0xd9   :  { %v1381_v51 = vmax.f32 %v1317_v42, 0.0  ;;  %v698_v52 = vadd.f32 %v697_v44, %v529_v43  ;;  %v621_v59 = vadd.f32 %v620_v54, %v452_v53  ;;  %490 = vmatmul.bf16.gmra.mxu0 %v256_v37  ;;  %v1092_v13 = vpop.permute.xlu2 %1091  ;;  %v217_v42 = vld [vmem:[#allocation3 + $0x368] sm:$0xff]  ;;  %v219_v43 = vld [vmem:[#allocation3 + $0x378] sm:$0xff]  ;;  %v259_v55 = vpack.c.bf16 %v155_v41, %v153_v34 }
  0xda   :  { %v1574_v56 = vpack.c.bf16 %v1382_v50, %v1382_v50  ;;  %570 = vmatmul.bf16.gmra.mxu2 %v288_v38  ;;  %1645 = vst [vmem:[#allocation2 + $0x11c] sm:$0xf] %v1581_v11  ;;  %v1260_v21 = vmul.f32 %v5325_v23, %v1092_v13  ;;  %v4822_v53 = vld [vmem:[%s6457_s6 + $0x94] sm:$0xf0]  ;;  %v5595_v13 = vld [vmem:[#allocation11] ss:$0 sm:$0xff] }
  0xdb   :  { %v1573_v57 = vpack.c.bf16 %v1381_v51, %v1381_v51  ;;  %v805_v58 = vmax.f32 %v698_v52, 0.0  ;;  %659 = vmatmul.bf16.gmra.mxu1 %v257_v46  ;;  %v1057_v60 = vpop.permute.xlu1 %1056  ;;  %v774_v0 = vmax.f32 %v621_v59, 0.0  ;;  %v290_v46 = vpack.c.bf16 %v218_v31, %v216_v29 }
  0xdc   :  { %v1052_v61 = vpop.permute.xlu0 %1051  ;;  %1638 = vst [vmem:[#allocation2 + $0xe4] sm:$0xf] %v1574_v56  ;;  %v1253_v1 = vmul.f32 %v5325_v23, %v1057_v60  ;;  %v1328_v35 = vadd.f32 %v5339_v30, %v1260_v21  ;;  %v291_v56 = vpack.c.bf16 %v219_v43, %v217_v42  ;;  %v4542_v59 = vor.u32 %v4822_v53, %v4541_v48 }
  0xdd   :  { %739 = vmatmul.bf16.gmra.mxu3 %v289_v47  ;;  %v1453_v63 = vpack.c.bf16 %v805_v58, %v805_v58  ;;  %v1252_v2 = vmul.f32 %v5325_v23, %v1052_v61  ;;  %1637 = vst [vmem:[#allocation2 + $0xdc] sm:$0xf] %v1573_v57  ;;  %v531_v3 = vpop.f32.mrf.mxu2  ;;  %v1422_v5 = vpack.c.bf16 %v774_v0, %v774_v0  ;;  %v4805_v0 = vld [vmem:[%s6457_s6 + $0x14] sm:$0xf] }
  0xde   :  { %v1321_v6 = vadd.f32 %v5339_v30, %v1253_v1  ;;  %v532_v8 = vadd.f32 %v5476_v12, %v531_v3  ;;  %v453_v10 = vpop.f32.mrf.mxu0  ;;  %v1392_v47 = vmax.f32 %v1328_v35, 0.0  ;;  %v5583_v1 = vld [vmem:[#allocation9] ss:$0 sm:$0xff]  ;;  %2431 = vmatpush.bf16.msrb.mxu3 %v4542_v59  ;;  %v4479_v3 = vld [vmem:[%s6457_s6 + $0x18] sm:$0xf0] }
  0xdf   :  { %1517 = vst [vmem:[#allocation2 + $0x118] sm:$0xf] %v1453_v63  ;;  %v1320_v7 = vadd.f32 %v5339_v30, %v1252_v2  ;;  %v454_v17 = vadd.f32 %v5476_v12, %v453_v10 }
  0xe0   :  { %v700_v9 = vpop.f32.mrf.mxu3  ;;  %1486 = vst [vmem:[#allocation2 + $0x20] sm:$0xf] %v1422_v5  ;;  %v1385_v14 = vmax.f32 %v1321_v6, 0.0  ;;  %v622_v18 = vpop.f32.mrf.mxu1  ;;  %v1584_v57 = vpack.c.bf16 %v1392_v47, %v1392_v47 }
  0xe1   :  { %v1384_v15 = vmax.f32 %v1320_v7, 0.0  ;;  %v701_v16 = vadd.f32 %v700_v9, %v532_v8  ;;  %v623_v27 = vadd.f32 %v622_v18, %v454_v17  ;;  %v1107_v58 = vpop.permute.xlu2 %1106  ;;  %v4543_v9 = vld [vmem:[%s6457_s6 + $0x98] sm:$0xf0] }
  0xe2   :  { %v1577_v24 = vpack.c.bf16 %v1385_v14, %v1385_v14  ;;  %1648 = vst [vmem:[#allocation2 + $0x134] sm:$0xf] %v1584_v57  ;;  %v1263_v2 = vmul.f32 %v5583_v1, %v1107_v58 }
  0xe3   :  { %v1576_v25 = vpack.c.bf16 %v1384_v15, %v1384_v15  ;;  %v806_v26 = vmax.f32 %v701_v16, 0.0  ;;  %v1072_v32 = vpop.permute.xlu1 %1071  ;;  %v775_v38 = vmax.f32 %v623_v27, 0.0  ;;  %v4482_v15 = vor.u32 %v4805_v0, %v4479_v3 }
  0xe4   :  { %v1067_v33 = vpop.permute.xlu0 %1066  ;;  %1641 = vst [vmem:[#allocation2 + $0xfc] sm:$0xf] %v1577_v24  ;;  %v1256_v39 = vmul.f32 %v5325_v23, %v1072_v32  ;;  %v1331_v14 = vadd.f32 %v5595_v13, %v1263_v2  ;;  %v4546_v16 = vor.u32 %v4821_v4, %v4543_v9 }
  0xe5   :  { %v1454_v37 = vpack.c.bf16 %v806_v26, %v806_v26  ;;  %v1255_v40 = vmul.f32 %v5325_v23, %v1067_v33  ;;  %1640 = vst [vmem:[#allocation2 + $0xf4] sm:$0xf] %v1576_v25  ;;  %v533_v44 = vpop.f32.mrf.mxu2  ;;  %v1423_v49 = vpack.c.bf16 %v775_v38, %v775_v38  ;;  %2600 = vmatpush.bf16.msrb.mxu0 %v4482_v15  ;;  %v156_v38 = vld [vmem:[#allocation3 + $0x180] sm:$0xff] }
  0xe6   :  { %v1324_v50 = vadd.f32 %v5339_v30, %v1256_v39  ;;  %v534_v23 = vadd.f32 %v5476_v12, %v533_v44  ;;  %v456_v54 = vpop.f32.mrf.mxu0  ;;  %v1395_v22 = vmax.f32 %v1331_v14, 0.0  ;;  %2769 = vmatpush.bf16.msrb.mxu1 %v4546_v16  ;;  %v158_v44 = vld [vmem:[#allocation3 + $0x190] sm:$0xff] }
  0xe7   :  { %1518 = vst [vmem:[#allocation2 + $0x120] sm:$0xf] %v1454_v37  ;;  %v1323_v51 = vadd.f32 %v5339_v30, %v1255_v40  ;;  %v457_v63 = vadd.f32 %v5476_v12, %v456_v54  ;;  %v159_v54 = vld [vmem:[#allocation3 + $0x198] sm:$0xff]  ;;  %v260_v58 = vpack.c.bf16 %v158_v44, %v156_v38  ;;  %v160_v44 = vld [vmem:[#allocation3 + $0x1a0] sm:$0xff] }
  0xe8   :  { %v702_v52 = vpop.f32.mrf.mxu3  ;;  %1487 = vst [vmem:[#allocation2 + $0x28] sm:$0xf] %v1423_v49  ;;  %v1388_v60 = vmax.f32 %v1324_v50, 0.0  ;;  %v625_v30 = vpop.f32.mrf.mxu1  ;;  %v1587_v31 = vpack.c.bf16 %v1395_v22, %v1395_v22  ;;  %v157_v49 = vld [vmem:[#allocation3 + $0x188] sm:$0xff] }
  0xe9   :  { %v1387_v61 = vmax.f32 %v1323_v51, 0.0  ;;  %v703_v62 = vadd.f32 %v702_v52, %v534_v23  ;;  %v626_v8 = vadd.f32 %v625_v30, %v457_v63  ;;  %495 = vmatmul.bf16.gmra.mxu0 %v258_v45  ;;  %v1122_v32 = vpop.permute.xlu2 %1121  ;;  %v220_v45 = vld [vmem:[#allocation3 + $0x380] sm:$0xff]  ;;  %v261_v3 = vpack.c.bf16 %v159_v54, %v157_v49 }
  0xea   :  { %v1580_v5 = vpack.c.bf16 %v1388_v60, %v1388_v60  ;;  %575 = vmatmul.bf16.gmra.mxu2 %v290_v46  ;;  %1651 = vst [vmem:[#allocation2 + $0x14c] sm:$0xf] %v1587_v31  ;;  %v1266_v39 = vmul.f32 %v5583_v1, %v1122_v32  ;;  %v222_v46 = vld [vmem:[#allocation3 + $0x390] sm:$0xff] }
  0xeb   :  { %v1579_v6 = vpack.c.bf16 %v1387_v61, %v1387_v61  ;;  %v807_v7 = vmax.f32 %v703_v62, 0.0  ;;  %664 = vmatmul.bf16.gmra.mxu1 %v259_v55  ;;  %v1087_v10 = vpop.permute.xlu1 %1086  ;;  %v776_v18 = vmax.f32 %v626_v8, 0.0  ;;  %v221_v55 = vld [vmem:[#allocation3 + $0x388] sm:$0xff]  ;;  %v292_v59 = vpack.c.bf16 %v222_v46, %v220_v45 }
  0xec   :  { %v1082_v11 = vpop.permute.xlu0 %1081  ;;  %1644 = vst [vmem:[#allocation2 + $0x114] sm:$0xf] %v1580_v5  ;;  %v1259_v19 = vmul.f32 %v5583_v1, %v1087_v10  ;;  %v1334_v50 = vadd.f32 %v5595_v13, %v1266_v39  ;;  %v4804_v46 = vld [vmem:[%s6457_s6 + $0x4] sm:$0xf0] }
  0xed   :  { %744 = vmatmul.bf16.gmra.mxu3 %v291_v56  ;;  %v1455_v17 = vpack.c.bf16 %v807_v7, %v807_v7  ;;  %v1258_v20 = vmul.f32 %v5583_v1, %v1082_v11  ;;  %1643 = vst [vmem:[#allocation2 + $0x10c] sm:$0xf] %v1579_v6  ;;  %v536_v21 = vpop.f32.mrf.mxu2  ;;  %v1424_v24 = vpack.c.bf16 %v776_v18, %v776_v18  ;;  %v223_v56 = vld [vmem:[#allocation3 + $0x398] sm:$0xff] }
  0xee   :  { %v1327_v25 = vadd.f32 %v5595_v13, %v1259_v19  ;;  %v537_v27 = vadd.f32 %v5476_v12, %v536_v21  ;;  %v458_v29 = vpop.f32.mrf.mxu0  ;;  %v1398_v60 = vmax.f32 %v1334_v50, 0.0  ;;  %v293_v4 = vpack.c.bf16 %v223_v56, %v221_v55  ;;  %v161_v55 = vld [vmem:[#allocation3 + $0x1a8] sm:$0xff] }
  0xef   :  { %1519 = vst [vmem:[#allocation2 + $0x128] sm:$0xf] %v1455_v17  ;;  %v1326_v26 = vadd.f32 %v5595_v13, %v1258_v20  ;;  %v459_v36 = vadd.f32 %v5476_v12, %v458_v29 }
  0xf0   :  { %v705_v28 = vpop.f32.mrf.mxu3  ;;  %1488 = vst [vmem:[#allocation2 + $0x30] sm:$0xf] %v1424_v24  ;;  %v1391_v33 = vmax.f32 %v1327_v25, 0.0  ;;  %v627_v37 = vpop.f32.mrf.mxu1  ;;  %v1590_v5 = vpack.c.bf16 %v1398_v60, %v1398_v60 }
  0xf1   :  { %v1390_v34 = vmax.f32 %v1326_v26, 0.0  ;;  %v706_v35 = vadd.f32 %v705_v28, %v537_v27  ;;  %v628_v43 = vadd.f32 %v627_v37, %v459_v36  ;;  %v1137_v6 = vpop.permute.xlu2 %1136 }
  0xf2   :  { %v1583_v40 = vpack.c.bf16 %v1391_v33, %v1391_v33  ;;  %1654 = vst [vmem:[#allocation2 + $0x164] sm:$0xf] %v1590_v5  ;;  %v1269_v14 = vmul.f32 %v5583_v1, %v1137_v6  ;;  %v4533_v5 = vld [vmem:[%s6457_s6 + $0x80] sm:$0xf] }
  0xf3   :  { %v1582_v41 = vpack.c.bf16 %v1390_v34, %v1390_v34  ;;  %v808_v42 = vmax.f32 %v706_v35, 0.0  ;;  %v1102_v47 = vpop.permute.xlu1 %1101  ;;  %v777_v23 = vmax.f32 %v628_v43, 0.0  ;;  %v4469_v43 = vld [vmem:[%s6457_s6] sm:$0xf] }
  0xf4   :  { %v1097_v48 = vpop.permute.xlu0 %1096  ;;  %1647 = vst [vmem:[#allocation2 + $0x12c] sm:$0xf] %v1583_v40  ;;  %v1262_v52 = vmul.f32 %v5583_v1, %v1102_v47  ;;  %v1337_v21 = vadd.f32 %v5595_v13, %v1269_v14 }
  0xf5   :  { %v1456_v51 = vpack.c.bf16 %v808_v42, %v808_v42  ;;  %v1261_v53 = vmul.f32 %v5583_v1, %v1097_v48  ;;  %1646 = vst [vmem:[#allocation2 + $0x124] sm:$0xf] %v1582_v41  ;;  %v538_v57 = vpop.f32.mrf.mxu2  ;;  %v1425_v61 = vpack.c.bf16 %v777_v23, %v777_v23  ;;  %v224_v23 = vld [vmem:[#allocation3 + $0x3a0] sm:$0xff] }
  0xf6   :  { %v1330_v62 = vadd.f32 %v5595_v13, %v1262_v52  ;;  %v539_v30 = vadd.f32 %v5476_v12, %v538_v57  ;;  %v461_v2 = vpop.f32.mrf.mxu0  ;;  %v1401_v28 = vmax.f32 %v1337_v21, 0.0  ;;  %v226_v52 = vld [vmem:[#allocation3 + $0x3b0] sm:$0xff]  ;;  %v4470_v57 = vor.u32 %v4804_v46, %v4469_v43 }
  0xf7   :  { %1520 = vst [vmem:[#allocation2 + $0x130] sm:$0xf] %v1456_v51  ;;  %v1329_v63 = vadd.f32 %v5595_v13, %v1261_v53  ;;  %v462_v10 = vadd.f32 %v5476_v12, %v461_v2  ;;  %v162_v51 = vld [vmem:[#allocation3 + $0x1b0] sm:$0xff] }
  0xf8   :  { %v707_v0 = vpop.f32.mrf.mxu3  ;;  %1489 = vst [vmem:[#allocation2 + $0x38] sm:$0xf] %v1425_v61  ;;  %v1394_v7 = vmax.f32 %v1330_v62, 0.0  ;;  %v630_v11 = vpop.f32.mrf.mxu1  ;;  %v1593_v36 = vpack.c.bf16 %v1401_v28, %v1401_v28  ;;  %v163_v62 = vld [vmem:[#allocation3 + $0x1b8] sm:$0xff]  ;;  %v262_v2 = vpack.c.bf16 %v162_v51, %v160_v44  ;;  %2263 = vmatpush.bf16.msrb.mxu2 %v4470_v57  ;;  %v4471_v28 = vld [vmem:[%s6457_s6 + $0x8] sm:$0xf0] }
  0xf9   :  { %v1393_v8 = vmax.f32 %v1329_v63, 0.0  ;;  %v708_v9 = vadd.f32 %v707_v0, %v539_v30  ;;  %v631_v18 = vadd.f32 %v630_v11, %v462_v10  ;;  %500 = vmatmul.bf16.gmra.mxu0 %v260_v58  ;;  %v1152_v37 = vpop.permute.xlu2 %1151  ;;  %v225_v63 = vld [vmem:[#allocation3 + $0x3a8] sm:$0xff]  ;;  %v227_v30 = vld [vmem:[#allocation3 + $0x3b8] sm:$0xff] }
  0xfa   :  { %v1586_v15 = vpack.c.bf16 %v1394_v7, %v1394_v7  ;;  %580 = vmatmul.bf16.gmra.mxu2 %v292_v59  ;;  %1657 = vst [vmem:[#allocation2 + $0x17c] sm:$0xf] %v1593_v36  ;;  %v1272_v45 = vmul.f32 %v5583_v1, %v1152_v37  ;;  %v4820_v11 = vld [vmem:[%s6457_s6 + $0x84] sm:$0xf0] }
  0xfb   :  { %v1585_v16 = vpack.c.bf16 %v1393_v8, %v1393_v8  ;;  %v809_v17 = vmax.f32 %v708_v9, 0.0  ;;  %669 = vmatmul.bf16.gmra.mxu1 %v261_v3  ;;  %v1117_v19 = vpop.permute.xlu1 %1116  ;;  %v778_v24 = vmax.f32 %v631_v18, 0.0  ;;  %v294_v3 = vpack.c.bf16 %v226_v52, %v224_v23 }
  0xfc   :  { %v1112_v20 = vpop.permute.xlu0 %1111  ;;  %1650 = vst [vmem:[#allocation2 + $0x144] sm:$0xf] %v1586_v15  ;;  %v1265_v25 = vmul.f32 %v5583_v1, %v1117_v19  ;;  %v1340_v56 = vadd.f32 %v5595_v13, %v1272_v45  ;;  %v263_v15 = vpack.c.bf16 %v163_v62, %v161_v55  ;;  %v4534_v19 = vor.u32 %v4820_v11, %v4533_v5  ;;  %v167_v11 = vld [vmem:[#allocation3 + $0x1d8] sm:$0xff] }
  0xfd   :  { %749 = vmatmul.bf16.gmra.mxu3 %v293_v4  ;;  %v1457_v22 = vpack.c.bf16 %v809_v17, %v809_v17  ;;  %v1264_v26 = vmul.f32 %v5583_v1, %v1112_v20  ;;  %1649 = vst [vmem:[#allocation2 + $0x13c] sm:$0xf] %v1585_v16  ;;  %v541_v27 = vpop.f32.mrf.mxu2  ;;  %v1426_v29 = vpack.c.bf16 %v778_v24, %v778_v24 }
  0xfe   :  { %v1333_v31 = vadd.f32 %v5595_v13, %v1265_v25  ;;  %v542_v33 = vadd.f32 %v5476_v12, %v541_v27  ;;  %v463_v35 = vpop.f32.mrf.mxu0  ;;  %v1404_v4 = vmax.f32 %v1340_v56, 0.0  ;;  %v295_v16 = vpack.c.bf16 %v227_v30, %v225_v63  ;;  %2432 = vmatpush.bf16.msrb.mxu3 %v4534_v19 }
  0xff   :  { %1521 = vst [vmem:[#allocation2 + $0x138] sm:$0xf] %v1457_v22  ;;  %v1332_v32 = vadd.f32 %v5595_v13, %v1264_v26  ;;  %v464_v41 = vadd.f32 %v5476_v12, %v463_v35  ;;  %v4803_v26 = vld [vmem:[%s6457_s6 + $0x4] sm:$0xf]  ;;  %v4535_v35 = vld [vmem:[%s6457_s6 + $0x88] sm:$0xf0] }
 0x100   :  { %v710_v34 = vpop.f32.mrf.mxu3  ;;  %1490 = vst [vmem:[#allocation2 + $0x40] sm:$0xf] %v1426_v29  ;;  %v1397_v38 = vmax.f32 %v1333_v31, 0.0  ;;  %v632_v42 = vpop.f32.mrf.mxu1  ;;  %v1596_v17 = vpack.c.bf16 %v1404_v4, %v1404_v4  ;;  %v4819_v29 = vld [vmem:[%s6457_s6 + $0x84] sm:$0xf] }
 0x101   :  { %v1396_v39 = vmax.f32 %v1332_v32, 0.0  ;;  %v711_v40 = vadd.f32 %v710_v34, %v542_v33  ;;  %v633_v50 = vadd.f32 %v632_v42, %v464_v41  ;;  %v1167_v18 = vpop.permute.xlu2 %1166 }
 0x102   :  { %v1589_v47 = vpack.c.bf16 %v1397_v38, %v1397_v38  ;;  %1660 = vst [vmem:[#allocation2 + $0x194] sm:$0xf] %v1596_v17  ;;  %v1275_v27 = vmul.f32 %v5583_v1, %v1167_v18 }
 0x103   :  { %v1588_v48 = vpack.c.bf16 %v1396_v39, %v1396_v39  ;;  %v810_v49 = vmax.f32 %v711_v40, 0.0  ;;  %v1132_v53 = vpop.permute.xlu1 %1131  ;;  %v779_v59 = vmax.f32 %v633_v50, 0.0  ;;  %v4474_v39 = vor.u32 %v4803_v26, %v4471_v28 }
 0x104   :  { %v1127_v54 = vpop.permute.xlu0 %1126  ;;  %1653 = vst [vmem:[#allocation2 + $0x15c] sm:$0xf] %v1589_v47  ;;  %v1268_v60 = vmul.f32 %v5583_v1, %v1132_v53  ;;  %v1343_v38 = vadd.f32 %v5595_v13, %v1275_v27  ;;  %v4538_v40 = vor.u32 %v4819_v29, %v4535_v35 }
 0x105   :  { %v1458_v58 = vpack.c.bf16 %v810_v49, %v810_v49  ;;  %v1267_v61 = vmul.f32 %v5583_v1, %v1127_v54  ;;  %1652 = vst [vmem:[#allocation2 + $0x154] sm:$0xf] %v1588_v48  ;;  %v543_v0 = vpop.f32.mrf.mxu2  ;;  %v1427_v6 = vpack.c.bf16 %v779_v59, %v779_v59  ;;  %2601 = vmatpush.bf16.msrb.mxu0 %v4474_v39  ;;  %v164_v59 = vld [vmem:[#allocation3 + $0x1c0] sm:$0xff] }
 0x106   :  { %v1336_v7 = vadd.f32 %v5595_v13, %v1268_v60  ;;  %v544_v9 = vadd.f32 %v5476_v12, %v543_v0  ;;  %v466_v14 = vpop.f32.mrf.mxu0  ;;  %v1407_v46 = vmax.f32 %v1343_v38, 0.0  ;;  %2770 = vmatpush.bf16.msrb.mxu1 %v4538_v40  ;;  %v166_v0 = vld [vmem:[#allocation3 + $0x1d0] sm:$0xff] }
 0x107   :  { %1522 = vst [vmem:[#allocation2 + $0x140] sm:$0xf] %v1458_v58  ;;  %v1335_v8 = vadd.f32 %v5595_v13, %v1267_v61  ;;  %v467_v24 = vadd.f32 %v5476_v12, %v466_v14  ;;  %v229_v14 = vld [vmem:[#allocation3 + $0x3c8] sm:$0xff]  ;;  %v264_v17 = vpack.c.bf16 %v166_v0, %v164_v59  ;;  %v170_v0 = vld [vmem:[#allocation3 + $0x1f0] sm:$0xff] }
 0x108   :  { %v712_v10 = vpop.f32.mrf.mxu3  ;;  %1491 = vst [vmem:[#allocation2 + $0x48] sm:$0xf] %v1427_v6  ;;  %v1400_v20 = vmax.f32 %v1336_v7, 0.0  ;;  %v635_v25 = vpop.f32.mrf.mxu1  ;;  %v1599_v52 = vpack.c.bf16 %v1407_v46, %v1407_v46  ;;  %v165_v6 = vld [vmem:[#allocation3 + $0x1c8] sm:$0xff] }
 0x109   :  { %v1399_v21 = vmax.f32 %v1335_v8, 0.0  ;;  %v713_v22 = vadd.f32 %v712_v10, %v544_v9  ;;  %v636_v34 = vadd.f32 %v635_v25, %v467_v24  ;;  %505 = vmatmul.bf16.gmra.mxu0 %v262_v2  ;;  %v1182_v53 = vpop.permute.xlu2 %1181  ;;  %v228_v2 = vld [vmem:[#allocation3 + $0x3c0] sm:$0xff]  ;;  %v265_v28 = vpack.c.bf16 %v167_v11, %v165_v6  ;;  %v4866_v11 = vld [vmem:[%s6459_s8 + $0xf4] sm:$0xf0] }
 0x10a   :  { %v1592_v31 = vpack.c.bf16 %v1400_v20, %v1400_v20  ;;  %585 = vmatmul.bf16.gmra.mxu2 %v294_v3  ;;  %1663 = vst [vmem:[#allocation2 + $0x1ac] sm:$0xf] %v1599_v52  ;;  %v1278_v60 = vmul.f32 %v5583_v1, %v1182_v53  ;;  %v230_v3 = vld [vmem:[#allocation3 + $0x3d0] sm:$0xff]  ;;  %v5666_v24 = vld [vmem:[#allocation8] ss:$0 sm:$0xff] }
 0x10b   :  { %v1591_v32 = vpack.c.bf16 %v1399_v21, %v1399_v21  ;;  %v811_v33 = vmax.f32 %v713_v22, 0.0  ;;  %674 = vmatmul.bf16.gmra.mxu1 %v263_v15  ;;  %v1147_v36 = vpop.permute.xlu1 %1146  ;;  %v780_v42 = vmax.f32 %v636_v34, 0.0  ;;  %v231_v15 = vld [vmem:[#allocation3 + $0x3d8] sm:$0xff]  ;;  %v296_v18 = vpack.c.bf16 %v230_v3, %v228_v2  ;;  %v4653_v2 = vld [vmem:[%s6459_s8 + $0x70] sm:$0xf] }
 0x10c   :  { %v1142_v37 = vpop.permute.xlu0 %1141  ;;  %1656 = vst [vmem:[#allocation2 + $0x174] sm:$0xf] %v1592_v31  ;;  %v1271_v43 = vmul.f32 %v5583_v1, %v1147_v36  ;;  %v1346_v7 = vadd.f32 %v5595_v13, %v1278_v60  ;;  %v297_v29 = vpack.c.bf16 %v231_v15, %v229_v14 }
 0x10d   :  { %754 = vmatmul.bf16.gmra.mxu3 %v295_v16  ;;  %v1459_v41 = vpack.c.bf16 %v811_v33, %v811_v33  ;;  %v1270_v44 = vmul.f32 %v5583_v1, %v1142_v37  ;;  %1655 = vst [vmem:[#allocation2 + $0x16c] sm:$0xf] %v1591_v32  ;;  %v546_v45 = vpop.f32.mrf.mxu2  ;;  %v1428_v47 = vpack.c.bf16 %v780_v42, %v780_v42 }
 0x10e   :  { %v1339_v48 = vadd.f32 %v5595_v13, %v1271_v43  ;;  %v547_v50 = vadd.f32 %v5476_v12, %v546_v45  ;;  %v468_v23 = vpop.f32.mrf.mxu0  ;;  %v1410_v19 = vmax.f32 %v1346_v7, 0.0 }
 0x10f   :  { %1523 = vst [vmem:[#allocation2 + $0x148] sm:$0xf] %v1459_v41  ;;  %v1338_v49 = vadd.f32 %v5595_v13, %v1270_v44  ;;  %v469_v57 = vadd.f32 %v5476_v12, %v468_v23 }
 0x110   :  { %v715_v51 = vpop.f32.mrf.mxu3  ;;  %1492 = vst [vmem:[#allocation2 + $0x50] sm:$0xf] %v1428_v47  ;;  %v1403_v54 = vmax.f32 %v1339_v48, 0.0  ;;  %v637_v58 = vpop.f32.mrf.mxu1  ;;  %v1602_v31 = vpack.c.bf16 %v1410_v19, %v1410_v19 }
 0x111   :  { %v1402_v55 = vmax.f32 %v1338_v49, 0.0  ;;  %v716_v56 = vadd.f32 %v715_v51, %v547_v50  ;;  %v638_v30 = vadd.f32 %v637_v58, %v469_v57  ;;  %v1197_v32 = vpop.permute.xlu2 %1196 }
 0x112   :  { %v1595_v61 = vpack.c.bf16 %v1403_v54, %v1403_v54  ;;  %1666 = vst [vmem:[#allocation2 + $0x1c4] sm:$0xf] %v1602_v31  ;;  %v1281_v38 = vmul.f32 %v5583_v1, %v1197_v32 }
 0x113   :  { %v1594_v62 = vpack.c.bf16 %v1402_v55, %v1402_v55  ;;  %v812_v63 = vmax.f32 %v716_v56, 0.0  ;;  %v1162_v4 = vpop.permute.xlu1 %1161  ;;  %v781_v12 = vmax.f32 %v638_v30, 0.0  ;;  %v168_v30 = vld [vmem:[#allocation3 + $0x1e0] sm:$0xff] }
 0x114   :  { %v1157_v5 = vpop.permute.xlu0 %1156  ;;  %1659 = vst [vmem:[#allocation2 + $0x18c] sm:$0xf] %v1595_v61  ;;  %v1274_v9 = vmul.f32 %v5583_v1, %v1162_v4  ;;  %v1349_v45 = vadd.f32 %v5595_v13, %v1281_v38  ;;  %v4850_v4 = vld [vmem:[%s6459_s8 + $0x74] sm:$0xf0]  ;;  %v266_v31 = vpack.c.bf16 %v170_v0, %v168_v30 }
 0x115   :  { %v1460_v8 = vpack.c.bf16 %v812_v63, %v812_v63  ;;  %v1273_v10 = vmul.f32 %v5583_v1, %v1157_v5  ;;  %1658 = vst [vmem:[#allocation2 + $0x184] sm:$0xf] %v1594_v62  ;;  %v548_v16 = vpop.f32.mrf.mxu2  ;;  %v1429_v20 = vpack.c.bf16 %v781_v12, %v781_v12  ;;  %v4717_v5 = vld [vmem:[%s6459_s8 + $0xf0] sm:$0xf] }
 0x116   :  { %v1342_v21 = vadd.f32 %v5595_v13, %v1274_v9  ;;  %v549_v25 = vadd.f32 %v5666_v24, %v548_v16  ;;  %v471_v27 = vpop.f32.mrf.mxu0  ;;  %v1413_v51 = vmax.f32 %v1349_v45, 0.0  ;;  %v232_v9 = vld [vmem:[#allocation3 + $0x3e0] sm:$0xff]  ;;  %v169_v16 = vld [vmem:[#allocation3 + $0x1e8] sm:$0xff]  ;;  %v4718_v19 = vor.u32 %v4866_v11, %v4717_v5 }
 0x117   :  { %1524 = vst [vmem:[#allocation2 + $0x150] sm:$0xf] %v1460_v8  ;;  %v1341_v22 = vadd.f32 %v5595_v13, %v1273_v10  ;;  %v472_v36 = vadd.f32 %v5666_v24, %v471_v27  ;;  %v234_v10 = vld [vmem:[#allocation3 + $0x3f0] sm:$0xff]  ;;  %v233_v27 = vld [vmem:[#allocation3 + $0x3e8] sm:$0xff] }
 0x118   :  { %v717_v26 = vpop.f32.mrf.mxu3  ;;  %1493 = vst [vmem:[#allocation2 + $0x58] sm:$0xf] %v1429_v20  ;;  %v1406_v33 = vmax.f32 %v1342_v21, 0.0  ;;  %v640_v37 = vpop.f32.mrf.mxu1  ;;  %v1605_v57 = vpack.c.bf16 %v1413_v51, %v1413_v51  ;;  %v298_v32 = vpack.c.bf16 %v234_v10, %v232_v9  ;;  %3491 = vmatpush.bf16.msra.mxu3 %v4718_v19 }
 0x119   :  { %v1405_v34 = vmax.f32 %v1341_v22, 0.0  ;;  %v718_v35 = vadd.f32 %v717_v26, %v549_v25  ;;  %v641_v42 = vadd.f32 %v640_v37, %v472_v36  ;;  %510 = vmatmul.bf16.gmra.mxu0 %v264_v17  ;;  %v1212_v58 = vpop.permute.xlu2 %1211  ;;  %v171_v26 = vld [vmem:[#allocation3 + $0x1f8] sm:$0xff] }
 0x11a   :  { %v1598_v39 = vpack.c.bf16 %v1406_v33, %v1406_v33  ;;  %590 = vmatmul.bf16.gmra.mxu2 %v296_v18  ;;  %1669 = vst [vmem:[#allocation2 + $0x1dc] sm:$0xf] %v1605_v57  ;;  %v1284_v3 = vmul.f32 %v5583_v1, %v1212_v58  ;;  %v4654_v18 = vor.u32 %v4850_v4, %v4653_v2 }
 0x11b   :  { %v1597_v40 = vpack.c.bf16 %v1405_v34, %v1405_v34  ;;  %v813_v41 = vmax.f32 %v718_v35, 0.0  ;;  %679 = vmatmul.bf16.gmra.mxu1 %v265_v28  ;;  %v1177_v43 = vpop.permute.xlu1 %1176  ;;  %v782_v47 = vmax.f32 %v641_v42, 0.0  ;;  %v235_v28 = vld [vmem:[#allocation3 + $0x3f8] sm:$0xff] }
 0x11c   :  { %v1172_v44 = vpop.permute.xlu0 %1171  ;;  %1662 = vst [vmem:[#allocation2 + $0x1a4] sm:$0xf] %v1598_v39  ;;  %v1277_v48 = vmul.f32 %v5583_v1, %v1177_v43  ;;  %v1352_v17 = vadd.f32 %v5595_v13, %v1284_v3  ;;  %3322 = vmatpush.bf16.msra.mxu2 %v4654_v18 }
 0x11d   :  { %759 = vmatmul.bf16.gmra.mxu3 %v297_v29  ;;  %v1461_v46 = vpack.c.bf16 %v813_v41, %v813_v41  ;;  %v1276_v49 = vmul.f32 %v5583_v1, %v1172_v44  ;;  %1661 = vst [vmem:[#allocation2 + $0x19c] sm:$0xf] %v1597_v40  ;;  %v551_v50 = vpop.f32.mrf.mxu2  ;;  %v1430_v23 = vpack.c.bf16 %v782_v47, %v782_v47 }
 0x11e   :  { %v1345_v52 = vadd.f32 %v5595_v13, %v1277_v48  ;;  %v552_v54 = vadd.f32 %v5666_v24, %v551_v50  ;;  %v473_v56 = vpop.f32.mrf.mxu0  ;;  %v1416_v33 = vmax.f32 %v1352_v17, 0.0  ;;  %v267_v40 = vpack.c.bf16 %v171_v26, %v169_v16  ;;  %v4849_v48 = vld [vmem:[%s6459_s8 + $0x74] sm:$0xf] }
 0x11f   :  { %1525 = vst [vmem:[#allocation2 + $0x158] sm:$0xf] %v1461_v46  ;;  %v1344_v53 = vadd.f32 %v5595_v13, %v1276_v49  ;;  %v474_v62 = vadd.f32 %v5666_v24, %v473_v56  ;;  %v299_v41 = vpack.c.bf16 %v235_v28, %v233_v27  ;;  %v4655_v49 = vld [vmem:[%s6459_s8 + $0x78] sm:$0xf0]  ;;  %v4865_v50 = vld [vmem:[%s6459_s8 + $0xf4] sm:$0xf] }
 0x120   :  { %v720_v55 = vpop.f32.mrf.mxu3  ;;  %1494 = vst [vmem:[#allocation2 + $0x60] sm:$0xf] %v1430_v23  ;;  %v1409_v59 = vmax.f32 %v1345_v52, 0.0  ;;  %v642_v63 = vpop.f32.mrf.mxu1  ;;  %v1608_v42 = vpack.c.bf16 %v1416_v33, %v1416_v33  ;;  %v4658_v57 = vor.u32 %v4849_v48, %v4655_v49  ;;  %v4739_v28 = vld [vmem:[#allocation2 + $0x4] sm:$0xf] }
 0x121   :  { %v1408_v60 = vmax.f32 %v1344_v53, 0.0  ;;  %v721_v61 = vadd.f32 %v720_v55, %v552_v54  ;;  %v643_v12 = vadd.f32 %v642_v63, %v474_v62  ;;  %v4719_v54 = vld [vmem:[%s6459_s8 + $0xf8] sm:$0xf0] }
 0x122   :  { %v1601_v6 = vpack.c.bf16 %v1409_v59, %v1409_v59  ;;  %1672 = vst [vmem:[#allocation2 + $0x1f4] sm:$0xf] %v1608_v42  ;;  %v4722_v58 = vor.u32 %v4865_v50, %v4719_v54  ;;  %3660 = vmatpush.bf16.msra.mxu0 %v4658_v57  ;;  %v4742_v54 = vld [vmem:[#allocation2 + $0x14] sm:$0xf0] }
 0x123   :  { %v1600_v7 = vpack.c.bf16 %v1408_v60, %v1408_v60  ;;  %v814_v8 = vmax.f32 %v721_v61, 0.0  ;;  %v1192_v14 = vpop.permute.xlu1 %1191  ;;  %v783_v21 = vmax.f32 %v643_v12, 0.0 }
 0x124   :  { %v1187_v15 = vpop.permute.xlu0 %1186  ;;  %1665 = vst [vmem:[#allocation2 + $0x1bc] sm:$0xf] %v1601_v6  ;;  %v1280_v22 = vmul.f32 %v5583_v1, %v1192_v14  ;;  %3829 = vmatpush.bf16.msra.mxu1 %v4722_v58  ;;  %v4741_v58 = vld [vmem:[#allocation2 + $0x14] sm:$0xf] }
 0x125   :  { %v1462_v20 = vpack.c.bf16 %v814_v8, %v814_v8  ;;  %v1279_v25 = vmul.f32 %v5583_v1, %v1187_v15  ;;  %1664 = vst [vmem:[#allocation2 + $0x1b4] sm:$0xf] %v1600_v7  ;;  %v553_v29 = vpop.f32.mrf.mxu2  ;;  %v1431_v34 = vpack.c.bf16 %v783_v21, %v783_v21  ;;  %v4740_v21 = vld [vmem:[#allocation2 + $0x4] sm:$0xf0] }
 0x126   :  { %v1348_v35 = vadd.f32 %v5595_v13, %v1280_v22  ;;  %v554_v37 = vadd.f32 %v5666_v24, %v553_v29  ;;  %v476_v39 = vpop.f32.mrf.mxu0  ;;  %v4215_v29 = vld [vmem:[#allocation2 + $0x8] sm:$0xf0] }
 0x127   :  { %1526 = vst [vmem:[#allocation2 + $0x160] sm:$0xf] %v1462_v20  ;;  %v1347_v36 = vadd.f32 %v5595_v13, %v1279_v25  ;;  %v477_v46 = vadd.f32 %v5666_v24, %v476_v39 }
 0x128   :  { %v722_v38 = vpop.f32.mrf.mxu3  ;;  %1495 = vst [vmem:[#allocation2 + $0x68] sm:$0xf] %v1431_v34  ;;  %v1412_v43 = vmax.f32 %v1348_v35, 0.0  ;;  %v645_v47 = vpop.f32.mrf.mxu1 }
 0x129   :  { %v1411_v44 = vmax.f32 %v1347_v36, 0.0  ;;  %v723_v45 = vadd.f32 %v722_v38, %v554_v37  ;;  %v646_v53 = vadd.f32 %v645_v47, %v477_v46  ;;  %515 = vmatmul.bf16.gmra.mxu0 %v266_v31  ;;  %v4218_v37 = vor.u32 %v4739_v28, %v4215_v29  ;;  %v4231_v28 = vld [vmem:[#allocation2 + $0x28] sm:$0xf0] }
 0x12a   :  { %v1604_v51 = vpack.c.bf16 %v1412_v43, %v1412_v43  ;;  %595 = vmatmul.bf16.gmra.mxu2 %v298_v32  ;;  %v4213_v32 = vld [vmem:[#allocation2] sm:$0xf] }
 0x12b   :  { %v1603_v23 = vpack.c.bf16 %v1411_v44, %v1411_v44  ;;  %v815_v52 = vmax.f32 %v723_v45, 0.0  ;;  %684 = vmatmul.bf16.gmra.mxu1 %v267_v40  ;;  %v1207_v55 = vpop.permute.xlu1 %1206  ;;  %v784_v60 = vmax.f32 %v646_v53, 0.0  ;;  %v4214_v36 = vor.u32 %v4740_v21, %v4213_v32  ;;  %v4744_v21 = vld [vmem:[#allocation2 + $0x24] sm:$0xf0] }
 0x12c   :  { %v1202_v56 = vpop.permute.xlu0 %1201  ;;  %1668 = vst [vmem:[#allocation2 + $0x1d4] sm:$0xf] %v1604_v51  ;;  %v1283_v61 = vmul.f32 %v5583_v1, %v1207_v55 }
 0x12d   :  { %764 = vmatmul.bf16.gmra.mxu3 %v299_v41  ;;  %v1463_v59 = vpack.c.bf16 %v815_v52, %v815_v52  ;;  %v1282_v62 = vmul.f32 %v5583_v1, %v1202_v56  ;;  %1667 = vst [vmem:[#allocation2 + $0x1cc] sm:$0xf] %v1603_v23  ;;  %v556_v63 = vpop.f32.mrf.mxu2  ;;  %v1432_v30 = vpack.c.bf16 %v784_v60, %v784_v60 }
 0x12e   :  { %v1351_v0 = vadd.f32 %v5595_v13, %v1283_v61  ;;  %v557_v3 = vadd.f32 %v5666_v24, %v556_v63  ;;  %v478_v5 = vpop.f32.mrf.mxu0  ;;  %v4221_v61 = vld [vmem:[#allocation2 + $0x10] sm:$0xf] }
 0x12f   :  { %1527 = vst [vmem:[#allocation2 + $0x168] sm:$0xf] %v1463_v59  ;;  %v1350_v2 = vadd.f32 %v5595_v13, %v1282_v62  ;;  %v479_v12 = vadd.f32 %v5666_v24, %v478_v5  ;;  %v4223_v59 = vld [vmem:[#allocation2 + $0x18] sm:$0xf0] }
 0x130   :  { %v725_v4 = vpop.f32.mrf.mxu3  ;;  %1496 = vst [vmem:[#allocation2 + $0x70] sm:$0xf] %v1432_v30  ;;  %v1415_v6 = vmax.f32 %v1351_v0, 0.0  ;;  %v647_v9 = vpop.f32.mrf.mxu1  ;;  %v4222_v0 = vor.u32 %v4742_v54, %v4221_v61  ;;  %v4745_v61 = vld [vmem:[#allocation2 + $0x34] sm:$0xf] }
 0x131   :  { %v1414_v7 = vmax.f32 %v1350_v2, 0.0  ;;  %v726_v8 = vadd.f32 %v725_v4, %v557_v3  ;;  %v648_v15 = vadd.f32 %v647_v9, %v479_v12  ;;  %v4226_v2 = vor.u32 %v4741_v58, %v4223_v59 }
 0x132   :  { %v1607_v10 = vpack.c.bf16 %v1415_v6, %v1415_v6 }
 0x133   :  { %v1606_v11 = vpack.c.bf16 %v1414_v7, %v1414_v7  ;;  %v816_v14 = vmax.f32 %v726_v8, 0.0  ;;  %v785_v18 = vmax.f32 %v648_v15, 0.0 }
 0x134   :  { %v1217_v16 = vpop.permute.xlu0 %1216  ;;  %1671 = vst [vmem:[#allocation2 + $0x1ec] sm:$0xf] %v1607_v10 }
 0x135   :  { %v1464_v17 = vpack.c.bf16 %v816_v14, %v816_v14  ;;  %v1285_v19 = vmul.f32 %v5583_v1, %v1217_v16  ;;  %1670 = vst [vmem:[#allocation2 + $0x1e4] sm:$0xf] %v1606_v11  ;;  %v558_v20 = vpop.f32.mrf.mxu2  ;;  %v1433_v22 = vpack.c.bf16 %v785_v18, %v785_v18 }
 0x136   :  { %v559_v26 = vadd.f32 %v5666_v24, %v558_v20  ;;  %v481_v31 = vpop.f32.mrf.mxu0 }
 0x137   :  { %1528 = vst [vmem:[#allocation2 + $0x170] sm:$0xf] %v1464_v17  ;;  %v1353_v25 = vadd.f32 %v5595_v13, %v1285_v19  ;;  %v482_v35 = vadd.f32 %v5666_v24, %v481_v31  ;;  %v4229_v31 = vld [vmem:[#allocation2 + $0x20] sm:$0xf] }
 0x138   :  { %v727_v27 = vpop.f32.mrf.mxu3  ;;  %1497 = vst [vmem:[#allocation2 + $0x78] sm:$0xf] %v1433_v22  ;;  %v650_v1 = vpop.f32.mrf.mxu1 }
 0x139   :  { %v1417_v33 = vmax.f32 %v1353_v25, 0.0  ;;  %v728_v34 = vadd.f32 %v727_v27, %v559_v26  ;;  %v651_v40 = vadd.f32 %v650_v1, %v482_v35  ;;  %2602 = vmatmul.bf16.vlgmr.msrb.gmra.mxu0 %v4214_v36  ;;  %v4743_v27 = vld [vmem:[#allocation2 + $0x24] sm:$0xf]  ;;  %v4230_v35 = vor.u32 %v4744_v21, %v4229_v31 }
 0x13a   :  { %2264 = vmatmul.bf16.vlgmr.msrb.gmra.mxu2 %v4214_v36  ;;  %v4234_v1 = vor.u32 %v4743_v27, %v4231_v28 }
 0x13b   :  { %v1609_v38 = vpack.c.bf16 %v1417_v33, %v1417_v33  ;;  %v817_v39 = vmax.f32 %v728_v34, 0.0  ;;  %2771 = vmatmul.bf16.vlgmr.msrb.gmra.mxu1 %v4218_v37  ;;  %v786_v41 = vmax.f32 %v651_v40, 0.0 }
 0x13d   :  { %2433 = vmatmul.bf16.vlgmr.msrb.gmra.mxu3 %v4218_v37  ;;  %1673 = vst [vmem:[#allocation2 + $0x1fc] sm:$0xf] %v1609_v38  ;;  %v1465_v13 = vpack.c.bf16 %v817_v39, %v817_v39  ;;  %v561_v42 = vpop.f32.mrf.mxu2  ;;  %v1434_v43 = vpack.c.bf16 %v786_v41, %v786_v41 }
 0x13e   :  { %v562_v44 = vadd.f32 %v5666_v24, %v561_v42  ;;  %v483_v46 = vpop.f32.mrf.mxu0 }
 0x13f   :  { %1529 = vst [vmem:[#allocation2 + $0x178] sm:$0xf] %v1465_v13  ;;  %v484_v48 = vadd.f32 %v5666_v24, %v483_v46 }
 0x140   :  { %v730_v45 = vpop.f32.mrf.mxu3  ;;  %1498 = vst [vmem:[#allocation2 + $0x80] sm:$0xf] %v1434_v43  ;;  %v652_v49 = vpop.f32.mrf.mxu1 }
 0x141   :  { %v731_v47 = vadd.f32 %v730_v45, %v562_v44  ;;  %v653_v51 = vadd.f32 %v652_v49, %v484_v48  ;;  %v4848_v48 = vld [vmem:[%s6459_s8 + $0x64] sm:$0xf0] }
 0x143   :  { %v818_v50 = vmax.f32 %v731_v47, 0.0  ;;  %v787_v52 = vmax.f32 %v653_v51, 0.0  ;;  %v4645_v47 = vld [vmem:[%s6459_s8 + $0x60] sm:$0xf]  ;;  %v4864_v51 = vld [vmem:[%s6459_s8 + $0xe4] sm:$0xf0] }
 0x144   :  { %v4646_v49 = vor.u32 %v4848_v48, %v4645_v47 }
 0x145   :  { %v1466_v23 = vpack.c.bf16 %v818_v50, %v818_v50  ;;  %v563_v53 = vpop.f32.mrf.mxu2  ;;  %v1435_v55 = vpack.c.bf16 %v787_v52, %v787_v52  ;;  %v4709_v50 = vld [vmem:[%s6459_s8 + $0xe0] sm:$0xf] }
 0x146   :  { %v564_v56 = vadd.f32 %v5666_v24, %v563_v53  ;;  %v486_v60 = vpop.f32.mrf.mxu0  ;;  %v4710_v53 = vor.u32 %v4864_v51, %v4709_v50  ;;  %3323 = vmatpush.bf16.msra.mxu2 %v4646_v49 }
 0x147   :  { %1530 = vst [vmem:[#allocation2 + $0x180] sm:$0xf] %v1466_v23  ;;  %v487_v63 = vadd.f32 %v5666_v24, %v486_v60 }
 0x148   :  { %v732_v57 = vpop.f32.mrf.mxu3  ;;  %1499 = vst [vmem:[#allocation2 + $0x88] sm:$0xf] %v1435_v55  ;;  %v655_v30 = vpop.f32.mrf.mxu1  ;;  %3492 = vmatpush.bf16.msra.mxu3 %v4710_v53 }
 0x149   :  { %v733_v62 = vadd.f32 %v732_v57, %v564_v56  ;;  %v656_v4 = vadd.f32 %v655_v30, %v487_v63  ;;  %2607 = vmatmul.bf16.gmra.mxu0 %v4222_v0  ;;  %v4746_v57 = vld [vmem:[#allocation2 + $0x34] sm:$0xf0]  ;;  %v4237_v30 = vld [vmem:[#allocation2 + $0x30] sm:$0xf] }
 0x14a   :  { %2269 = vmatmul.bf16.gmra.mxu2 %v4222_v0 }
 0x14b   :  { %v819_v3 = vmax.f32 %v733_v62, 0.0  ;;  %2776 = vmatmul.bf16.gmra.mxu1 %v4226_v2  ;;  %v788_v6 = vmax.f32 %v656_v4, 0.0  ;;  %v4239_v62 = vld [vmem:[#allocation2 + $0x38] sm:$0xf0]  ;;  %v4238_v4 = vor.u32 %v4746_v57, %v4237_v30  ;;  %v4749_v30 = vld [vmem:[#allocation2 + $0x54] sm:$0xf] }
 0x14d   :  { %2438 = vmatmul.bf16.gmra.mxu3 %v4226_v2  ;;  %v1467_v5 = vpack.c.bf16 %v819_v3, %v819_v3  ;;  %v566_v7 = vpop.f32.mrf.mxu2  ;;  %v1436_v8 = vpack.c.bf16 %v788_v6, %v788_v6  ;;  %v4647_v6 = vld [vmem:[%s6459_s8 + $0x68] sm:$0xf0] }
 0x14e   :  { %v567_v12 = vadd.f32 %v5666_v24, %v566_v7  ;;  %v488_v10 = vpop.f32.mrf.mxu0  ;;  %v4242_v7 = vor.u32 %v4745_v61, %v4239_v62 }
 0x14f   :  { %1531 = vst [vmem:[#allocation2 + $0x188] sm:$0xf] %v1467_v5  ;;  %v489_v14 = vadd.f32 %v5666_v24, %v488_v10  ;;  %v4847_v5 = vld [vmem:[%s6459_s8 + $0x64] sm:$0xf] }
 0x150   :  { %v735_v9 = vpop.f32.mrf.mxu3  ;;  %1500 = vst [vmem:[#allocation2 + $0x90] sm:$0xf] %v1436_v8  ;;  %v657_v15 = vpop.f32.mrf.mxu1  ;;  %v4650_v8 = vor.u32 %v4847_v5, %v4647_v6 }
 0x151   :  { %v736_v11 = vadd.f32 %v735_v9, %v567_v12  ;;  %v658_v17 = vadd.f32 %v657_v15, %v489_v14  ;;  %v4863_v12 = vld [vmem:[%s6459_s8 + $0xe4] sm:$0xf]  ;;  %v4711_v9 = vld [vmem:[%s6459_s8 + $0xe8] sm:$0xf0] }
 0x152   :  { %v4714_v14 = vor.u32 %v4863_v12, %v4711_v9  ;;  %3661 = vmatpush.bf16.msra.mxu0 %v4650_v8 }
 0x153   :  { %v820_v16 = vmax.f32 %v736_v11, 0.0  ;;  %v789_v19 = vmax.f32 %v658_v17, 0.0 }
 0x154   :  { %3830 = vmatpush.bf16.msra.mxu1 %v4714_v14 }
 0x155   :  { %v1468_v18 = vpack.c.bf16 %v820_v16, %v820_v16  ;;  %v568_v20 = vpop.f32.mrf.mxu2  ;;  %v1437_v22 = vpack.c.bf16 %v789_v19, %v789_v19 }
 0x156   :  { %v569_v25 = vadd.f32 %v5666_v24, %v568_v20  ;;  %v491_v29 = vpop.f32.mrf.mxu0 }
 0x157   :  { %1532 = vst [vmem:[#allocation2 + $0x190] sm:$0xf] %v1468_v18  ;;  %v492_v33 = vadd.f32 %v5666_v24, %v491_v29 }
 0x158   :  { %v737_v26 = vpop.f32.mrf.mxu3  ;;  %1501 = vst [vmem:[#allocation2 + $0x98] sm:$0xf] %v1437_v22  ;;  %v660_v34 = vpop.f32.mrf.mxu1 }
 0x159   :  { %v738_v32 = vadd.f32 %v737_v26, %v569_v25  ;;  %v661_v37 = vadd.f32 %v660_v34, %v492_v33  ;;  %2612 = vmatmul.bf16.gmra.mxu0 %v4230_v35  ;;  %v4748_v33 = vld [vmem:[#allocation2 + $0x44] sm:$0xf0] }
 0x15a   :  { %2274 = vmatmul.bf16.gmra.mxu2 %v4230_v35 }
 0x15b   :  { %v821_v36 = vmax.f32 %v738_v32, 0.0  ;;  %2781 = vmatmul.bf16.gmra.mxu1 %v4234_v1  ;;  %v790_v39 = vmax.f32 %v661_v37, 0.0  ;;  %v4247_v37 = vld [vmem:[#allocation2 + $0x48] sm:$0xf0] }
 0x15d   :  { %2443 = vmatmul.bf16.gmra.mxu3 %v4234_v1  ;;  %v1469_v38 = vpack.c.bf16 %v821_v36, %v821_v36  ;;  %v571_v40 = vpop.f32.mrf.mxu2  ;;  %v1438_v13 = vpack.c.bf16 %v790_v39, %v790_v39  ;;  %v4747_v36 = vld [vmem:[#allocation2 + $0x44] sm:$0xf]  ;;  %v4245_v39 = vld [vmem:[#allocation2 + $0x40] sm:$0xf] }
 0x15e   :  { %v572_v41 = vadd.f32 %v5666_v24, %v571_v40  ;;  %v493_v43 = vpop.f32.mrf.mxu0 }
 0x15f   :  { %1533 = vst [vmem:[#allocation2 + $0x198] sm:$0xf] %v1469_v38  ;;  %v494_v45 = vadd.f32 %v5666_v24, %v493_v43  ;;  %v4250_v43 = vor.u32 %v4747_v36, %v4247_v37  ;;  %v4261_v36 = vld [vmem:[#allocation2 + $0x60] sm:$0xf] }
 0x160   :  { %v740_v42 = vpop.f32.mrf.mxu3  ;;  %1502 = vst [vmem:[#allocation2 + $0xa0] sm:$0xf] %v1438_v13  ;;  %v662_v46 = vpop.f32.mrf.mxu1 }
 0x161   :  { %v741_v44 = vadd.f32 %v740_v42, %v572_v41  ;;  %v663_v52 = vadd.f32 %v662_v46, %v494_v45  ;;  %v4246_v42 = vor.u32 %v4748_v33, %v4245_v39 }
 0x163   :  { %v822_v23 = vmax.f32 %v741_v44, 0.0  ;;  %v791_v55 = vmax.f32 %v663_v52, 0.0 }
 0x165   :  { %v1470_v54 = vpack.c.bf16 %v822_v23, %v822_v23  ;;  %v573_v56 = vpop.f32.mrf.mxu2  ;;  %v1439_v58 = vpack.c.bf16 %v791_v55, %v791_v55 }
 0x166   :  { %v574_v59 = vadd.f32 %v5666_v24, %v573_v56  ;;  %v496_v63 = vpop.f32.mrf.mxu0 }
 0x167   :  { %1534 = vst [vmem:[#allocation2 + $0x1a0] sm:$0xf] %v1470_v54  ;;  %v497_v2 = vadd.f32 %v5666_v24, %v496_v63 }
 0x168   :  { %v742_v60 = vpop.f32.mrf.mxu3  ;;  %1503 = vst [vmem:[#allocation2 + $0xa8] sm:$0xf] %v1439_v58  ;;  %v665_v3 = vpop.f32.mrf.mxu1 }
 0x169   :  { %v743_v0 = vadd.f32 %v742_v60, %v574_v59  ;;  %v666_v11 = vadd.f32 %v665_v3, %v497_v2  ;;  %2617 = vmatmul.bf16.gmra.mxu0 %v4238_v4  ;;  %v4750_v60 = vld [vmem:[#allocation2 + $0x54] sm:$0xf0]  ;;  %v4253_v3 = vld [vmem:[#allocation2 + $0x50] sm:$0xf] }
 0x16a   :  { %2279 = vmatmul.bf16.gmra.mxu2 %v4238_v4 }
 0x16b   :  { %v823_v10 = vmax.f32 %v743_v0, 0.0  ;;  %2786 = vmatmul.bf16.gmra.mxu1 %v4242_v7  ;;  %v792_v16 = vmax.f32 %v666_v11, 0.0  ;;  %v4255_v0 = vld [vmem:[#allocation2 + $0x58] sm:$0xf0] }
 0x16c   :  { %v4258_v8 = vor.u32 %v4749_v30, %v4255_v0  ;;  %v4753_v30 = vld [vmem:[#allocation2 + $0x74] sm:$0xf]  ;;  %v4271_v0 = vld [vmem:[#allocation2 + $0x78] sm:$0xf0] }
 0x16d   :  { %2448 = vmatmul.bf16.gmra.mxu3 %v4242_v7  ;;  %v1471_v15 = vpack.c.bf16 %v823_v10, %v823_v10  ;;  %v576_v17 = vpop.f32.mrf.mxu2  ;;  %v1440_v18 = vpack.c.bf16 %v792_v16, %v792_v16  ;;  %v4254_v7 = vor.u32 %v4750_v60, %v4253_v3 }
 0x16e   :  { %v577_v19 = vadd.f32 %v5666_v24, %v576_v17  ;;  %v498_v21 = vpop.f32.mrf.mxu0 }
 0x16f   :  { %1535 = vst [vmem:[#allocation2 + $0x1a8] sm:$0xf] %v1471_v15  ;;  %v499_v25 = vadd.f32 %v5666_v24, %v498_v21 }
 0x170   :  { %v745_v20 = vpop.f32.mrf.mxu3  ;;  %1504 = vst [vmem:[#allocation2 + $0xb0] sm:$0xf] %v1440_v18  ;;  %v667_v26 = vpop.f32.mrf.mxu1 }
 0x171   :  { %v746_v22 = vadd.f32 %v745_v20, %v577_v19  ;;  %v668_v28 = vadd.f32 %v667_v26, %v499_v25 }
 0x173   :  { %v824_v27 = vmax.f32 %v746_v22, 0.0  ;;  %v793_v31 = vmax.f32 %v668_v28, 0.0 }
 0x175   :  { %v1472_v29 = vpack.c.bf16 %v824_v27, %v824_v27  ;;  %v578_v32 = vpop.f32.mrf.mxu2  ;;  %v1441_v34 = vpack.c.bf16 %v793_v31, %v793_v31 }
 0x176   :  { %v579_v35 = vadd.f32 %v5666_v24, %v578_v32  ;;  %v501_v38 = vpop.f32.mrf.mxu0 }
 0x177   :  { %1536 = vst [vmem:[#allocation2 + $0x1b0] sm:$0xf] %v1472_v29  ;;  %v502_v13 = vadd.f32 %v5666_v24, %v501_v38  ;;  %v4752_v29 = vld [vmem:[#allocation2 + $0x64] sm:$0xf0] }
 0x178   :  { %v747_v1 = vpop.f32.mrf.mxu3  ;;  %1505 = vst [vmem:[#allocation2 + $0xb8] sm:$0xf] %v1441_v34  ;;  %v670_v41 = vpop.f32.mrf.mxu1  ;;  %v4751_v34 = vld [vmem:[#allocation2 + $0x64] sm:$0xf] }
 0x179   :  { %v748_v40 = vadd.f32 %v747_v1, %v579_v35  ;;  %v671_v45 = vadd.f32 %v670_v41, %v502_v13  ;;  %2622 = vmatmul.bf16.gmra.mxu0 %v4246_v42  ;;  %v4263_v35 = vld [vmem:[#allocation2 + $0x68] sm:$0xf0] }
 0x17a   :  { %2284 = vmatmul.bf16.gmra.mxu2 %v4246_v42  ;;  %v4266_v13 = vor.u32 %v4751_v34, %v4263_v35  ;;  %v1770_v34 = vld [vmem:[%s6458_s7] sm:$0x3] }
 0x17b   :  { %v825_v44 = vmax.f32 %v748_v40, 0.0  ;;  %2791 = vmatmul.bf16.gmra.mxu1 %v4250_v43  ;;  %v794_v47 = vmax.f32 %v671_v45, 0.0  ;;  %v4262_v40 = vor.u32 %v4752_v29, %v4261_v36 }
 0x17d   :  { %2453 = vmatmul.bf16.gmra.mxu3 %v4250_v43  ;;  %v1473_v46 = vpack.c.bf16 %v825_v44, %v825_v44  ;;  %v581_v48 = vpop.f32.mrf.mxu2  ;;  %v1442_v49 = vpack.c.bf16 %v794_v47, %v794_v47 }
 0x17e   :  { %v582_v50 = vadd.f32 %v5666_v24, %v581_v48  ;;  %v503_v23 = vpop.f32.mrf.mxu0 }
 0x17f   :  { %1537 = vst [vmem:[#allocation2 + $0x1b8] sm:$0xf] %v1473_v46  ;;  %v504_v53 = vadd.f32 %v5666_v24, %v503_v23 }
 0x180   :  { %v750_v51 = vpop.f32.mrf.mxu3  ;;  %1506 = vst [vmem:[#allocation2 + $0xc0] sm:$0xf] %v1442_v49  ;;  %v672_v54 = vpop.f32.mrf.mxu1  ;;  %v4637_v49 = vld [vmem:[%s6459_s8 + $0x50] sm:$0xf] }
 0x181   :  { %v751_v52 = vadd.f32 %v750_v51, %v582_v50  ;;  %v673_v56 = vadd.f32 %v672_v54, %v504_v53  ;;  %v4846_v50 = vld [vmem:[%s6459_s8 + $0x54] sm:$0xf0] }
 0x182   :  { %v4638_v23 = vor.u32 %v4846_v50, %v4637_v49  ;;  %v4862_v53 = vld [vmem:[%s6459_s8 + $0xd4] sm:$0xf0] }
 0x183   :  { %v826_v55 = vmax.f32 %v751_v52, 0.0  ;;  %v795_v58 = vmax.f32 %v673_v56, 0.0  ;;  %v4701_v52 = vld [vmem:[%s6459_s8 + $0xd0] sm:$0xf] }
 0x184   :  { %3324 = vmatpush.bf16.msra.mxu2 %v4638_v23 }
 0x185   :  { %v1474_v57 = vpack.c.bf16 %v826_v55, %v826_v55  ;;  %v583_v59 = vpop.f32.mrf.mxu2  ;;  %v1443_v61 = vpack.c.bf16 %v795_v58, %v795_v58 }
 0x186   :  { %v584_v62 = vadd.f32 %v5666_v24, %v583_v59  ;;  %v506_v2 = vpop.f32.mrf.mxu0 }
 0x187   :  { %1538 = vst [vmem:[#allocation2 + $0x1c0] sm:$0xf] %v1474_v57  ;;  %v507_v5 = vadd.f32 %v5666_v24, %v506_v2  ;;  %v4702_v57 = vor.u32 %v4862_v53, %v4701_v52  ;;  %v5805_v53 = vperm.slane %v1770_v34, 0 }
 0x188   :  { %v752_v63 = vpop.f32.mrf.mxu3  ;;  %1507 = vst [vmem:[#allocation2 + $0xc8] sm:$0xf] %v1443_v61  ;;  %v675_v6 = vpop.f32.mrf.mxu1 }
 0x189   :  { %v753_v4 = vadd.f32 %v752_v63, %v584_v62  ;;  %v676_v9 = vadd.f32 %v675_v6, %v507_v5  ;;  %2627 = vmatmul.bf16.gmra.mxu0 %v4254_v7  ;;  %3493 = vmatpush.bf16.msra.mxu3 %v4702_v57  ;;  %v4754_v63 = vld [vmem:[#allocation2 + $0x74] sm:$0xf0]  ;;  %v4845_v5 = vld [vmem:[%s6459_s8 + $0x54] sm:$0xf]  ;;  %v4639_v6 = vld [vmem:[%s6459_s8 + $0x58] sm:$0xf0] }
 0x18a   :  { %2289 = vmatmul.bf16.gmra.mxu2 %v4254_v7 }
 0x18b   :  { %v827_v12 = vmax.f32 %v753_v4, 0.0  ;;  %2796 = vmatmul.bf16.gmra.mxu1 %v4258_v8  ;;  %v796_v11 = vmax.f32 %v676_v9, 0.0  ;;  %v4861_v9 = vld [vmem:[%s6459_s8 + $0xd4] sm:$0xf] }
 0x18d   :  { %2458 = vmatmul.bf16.gmra.mxu3 %v4258_v8  ;;  %v1475_v10 = vpack.c.bf16 %v827_v12, %v827_v12  ;;  %v586_v14 = vpop.f32.mrf.mxu2  ;;  %v1444_v15 = vpack.c.bf16 %v796_v11, %v796_v11  ;;  %v4269_v8 = vld [vmem:[#allocation2 + $0x70] sm:$0xf]  ;;  %v4642_v12 = vor.u32 %v4845_v5, %v4639_v6  ;;  %v4757_v5 = vld [vmem:[#allocation2 + $0x94] sm:$0xf]  ;;  %v4287_v6 = vld [vmem:[#allocation2 + $0x98] sm:$0xf0] }
 0x18e   :  { %v587_v16 = vadd.f32 %v5666_v24, %v586_v14  ;;  %v508_v18 = vpop.f32.mrf.mxu0 }
 0x18f   :  { %1539 = vst [vmem:[#allocation2 + $0x1c8] sm:$0xf] %v1475_v10  ;;  %v509_v20 = vadd.f32 %v5666_v24, %v508_v18  ;;  %v4703_v10 = vld [vmem:[%s6459_s8 + $0xd8] sm:$0xf0]  ;;  %v4274_v18 = vor.u32 %v4753_v30, %v4271_v0  ;;  %3662 = vmatpush.bf16.msra.mxu0 %v4642_v12  ;;  %v4758_v0 = vld [vmem:[#allocation2 + $0x94] sm:$0xf0] }
 0x190   :  { %v755_v17 = vpop.f32.mrf.mxu3  ;;  %1508 = vst [vmem:[#allocation2 + $0xd0] sm:$0xf] %v1444_v15  ;;  %v677_v21 = vpop.f32.mrf.mxu1 }
 0x191   :  { %v756_v19 = vadd.f32 %v755_v17, %v587_v16  ;;  %v678_v25 = vadd.f32 %v677_v21, %v509_v20  ;;  %v4270_v16 = vor.u32 %v4754_v63, %v4269_v8  ;;  %v4706_v17 = vor.u32 %v4861_v9, %v4703_v10  ;;  %v4285_v8 = vld [vmem:[#allocation2 + $0x90] sm:$0xf] }
 0x193   :  { %v828_v22 = vmax.f32 %v756_v19, 0.0  ;;  %v797_v27 = vmax.f32 %v678_v25, 0.0  ;;  %3831 = vmatpush.bf16.msra.mxu1 %v4706_v17 }
 0x195   :  { %v1476_v26 = vpack.c.bf16 %v828_v22, %v828_v22  ;;  %v588_v28 = vpop.f32.mrf.mxu2  ;;  %v1445_v31 = vpack.c.bf16 %v797_v27, %v797_v27 }
 0x196   :  { %v589_v32 = vadd.f32 %v5666_v24, %v588_v28  ;;  %v511_v1 = vpop.f32.mrf.mxu0 }
 0x197   :  { %1540 = vst [vmem:[#allocation2 + $0x1d0] sm:$0xf] %v1476_v26  ;;  %v512_v38 = vadd.f32 %v5666_v24, %v511_v1 }
 0x198   :  { %v757_v33 = vpop.f32.mrf.mxu3  ;;  %1509 = vst [vmem:[#allocation2 + $0xd8] sm:$0xf] %v1445_v31  ;;  %v680_v39 = vpop.f32.mrf.mxu1 }
 0x199   :  { %v758_v37 = vadd.f32 %v757_v33, %v589_v32  ;;  %v681_v42 = vadd.f32 %v680_v39, %v512_v38  ;;  %2632 = vmatmul.bf16.gmra.mxu0 %v4262_v40  ;;  %v5801_v38 = vperm.slane %v1770_v34, 1 }
 0x19a   :  { %2294 = vmatmul.bf16.gmra.mxu2 %v4262_v40  ;;  %v4756_v40 = vld [vmem:[#allocation2 + $0x84] sm:$0xf0] }
 0x19b   :  { %v829_v41 = vmax.f32 %v758_v37, 0.0  ;;  %2801 = vmatmul.bf16.gmra.mxu1 %v4266_v13  ;;  %v798_v44 = vmax.f32 %v681_v42, 0.0 }
 0x19d   :  { %2463 = vmatmul.bf16.gmra.mxu3 %v4266_v13  ;;  %v1477_v43 = vpack.c.bf16 %v829_v41, %v829_v41  ;;  %v591_v45 = vpop.f32.mrf.mxu2  ;;  %v1446_v46 = vpack.c.bf16 %v798_v44, %v798_v44  ;;  %v4279_v44 = vld [vmem:[#allocation2 + $0x88] sm:$0xf0] }
 0x19e   :  { %v592_v47 = vadd.f32 %v5666_v24, %v591_v45  ;;  %v513_v51 = vpop.f32.mrf.mxu0 }
 0x19f   :  { %1541 = vst [vmem:[#allocation2 + $0x1d8] sm:$0xf] %v1477_v43  ;;  %v514_v55 = vadd.f32 %v5666_v24, %v513_v51  ;;  %v4755_v43 = vld [vmem:[#allocation2 + $0x84] sm:$0xf] }
 0x1a0   :  { %v760_v48 = vpop.f32.mrf.mxu3  ;;  %1510 = vst [vmem:[#allocation2 + $0xe0] sm:$0xf] %v1446_v46  ;;  %v682_v56 = vpop.f32.mrf.mxu1  ;;  %v4277_v46 = vld [vmem:[#allocation2 + $0x80] sm:$0xf]  ;;  %v4282_v51 = vor.u32 %v4755_v43, %v4279_v44 }
 0x1a1   :  { %v761_v54 = vadd.f32 %v760_v48, %v592_v47  ;;  %v683_v59 = vadd.f32 %v682_v56, %v514_v55  ;;  %v4278_v50 = vor.u32 %v4756_v40, %v4277_v46  ;;  %v4293_v40 = vld [vmem:[#allocation2 + $0xa0] sm:$0xf] }
 0x1a3   :  { %v830_v58 = vmax.f32 %v761_v54, 0.0  ;;  %v799_v61 = vmax.f32 %v683_v59, 0.0 }
 0x1a5   :  { %v1478_v60 = vpack.c.bf16 %v830_v58, %v830_v58  ;;  %v593_v62 = vpop.f32.mrf.mxu2  ;;  %v1447_v2 = vpack.c.bf16 %v799_v61, %v799_v61 }
 0x1a6   :  { %v594_v3 = vadd.f32 %v5666_v24, %v593_v62  ;;  %v516_v7 = vpop.f32.mrf.mxu0 }
 0x1a7   :  { %1542 = vst [vmem:[#allocation2 + $0x1e0] sm:$0xf] %v1478_v60  ;;  %v517_v14 = vadd.f32 %v5666_v24, %v516_v7 }
 0x1a8   :  { %v762_v4 = vpop.f32.mrf.mxu3  ;;  %1511 = vst [vmem:[#allocation2 + $0xe8] sm:$0xf] %v1447_v2  ;;  %v685_v15 = vpop.f32.mrf.mxu1 }
 0x1a9   :  { %v763_v11 = vadd.f32 %v762_v4, %v594_v3  ;;  %v686_v20 = vadd.f32 %v685_v15, %v517_v14  ;;  %2637 = vmatmul.bf16.gmra.mxu0 %v4270_v16  ;;  %v4290_v14 = vor.u32 %v4757_v5, %v4287_v6  ;;  %v4859_v6 = vld [vmem:[%s6459_s8 + $0xc4] sm:$0xf] }
 0x1aa   :  { %2299 = vmatmul.bf16.gmra.mxu2 %v4270_v16 }
 0x1ab   :  { %v831_v19 = vmax.f32 %v763_v11, 0.0  ;;  %2806 = vmatmul.bf16.gmra.mxu1 %v4274_v18  ;;  %v800_v22 = vmax.f32 %v686_v20, 0.0  ;;  %v4286_v11 = vor.u32 %v4758_v0, %v4285_v8  ;;  %v4631_v0 = vld [vmem:[%s6459_s8 + $0x48] sm:$0xf0] }
 0x1ad   :  { %2468 = vmatmul.bf16.gmra.mxu3 %v4274_v18  ;;  %v1479_v21 = vpack.c.bf16 %v831_v19, %v831_v19  ;;  %v596_v25 = vpop.f32.mrf.mxu2  ;;  %v1448_v26 = vpack.c.bf16 %v800_v22, %v800_v22 }
 0x1ae   :  { %v597_v27 = vadd.f32 %v5666_v24, %v596_v25  ;;  %v518_v29 = vpop.f32.mrf.mxu0 }
 0x1af   :  { %1543 = vst [vmem:[#allocation2 + $0x1e8] sm:$0xf] %v1479_v21  ;;  %v519_v32 = vadd.f32 %v5666_v24, %v518_v29 }
 0x1b0   :  { %v765_v28 = vpop.f32.mrf.mxu3  ;;  %1512 = vst [vmem:[#allocation2 + $0xf0] sm:$0xf] %v1448_v26  ;;  %v687_v33 = vpop.f32.mrf.mxu1 }
 0x1b1   :  { %v766_v31 = vadd.f32 %v765_v28, %v597_v27  ;;  %v688_v1 = vadd.f32 %v687_v33, %v519_v32  ;;  %v4760_v33 = vld [vmem:[#allocation2 + $0xa4] sm:$0xf0] }
 0x1b2   :  { %v4294_v43 = vor.u32 %v4760_v33, %v4293_v40 }
 0x1b3   :  { %v832_v35 = vmax.f32 %v766_v31, 0.0  ;;  %v801_v37 = vmax.f32 %v688_v1, 0.0  ;;  %v4759_v1 = vld [vmem:[#allocation2 + $0xa4] sm:$0xf] }
 0x1b5   :  { %v1480_v36 = vpack.c.bf16 %v832_v35, %v832_v35  ;;  %v598_v39 = vpop.f32.mrf.mxu2  ;;  %v1449_v13 = vpack.c.bf16 %v801_v37, %v801_v37 }
 0x1b6   :  { %v599_v41 = vadd.f32 %v5666_v24, %v598_v39  ;;  %v2603_v45 = vpop.f32.mrf.mxu0 }
 0x1b7   :  { %1544 = vst [vmem:[#allocation2 + $0x1f0] sm:$0xf] %v1480_v36  ;;  %v2604_v48 = vadd.f32 %v2603_v45, %v5801_v38  ;;  %v4295_v36 = vld [vmem:[#allocation2 + $0xa8] sm:$0xf0] }
 0x1b8   :  { %v767_v42 = vpop.f32.mrf.mxu3  ;;  %1513 = vst [vmem:[#allocation2 + $0xf8] sm:$0xf] %v1449_v13  ;;  %v2772_v49 = vpop.f32.mrf.mxu1  ;;  %v4298_v44 = vor.u32 %v4759_v1, %v4295_v36 }
 0x1b9   :  { %v768_v47 = vadd.f32 %v767_v42, %v599_v41  ;;  %v2773_v52 = vadd.f32 %v2772_v49, %v2604_v48  ;;  %2642 = vmatmul.bf16.gmra.mxu0 %v4278_v50  ;;  %v4629_v48 = vld [vmem:[%s6459_s8 + $0x40] sm:$0xf]  ;;  %v4844_v49 = vld [vmem:[%s6459_s8 + $0x44] sm:$0xf0] }
 0x1ba   :  { %2304 = vmatmul.bf16.gmra.mxu2 %v4278_v50 }
 0x1bb   :  { %v833_v23 = vmax.f32 %v768_v47, 0.0  ;;  %2811 = vmatmul.bf16.gmra.mxu1 %v4282_v51  ;;  %v2933_v62 = vmax.f32 %v2773_v52, 0.0  ;;  %v4693_v52 = vld [vmem:[%s6459_s8 + $0xc0] sm:$0xf] }
 0x1bd   :  { %2473 = vmatmul.bf16.gmra.mxu3 %v4282_v51  ;;  %v1481_v24 = vpack.c.bf16 %v833_v23, %v833_v23  ;;  %v2265_v54 = vpop.f32.mrf.mxu2  ;;  %v4630_v23 = vor.u32 %v4844_v49, %v4629_v48  ;;  %v4309_v48 = vld [vmem:[#allocation2 + $0xc0] sm:$0xf] }
 0x1be   :  { %v2266_v55 = vadd.f32 %v2265_v54, %v5805_v53  ;;  %v2605_v57 = vpop.f32.mrf.mxu0 }
 0x1bf   :  { %1545 = vst [vmem:[#allocation2 + $0x1f8] sm:$0xf] %v1481_v24  ;;  %v2606_v59 = vadd.f32 %v2605_v57, %v5801_v38  ;;  %v4860_v24 = vld [vmem:[%s6459_s8 + $0xc4] sm:$0xf0]  ;;  %3325 = vmatpush.bf16.msra.mxu2 %v4630_v23 }
 0x1c0   :  { %v2434_v56 = vpop.f32.mrf.mxu3  ;;  %v2774_v60 = vpop.f32.mrf.mxu1 }
 0x1c1   :  { %v2435_v58 = vadd.f32 %v2434_v56, %v2266_v55  ;;  %v2775_v61 = vadd.f32 %v2774_v60, %v2606_v59  ;;  %v4694_v56 = vor.u32 %v4860_v24, %v4693_v52 }
 0x1c3   :  { %v2935_v63 = vmax.f32 %v2775_v61, 0.0  ;;  %v2932_v15 = vmax.f32 %v2435_v58, 0.0  ;;  %3494 = vmatpush.bf16.msra.mxu3 %v4694_v56 }
 0x1c5   :  { %v2267_v30 = vpop.f32.mrf.mxu2  ;;  %v5809_v2 = vpack.c.bf16 %v2935_v63, %v2933_v62 }
 0x1c6   :  { %v2268_v3 = vadd.f32 %v2267_v30, %v5805_v53  ;;  %v2608_v7 = vpop.f32.mrf.mxu0  ;;  %v4843_v30 = vld [vmem:[%s6459_s8 + $0x44] sm:$0xf] }
 0x1c7   :  { %v2609_v9 = vadd.f32 %v2608_v7, %v5801_v38  ;;  %v4634_v5 = vor.u32 %v4843_v30, %v4631_v0  ;;  %v4695_v7 = vld [vmem:[%s6459_s8 + $0xc8] sm:$0xf0] }
 0x1c8   :  { %v2436_v4 = vpop.f32.mrf.mxu3  ;;  %v2777_v10 = vpop.f32.mrf.mxu1 }
 0x1c9   :  { %v2437_v12 = vadd.f32 %v2436_v4, %v2268_v3  ;;  %v2778_v17 = vadd.f32 %v2777_v10, %v2609_v9  ;;  %2647 = vmatmul.bf16.gmra.mxu0 %v4286_v11  ;;  %v4762_v4 = vld [vmem:[#allocation2 + $0xb4] sm:$0xf0]  ;;  %v4761_v9 = vld [vmem:[#allocation2 + $0xb4] sm:$0xf]  ;;  %v4303_v10 = vld [vmem:[#allocation2 + $0xb8] sm:$0xf0] }
 0x1ca   :  { %2309 = vmatmul.bf16.gmra.mxu2 %v4286_v11  ;;  %v4698_v11 = vor.u32 %v4859_v6, %v4695_v7  ;;  %3663 = vmatpush.bf16.msra.mxu0 %v4634_v5  ;;  %v4766_v6 = vld [vmem:[#allocation2 + $0xd4] sm:$0xf0] }
 0x1cb   :  { %v2934_v16 = vmax.f32 %v2437_v12, 0.0  ;;  %2816 = vmatmul.bf16.gmra.mxu1 %v4290_v14  ;;  %v2937_v29 = vmax.f32 %v2778_v17, 0.0 }
 0x1cc   :  { %3832 = vmatpush.bf16.msra.mxu1 %v4698_v11 }
 0x1cd   :  { %2478 = vmatmul.bf16.gmra.mxu3 %v4290_v14  ;;  %v5813_v18 = vpack.c.bf16 %v2934_v16, %v2932_v15  ;;  %v2270_v19 = vpop.f32.mrf.mxu2  ;;  %v4301_v16 = vld [vmem:[#allocation2 + $0xb0] sm:$0xf] }
 0x1ce   :  { %v2271_v20 = vadd.f32 %v2270_v19, %v5805_v53  ;;  %v2610_v22 = vpop.f32.mrf.mxu0 }
 0x1cf   :  { %v2611_v26 = vadd.f32 %v2610_v22, %v5801_v38  ;;  %v4306_v22 = vor.u32 %v4761_v9, %v4303_v10  ;;  %v4319_v9 = vld [vmem:[#allocation2 + $0xd8] sm:$0xf0] }
 0x1d0   :  { %v2439_v21 = vpop.f32.mrf.mxu3  ;;  %v2779_v27 = vpop.f32.mrf.mxu1 }
 0x1d1   :  { %v2440_v25 = vadd.f32 %v2439_v21, %v2271_v20  ;;  %v2780_v28 = vadd.f32 %v2779_v27, %v2611_v26  ;;  %v4302_v21 = vor.u32 %v4762_v4, %v4301_v16 }
 0x1d3   :  { %v2939_v31 = vmax.f32 %v2780_v28, 0.0  ;;  %v2936_v45 = vmax.f32 %v2440_v25, 0.0 }
 0x1d5   :  { %v2272_v32 = vpop.f32.mrf.mxu2  ;;  %v5818_v37 = vpack.c.bf16 %v2939_v31, %v2937_v29 }
 0x1d6   :  { %v2273_v34 = vadd.f32 %v2272_v32, %v5805_v53  ;;  %v2613_v39 = vpop.f32.mrf.mxu0 }
 0x1d7   :  { %v2614_v41 = vadd.f32 %v2613_v39, %v5801_v38 }
 0x1d8   :  { %v2441_v35 = vpop.f32.mrf.mxu3  ;;  %v2782_v42 = vpop.f32.mrf.mxu1 }
 0x1d9   :  { %v2442_v13 = vadd.f32 %v2441_v35, %v2273_v34  ;;  %v2783_v47 = vadd.f32 %v2782_v42, %v2614_v41  ;;  %2652 = vmatmul.bf16.gmra.mxu0 %v4294_v43  ;;  %v4764_v41 = vld [vmem:[#allocation2 + $0xc4] sm:$0xf0] }
 0x1da   :  { %2314 = vmatmul.bf16.gmra.mxu2 %v4294_v43  ;;  %v4310_v52 = vor.u32 %v4764_v41, %v4309_v48  ;;  %v4768_v41 = vld [vmem:[#allocation2 + $0xe4] sm:$0xf0] }
 0x1db   :  { %v2938_v46 = vmax.f32 %v2442_v13, 0.0  ;;  %2821 = vmatmul.bf16.gmra.mxu1 %v4298_v44  ;;  %v2941_v62 = vmax.f32 %v2783_v47, 0.0 }
 0x1dd   :  { %2483 = vmatmul.bf16.gmra.mxu3 %v4298_v44  ;;  %v5827_v50 = vpack.c.bf16 %v2938_v46, %v2936_v45  ;;  %v2275_v51 = vpop.f32.mrf.mxu2  ;;  %v4763_v44 = vld [vmem:[#allocation2 + $0xc4] sm:$0xf]  ;;  %v4311_v45 = vld [vmem:[#allocation2 + $0xc8] sm:$0xf0] }
 0x1de   :  { %v2276_v54 = vadd.f32 %v2275_v51, %v5805_v53  ;;  %v2615_v57 = vpop.f32.mrf.mxu0  ;;  %v4314_v24 = vor.u32 %v4763_v44, %v4311_v45  ;;  %v4767_v44 = vld [vmem:[#allocation2 + $0xe4] sm:$0xf]  ;;  %v4327_v45 = vld [vmem:[#allocation2 + $0xe8] sm:$0xf0] }
 0x1df   :  { %v2616_v59 = vadd.f32 %v2615_v57, %v5801_v38 }
 0x1e0   :  { %v2444_v55 = vpop.f32.mrf.mxu3  ;;  %v2784_v60 = vpop.f32.mrf.mxu1 }
 0x1e1   :  { %v2445_v58 = vadd.f32 %v2444_v55, %v2276_v54  ;;  %v2785_v61 = vadd.f32 %v2784_v60, %v2616_v59 }
 0x1e3   :  { %v2943_v63 = vmax.f32 %v2785_v61, 0.0  ;;  %v2940_v25 = vmax.f32 %v2445_v58, 0.0 }
 0x1e5   :  { %v2277_v3 = vpop.f32.mrf.mxu2  ;;  %v5850_v14 = vpack.c.bf16 %v2943_v63, %v2941_v62 }
 0x1e6   :  { %v2278_v8 = vadd.f32 %v2277_v3, %v5805_v53  ;;  %v2618_v15 = vpop.f32.mrf.mxu0 }
 0x1e7   :  { %v2619_v19 = vadd.f32 %v2618_v15, %v5801_v38  ;;  %v4317_v15 = vld [vmem:[#allocation2 + $0xd0] sm:$0xf] }
 0x1e8   :  { %v2446_v12 = vpop.f32.mrf.mxu3  ;;  %v2787_v20 = vpop.f32.mrf.mxu1 }
 0x1e9   :  { %v2447_v17 = vadd.f32 %v2446_v12, %v2278_v8  ;;  %v2788_v27 = vadd.f32 %v2787_v20, %v2619_v19  ;;  %2657 = vmatmul.bf16.gmra.mxu0 %v4302_v21  ;;  %v4765_v12 = vld [vmem:[#allocation2 + $0xd4] sm:$0xf]  ;;  %v4318_v20 = vor.u32 %v4766_v6, %v4317_v15 }
 0x1ea   :  { %2319 = vmatmul.bf16.gmra.mxu2 %v4302_v21  ;;  %v4322_v21 = vor.u32 %v4765_v12, %v4319_v9 }
 0x1eb   :  { %v2942_v26 = vmax.f32 %v2447_v17, 0.0  ;;  %2826 = vmatmul.bf16.gmra.mxu1 %v4306_v22  ;;  %v2945_v39 = vmax.f32 %v2788_v27, 0.0 }
 0x1ed   :  { %2488 = vmatmul.bf16.gmra.mxu3 %v4306_v22  ;;  %v5853_v28 = vpack.c.bf16 %v2942_v26, %v2940_v25  ;;  %v2280_v29 = vpop.f32.mrf.mxu2 }
 0x1ee   :  { %v2281_v31 = vadd.f32 %v2280_v29, %v5805_v53  ;;  %v2620_v33 = vpop.f32.mrf.mxu0 }
 0x1ef   :  { %v2621_v35 = vadd.f32 %v2620_v33, %v5801_v38 }
 0x1f0   :  { %v2449_v32 = vpop.f32.mrf.mxu3  ;;  %v2789_v1 = vpop.f32.mrf.mxu1 }
 0x1f1   :  { %v2450_v34 = vadd.f32 %v2449_v32, %v2281_v31  ;;  %v2790_v36 = vadd.f32 %v2789_v1, %v2621_v35 }
 0x1f3   :  { %v2947_v40 = vmax.f32 %v2790_v36, 0.0  ;;  %v2944_v54 = vmax.f32 %v2450_v34, 0.0 }
 0x1f5   :  { %v2282_v13 = vpop.f32.mrf.mxu2  ;;  %v5858_v46 = vpack.c.bf16 %v2947_v40, %v2945_v39 }
 0x1f6   :  { %v2283_v42 = vadd.f32 %v2282_v13, %v5805_v53  ;;  %v2623_v47 = vpop.f32.mrf.mxu0 }
 0x1f7   :  { %v2624_v51 = vadd.f32 %v2623_v47, %v5801_v38 }
 0x1f8   :  { %v2451_v43 = vpop.f32.mrf.mxu3  ;;  %v2792_v23 = vpop.f32.mrf.mxu1 }
 0x1f9   :  { %v2452_v49 = vadd.f32 %v2451_v43, %v2283_v42  ;;  %v2793_v56 = vadd.f32 %v2792_v23, %v2624_v51  ;;  %2662 = vmatmul.bf16.gmra.mxu0 %v4310_v52 }
 0x1fa   :  { %2324 = vmatmul.bf16.gmra.mxu2 %v4310_v52 }
 0x1fb   :  { %v2946_v55 = vmax.f32 %v2452_v49, 0.0  ;;  %2831 = vmatmul.bf16.gmra.mxu1 %v4314_v24  ;;  %v2949_v3 = vmax.f32 %v2793_v56, 0.0  ;;  %v4325_v49 = vld [vmem:[#allocation2 + $0xe0] sm:$0xf] }
 0x1fd   :  { %2493 = vmatmul.bf16.gmra.mxu3 %v4314_v24  ;;  %v5861_v57 = vpack.c.bf16 %v2946_v55, %v2944_v54  ;;  %v2285_v58 = vpop.f32.mrf.mxu2  ;;  %v4326_v24 = vor.u32 %v4768_v41, %v4325_v49  ;;  %v4330_v54 = vor.u32 %v4767_v44, %v4327_v45 }
 0x1fe   :  { %v2286_v59 = vadd.f32 %v2285_v58, %v5805_v53  ;;  %v2625_v61 = vpop.f32.mrf.mxu0 }
 0x1ff   :  { %v2626_v63 = vadd.f32 %v2625_v61, %v5801_v38 }
 0x200   :  { %v2454_v60 = vpop.f32.mrf.mxu3  ;;  %v2794_v30 = vpop.f32.mrf.mxu1 }
 0x201   :  { %v2455_v62 = vadd.f32 %v2454_v60, %v2286_v59  ;;  %v2795_v0 = vadd.f32 %v2794_v30, %v2626_v63  ;;  %v4621_v59 = vld [vmem:[%s6459_s8 + $0x30] sm:$0xf]  ;;  %v4842_v60 = vld [vmem:[%s6459_s8 + $0x34] sm:$0xf0] }
 0x202   :  { %v4622_v63 = vor.u32 %v4842_v60, %v4621_v59  ;;  %v4685_v30 = vld [vmem:[%s6459_s8 + $0xb0] sm:$0xf]  ;;  %v4772_v60 = vld [vmem:[#allocation2 + $0x104] sm:$0xf0] }
 0x203   :  { %v2951_v4 = vmax.f32 %v2795_v0, 0.0  ;;  %v2948_v22 = vmax.f32 %v2455_v62, 0.0  ;;  %v4858_v0 = vld [vmem:[%s6459_s8 + $0xb4] sm:$0xf0] }
 0x204   :  { %3326 = vmatpush.bf16.msra.mxu2 %v4622_v63 }
 0x205   :  { %v2287_v5 = vpop.f32.mrf.mxu2  ;;  %v5866_v10 = vpack.c.bf16 %v2951_v4, %v2949_v3 }
 0x206   :  { %v2288_v7 = vadd.f32 %v2287_v5, %v5805_v53  ;;  %v2628_v11 = vpop.f32.mrf.mxu0  ;;  %v4686_v5 = vor.u32 %v4858_v0, %v4685_v30  ;;  %v4771_v30 = vld [vmem:[#allocation2 + $0x104] sm:$0xf]  ;;  %v4343_v0 = vld [vmem:[#allocation2 + $0x108] sm:$0xf0] }
 0x207   :  { %v2629_v17 = vadd.f32 %v2628_v11, %v5801_v38 }
 0x208   :  { %v2456_v8 = vpop.f32.mrf.mxu3  ;;  %v2797_v19 = vpop.f32.mrf.mxu1  ;;  %3495 = vmatpush.bf16.msra.mxu3 %v4686_v5  ;;  %v4341_v5 = vld [vmem:[#allocation2 + $0x100] sm:$0xf] }
 0x209   :  { %v2457_v16 = vadd.f32 %v2456_v8, %v2288_v7  ;;  %v2798_v26 = vadd.f32 %v2797_v19, %v2629_v17  ;;  %2667 = vmatmul.bf16.gmra.mxu0 %v4318_v20  ;;  %v4623_v17 = vld [vmem:[%s6459_s8 + $0x38] sm:$0xf0] }
 0x20a   :  { %2329 = vmatmul.bf16.gmra.mxu2 %v4318_v20  ;;  %v4770_v20 = vld [vmem:[#allocation2 + $0xf4] sm:$0xf0] }
 0x20b   :  { %v2950_v25 = vmax.f32 %v2457_v16, 0.0  ;;  %2836 = vmatmul.bf16.gmra.mxu1 %v4322_v21  ;;  %v2953_v39 = vmax.f32 %v2798_v26, 0.0  ;;  %v4841_v16 = vld [vmem:[%s6459_s8 + $0x34] sm:$0xf] }
 0x20d   :  { %2498 = vmatmul.bf16.gmra.mxu3 %v4322_v21  ;;  %v5869_v27 = vpack.c.bf16 %v2950_v25, %v2948_v22  ;;  %v2290_v29 = vpop.f32.mrf.mxu2  ;;  %v4626_v21 = vor.u32 %v4841_v16, %v4623_v17  ;;  %v4857_v22 = vld [vmem:[%s6459_s8 + $0xb4] sm:$0xf]  ;;  %v4687_v25 = vld [vmem:[%s6459_s8 + $0xb8] sm:$0xf0] }
 0x20e   :  { %v2291_v31 = vadd.f32 %v2290_v29, %v5805_v53  ;;  %v2630_v33 = vpop.f32.mrf.mxu0 }
 0x20f   :  { %v2631_v35 = vadd.f32 %v2630_v33, %v5801_v38  ;;  %v4690_v33 = vor.u32 %v4857_v22, %v4687_v25  ;;  %3664 = vmatpush.bf16.msra.mxu0 %v4626_v21 }
 0x210   :  { %v2459_v32 = vpop.f32.mrf.mxu3  ;;  %v2799_v1 = vpop.f32.mrf.mxu1 }
 0x211   :  { %v2460_v34 = vadd.f32 %v2459_v32, %v2291_v31  ;;  %v2800_v36 = vadd.f32 %v2799_v1, %v2631_v35  ;;  %v4769_v31 = vld [vmem:[#allocation2 + $0xf4] sm:$0xf]  ;;  %v4335_v32 = vld [vmem:[#allocation2 + $0xf8] sm:$0xf0]  ;;  %v4333_v1 = vld [vmem:[#allocation2 + $0xf0] sm:$0xf]  ;;  %3833 = vmatpush.bf16.msra.mxu1 %v4690_v33 }
 0x212   :  { %v4338_v41 = vor.u32 %v4769_v31, %v4335_v32 }
 0x213   :  { %v2955_v40 = vmax.f32 %v2800_v36, 0.0  ;;  %v2952_v55 = vmax.f32 %v2460_v34, 0.0 }
 0x215   :  { %v2292_v13 = vpop.f32.mrf.mxu2  ;;  %v5874_v47 = vpack.c.bf16 %v2955_v40, %v2953_v39 }
 0x216   :  { %v2293_v42 = vadd.f32 %v2292_v13, %v5805_v53  ;;  %v2633_v48 = vpop.f32.mrf.mxu0  ;;  %v4334_v13 = vor.u32 %v4770_v20, %v4333_v1  ;;  %v4774_v1 = vld [vmem:[#allocation2 + $0x114] sm:$0xf0] }
 0x217   :  { %v2634_v23 = vadd.f32 %v2633_v48, %v5801_v38 }
 0x218   :  { %v2461_v43 = vpop.f32.mrf.mxu3  ;;  %v2802_v52 = vpop.f32.mrf.mxu1 }
 0x219   :  { %v2462_v51 = vadd.f32 %v2461_v43, %v2293_v42  ;;  %v2803_v58 = vadd.f32 %v2802_v52, %v2634_v23  ;;  %2672 = vmatmul.bf16.gmra.mxu0 %v4326_v24 }
 0x21a   :  { %2334 = vmatmul.bf16.gmra.mxu2 %v4326_v24 }
 0x21b   :  { %v2954_v56 = vmax.f32 %v2462_v51, 0.0  ;;  %2841 = vmatmul.bf16.gmra.mxu1 %v4330_v54  ;;  %v2957_v11 = vmax.f32 %v2803_v58, 0.0 }
 0x21d   :  { %2503 = vmatmul.bf16.gmra.mxu3 %v4330_v54  ;;  %v5883_v61 = vpack.c.bf16 %v2954_v56, %v2952_v55  ;;  %v2295_v62 = vpop.f32.mrf.mxu2 }
 0x21e   :  { %v2296_v3 = vadd.f32 %v2295_v62, %v5805_v53  ;;  %v2635_v6 = vpop.f32.mrf.mxu0 }
 0x21f   :  { %v2636_v8 = vadd.f32 %v2635_v6, %v5801_v38 }
 0x220   :  { %v2464_v4 = vpop.f32.mrf.mxu3  ;;  %v2804_v12 = vpop.f32.mrf.mxu1 }
 0x221   :  { %v2465_v7 = vadd.f32 %v2464_v4, %v2296_v3  ;;  %v2805_v9 = vadd.f32 %v2804_v12, %v2636_v8  ;;  %v4342_v12 = vor.u32 %v4772_v60, %v4341_v5 }
 0x223   :  { %v2959_v15 = vmax.f32 %v2805_v9, 0.0  ;;  %v2956_v42 = vmax.f32 %v2465_v7, 0.0  ;;  %v4346_v9 = vor.u32 %v4771_v30, %v4343_v0 }
 0x225   :  { %v2297_v19 = vpop.f32.mrf.mxu2  ;;  %v5906_v34 = vpack.c.bf16 %v2959_v15, %v2957_v11 }
 0x226   :  { %v2298_v26 = vadd.f32 %v2297_v19, %v5805_v53  ;;  %v2638_v35 = vpop.f32.mrf.mxu0 }
 0x227   :  { %v2639_v39 = vadd.f32 %v2638_v35, %v5801_v38 }
 0x228   :  { %v2466_v29 = vpop.f32.mrf.mxu3  ;;  %v2807_v40 = vpop.f32.mrf.mxu1 }
 0x229   :  { %v2467_v36 = vadd.f32 %v2466_v29, %v2298_v26  ;;  %v2808_v44 = vadd.f32 %v2807_v40, %v2639_v39  ;;  %2677 = vmatmul.bf16.gmra.mxu0 %v4334_v13  ;;  %v4773_v40 = vld [vmem:[#allocation2 + $0x114] sm:$0xf] }
 0x22a   :  { %2339 = vmatmul.bf16.gmra.mxu2 %v4334_v13  ;;  %v4351_v13 = vld [vmem:[#allocation2 + $0x118] sm:$0xf0] }
 0x22b   :  { %v2958_v43 = vmax.f32 %v2467_v36, 0.0  ;;  %2846 = vmatmul.bf16.gmra.mxu1 %v4338_v41  ;;  %v2961_v56 = vmax.f32 %v2808_v44, 0.0 }
 0x22d   :  { %2508 = vmatmul.bf16.gmra.mxu3 %v4338_v41  ;;  %v5909_v45 = vpack.c.bf16 %v2958_v43, %v2956_v42  ;;  %v2300_v48 = vpop.f32.mrf.mxu2  ;;  %v4349_v43 = vld [vmem:[#allocation2 + $0x110] sm:$0xf] }
 0x22e   :  { %v2301_v49 = vadd.f32 %v2300_v48, %v5805_v53  ;;  %v2640_v23 = vpop.f32.mrf.mxu0 }
 0x22f   :  { %v2641_v24 = vadd.f32 %v2640_v23, %v5801_v38  ;;  %v4354_v23 = vor.u32 %v4773_v40, %v4351_v13  ;;  %v4677_v40 = vld [vmem:[%s6459_s8 + $0xa0] sm:$0xf]  ;;  %v4856_v13 = vld [vmem:[%s6459_s8 + $0xa4] sm:$0xf0] }
 0x230   :  { %v2469_v51 = vpop.f32.mrf.mxu3  ;;  %v2809_v54 = vpop.f32.mrf.mxu1 }
 0x231   :  { %v2470_v52 = vadd.f32 %v2469_v51, %v2301_v49  ;;  %v2810_v55 = vadd.f32 %v2809_v54, %v2641_v24  ;;  %v4350_v51 = vor.u32 %v4774_v1, %v4349_v43 }
 0x233   :  { %v2963_v58 = vmax.f32 %v2810_v55, 0.0  ;;  %v2960_v11 = vmax.f32 %v2470_v52, 0.0 }
 0x235   :  { %v2302_v59 = vpop.f32.mrf.mxu2  ;;  %v5914_v3 = vpack.c.bf16 %v2963_v58, %v2961_v56 }
 0x236   :  { %v2303_v62 = vadd.f32 %v2302_v59, %v5805_v53  ;;  %v2643_v4 = vpop.f32.mrf.mxu0 }
 0x237   :  { %v2644_v7 = vadd.f32 %v2643_v4, %v5801_v38 }
 0x238   :  { %v2471_v63 = vpop.f32.mrf.mxu3  ;;  %v2812_v8 = vpop.f32.mrf.mxu1 }
 0x239   :  { %v2472_v6 = vadd.f32 %v2471_v63, %v2303_v62  ;;  %v2813_v16 = vadd.f32 %v2812_v8, %v2644_v7  ;;  %2682 = vmatmul.bf16.gmra.mxu0 %v4342_v12  ;;  %v4776_v7 = vld [vmem:[#allocation2 + $0x124] sm:$0xf0] }
 0x23a   :  { %2344 = vmatmul.bf16.gmra.mxu2 %v4342_v12 }
 0x23b   :  { %v2962_v15 = vmax.f32 %v2472_v6, 0.0  ;;  %2851 = vmatmul.bf16.gmra.mxu1 %v4346_v9  ;;  %v2965_v32 = vmax.f32 %v2813_v16, 0.0 }
 0x23d   :  { %2513 = vmatmul.bf16.gmra.mxu3 %v4346_v9  ;;  %v5917_v17 = vpack.c.bf16 %v2962_v15, %v2960_v11  ;;  %v2305_v19 = vpop.f32.mrf.mxu2  ;;  %v4775_v9 = vld [vmem:[#allocation2 + $0x124] sm:$0xf]  ;;  %v4359_v11 = vld [vmem:[#allocation2 + $0x128] sm:$0xf0] }
 0x23e   :  { %v2306_v20 = vadd.f32 %v2305_v19, %v5805_v53  ;;  %v2645_v22 = vpop.f32.mrf.mxu0  ;;  %v4357_v19 = vld [vmem:[#allocation2 + $0x120] sm:$0xf] }
 0x23f   :  { %v2646_v26 = vadd.f32 %v2645_v22, %v5801_v38 }
 0x240   :  { %v2474_v21 = vpop.f32.mrf.mxu3  ;;  %v2814_v29 = vpop.f32.mrf.mxu1 }
 0x241   :  { %v2475_v25 = vadd.f32 %v2474_v21, %v2306_v20  ;;  %v2815_v31 = vadd.f32 %v2814_v29, %v2646_v26  ;;  %v4362_v26 = vor.u32 %v4775_v9, %v4359_v11  ;;  %v4365_v9 = vld [vmem:[#allocation2 + $0x130] sm:$0xf] }
 0x243   :  { %v2967_v33 = vmax.f32 %v2815_v31, 0.0  ;;  %v2964_v52 = vmax.f32 %v2475_v25, 0.0  ;;  %v4358_v25 = vor.u32 %v4776_v7, %v4357_v19 }
 0x245   :  { %v2307_v35 = vpop.f32.mrf.mxu2  ;;  %v5922_v41 = vpack.c.bf16 %v2967_v33, %v2965_v32  ;;  %v4613_v33 = vld [vmem:[%s6459_s8 + $0x20] sm:$0xf] }
 0x246   :  { %v2308_v36 = vadd.f32 %v2307_v35, %v5805_v53  ;;  %v2648_v42 = vpop.f32.mrf.mxu0  ;;  %v4840_v35 = vld [vmem:[%s6459_s8 + $0x24] sm:$0xf0] }
 0x247   :  { %v2649_v48 = vadd.f32 %v2648_v42, %v5801_v38 }
 0x248   :  { %v2476_v39 = vpop.f32.mrf.mxu3  ;;  %v2817_v49 = vpop.f32.mrf.mxu1 }
 0x249   :  { %v2477_v44 = vadd.f32 %v2476_v39, %v2308_v36  ;;  %v2818_v54 = vadd.f32 %v2817_v49, %v2649_v48  ;;  %2687 = vmatmul.bf16.gmra.mxu0 %v4350_v51  ;;  %v4614_v39 = vor.u32 %v4840_v35, %v4613_v33 }
 0x24a   :  { %2349 = vmatmul.bf16.gmra.mxu2 %v4350_v51 }
 0x24b   :  { %v2966_v24 = vmax.f32 %v2477_v44, 0.0  ;;  %2856 = vmatmul.bf16.gmra.mxu1 %v4354_v23  ;;  %v2969_v4 = vmax.f32 %v2818_v54, 0.0  ;;  %v4678_v44 = vor.u32 %v4856_v13, %v4677_v40  ;;  %3327 = vmatpush.bf16.msra.mxu2 %v4614_v39 }
 0x24d   :  { %2518 = vmatmul.bf16.gmra.mxu3 %v4354_v23  ;;  %v5925_v55 = vpack.c.bf16 %v2966_v24, %v2964_v52  ;;  %v2310_v56 = vpop.f32.mrf.mxu2 }
 0x24e   :  { %v2311_v58 = vadd.f32 %v2310_v56, %v5805_v53  ;;  %v2650_v60 = vpop.f32.mrf.mxu0  ;;  %3496 = vmatpush.bf16.msra.mxu3 %v4678_v44  ;;  %v4839_v56 = vld [vmem:[%s6459_s8 + $0x24] sm:$0xf] }
 0x24f   :  { %v2651_v63 = vadd.f32 %v2650_v60, %v5801_v38  ;;  %v4778_v60 = vld [vmem:[#allocation2 + $0x134] sm:$0xf0] }
 0x250   :  { %v2479_v59 = vpop.f32.mrf.mxu3  ;;  %v2819_v30 = vpop.f32.mrf.mxu1 }
 0x251   :  { %v2480_v62 = vadd.f32 %v2479_v59, %v2311_v58  ;;  %v2820_v0 = vadd.f32 %v2819_v30, %v2651_v63  ;;  %v4615_v58 = vld [vmem:[%s6459_s8 + $0x28] sm:$0xf0]  ;;  %v4855_v63 = vld [vmem:[%s6459_s8 + $0xa4] sm:$0xf] }
 0x252   :  { %v4679_v30 = vld [vmem:[%s6459_s8 + $0xa8] sm:$0xf0] }
 0x253   :  { %v2971_v5 = vmax.f32 %v2820_v0, 0.0  ;;  %v2968_v29 = vmax.f32 %v2480_v62, 0.0  ;;  %v4618_v62 = vor.u32 %v4839_v56, %v4615_v58  ;;  %v4682_v7 = vor.u32 %v4855_v63, %v4679_v30  ;;  %v4373_v56 = vld [vmem:[#allocation2 + $0x140] sm:$0xf] }
 0x255   :  { %v2312_v6 = vpop.f32.mrf.mxu2  ;;  %v5930_v15 = vpack.c.bf16 %v2971_v5, %v2969_v4  ;;  %v4777_v5 = vld [vmem:[#allocation2 + $0x134] sm:$0xf]  ;;  %3665 = vmatpush.bf16.msra.mxu0 %v4618_v62  ;;  %3834 = vmatpush.bf16.msra.mxu1 %v4682_v7 }
 0x256   :  { %v2313_v8 = vadd.f32 %v2312_v6, %v5805_v53  ;;  %v2653_v16 = vpop.f32.mrf.mxu0  ;;  %v4367_v6 = vld [vmem:[#allocation2 + $0x138] sm:$0xf0] }
 0x257   :  { %v2654_v21 = vadd.f32 %v2653_v16, %v5801_v38 }
 0x258   :  { %v2481_v12 = vpop.f32.mrf.mxu3  ;;  %v2822_v22 = vpop.f32.mrf.mxu1 }
 0x259   :  { %v2482_v20 = vadd.f32 %v2481_v12, %v2313_v8  ;;  %v2823_v32 = vadd.f32 %v2822_v22, %v2654_v21  ;;  %2692 = vmatmul.bf16.gmra.mxu0 %v4358_v25  ;;  %v4370_v21 = vor.u32 %v4777_v5, %v4367_v6 }
 0x25a   :  { %2354 = vmatmul.bf16.gmra.mxu2 %v4358_v25 }
 0x25b   :  { %v2970_v31 = vmax.f32 %v2482_v20, 0.0  ;;  %2861 = vmatmul.bf16.gmra.mxu1 %v4362_v26  ;;  %v2973_v24 = vmax.f32 %v2823_v32, 0.0  ;;  %v4366_v20 = vor.u32 %v4778_v60, %v4365_v9 }
 0x25d   :  { %2523 = vmatmul.bf16.gmra.mxu3 %v4362_v26  ;;  %v5939_v1 = vpack.c.bf16 %v2970_v31, %v2968_v29  ;;  %v2315_v36 = vpop.f32.mrf.mxu2 }
 0x25e   :  { %v2316_v42 = vadd.f32 %v2315_v36, %v5805_v53  ;;  %v2655_v48 = vpop.f32.mrf.mxu0 }
 0x25f   :  { %v2656_v51 = vadd.f32 %v2655_v48, %v5801_v38  ;;  %v4780_v48 = vld [vmem:[#allocation2 + $0x144] sm:$0xf0] }
 0x260   :  { %v2484_v43 = vpop.f32.mrf.mxu3  ;;  %v2824_v23 = vpop.f32.mrf.mxu1  ;;  %v4374_v62 = vor.u32 %v4780_v48, %v4373_v56 }
 0x261   :  { %v2485_v49 = vadd.f32 %v2484_v43, %v2316_v42  ;;  %v2825_v52 = vadd.f32 %v2824_v23, %v2656_v51  ;;  %v4779_v23 = vld [vmem:[#allocation2 + $0x144] sm:$0xf] }
 0x263   :  { %v2975_v54 = vmax.f32 %v2825_v52, 0.0  ;;  %v2972_v22 = vmax.f32 %v2485_v49, 0.0  ;;  %v4375_v52 = vld [vmem:[#allocation2 + $0x148] sm:$0xf0] }
 0x264   :  { %v4378_v63 = vor.u32 %v4779_v23, %v4375_v52 }
 0x265   :  { %v2317_v59 = vpop.f32.mrf.mxu2  ;;  %v5962_v8 = vpack.c.bf16 %v2975_v54, %v2973_v24 }
 0x266   :  { %v2318_v0 = vadd.f32 %v2317_v59, %v5805_v53  ;;  %v2658_v12 = vpop.f32.mrf.mxu0 }
 0x267   :  { %v2659_v16 = vadd.f32 %v2658_v12, %v5801_v38 }
 0x268   :  { %v2486_v4 = vpop.f32.mrf.mxu3  ;;  %v2827_v19 = vpop.f32.mrf.mxu1 }
 0x269   :  { %v2487_v11 = vadd.f32 %v2486_v4, %v2318_v0  ;;  %v2828_v26 = vadd.f32 %v2827_v19, %v2659_v16  ;;  %2697 = vmatmul.bf16.gmra.mxu0 %v4366_v20 }
 0x26a   :  { %2359 = vmatmul.bf16.gmra.mxu2 %v4366_v20 }
 0x26b   :  { %v2974_v25 = vmax.f32 %v2487_v11, 0.0  ;;  %2866 = vmatmul.bf16.gmra.mxu1 %v4370_v21  ;;  %v2977_v42 = vmax.f32 %v2828_v26, 0.0  ;;  %v4782_v26 = vld [vmem:[#allocation2 + $0x154] sm:$0xf0] }
 0x26d   :  { %2528 = vmatmul.bf16.gmra.mxu3 %v4370_v21  ;;  %v5965_v29 = vpack.c.bf16 %v2974_v25, %v2972_v22  ;;  %v2320_v31 = vpop.f32.mrf.mxu2 }
 0x26e   :  { %v2321_v32 = vadd.f32 %v2320_v31, %v5805_v53  ;;  %v2660_v35 = vpop.f32.mrf.mxu0 }
 0x26f   :  { %v2661_v39 = vadd.f32 %v2660_v35, %v5801_v38  ;;  %v4383_v35 = vld [vmem:[#allocation2 + $0x158] sm:$0xf0] }
 0x270   :  { %v2489_v33 = vpop.f32.mrf.mxu3  ;;  %v2829_v40 = vpop.f32.mrf.mxu1 }
 0x271   :  { %v2490_v36 = vadd.f32 %v2489_v33, %v2321_v32  ;;  %v2830_v13 = vadd.f32 %v2829_v40, %v2661_v39  ;;  %v4781_v33 = vld [vmem:[#allocation2 + $0x154] sm:$0xf]  ;;  %v4381_v40 = vld [vmem:[#allocation2 + $0x150] sm:$0xf] }
 0x272   :  { %v4386_v48 = vor.u32 %v4781_v33, %v4383_v35 }
 0x273   :  { %v2979_v43 = vmax.f32 %v2830_v13, 0.0  ;;  %v2976_v30 = vmax.f32 %v2490_v36, 0.0 }
 0x275   :  { %v2322_v44 = vpop.f32.mrf.mxu2  ;;  %v5970_v24 = vpack.c.bf16 %v2979_v43, %v2977_v42 }
 0x276   :  { %v2323_v49 = vadd.f32 %v2322_v44, %v5805_v53  ;;  %v2663_v54 = vpop.f32.mrf.mxu0  ;;  %v4382_v44 = vor.u32 %v4782_v26, %v4381_v40  ;;  %v4605_v40 = vld [vmem:[%s6459_s8 + $0x10] sm:$0xf] }
 0x277   :  { %v2664_v59 = vadd.f32 %v2663_v54, %v5801_v38 }
 0x278   :  { %v2491_v51 = vpop.f32.mrf.mxu3  ;;  %v2832_v60 = vpop.f32.mrf.mxu1 }
 0x279   :  { %v2492_v58 = vadd.f32 %v2491_v51, %v2323_v49  ;;  %v2833_v4 = vadd.f32 %v2832_v60, %v2664_v59  ;;  %2702 = vmatmul.bf16.gmra.mxu0 %v4374_v62 }
 0x27a   :  { %2364 = vmatmul.bf16.gmra.mxu2 %v4374_v62 }
 0x27b   :  { %v2978_v0 = vmax.f32 %v2492_v58, 0.0  ;;  %2871 = vmatmul.bf16.gmra.mxu1 %v4378_v63  ;;  %v2981_v21 = vmax.f32 %v2833_v4, 0.0 }
 0x27d   :  { %2533 = vmatmul.bf16.gmra.mxu3 %v4378_v63  ;;  %v5973_v5 = vpack.c.bf16 %v2978_v0, %v2976_v30  ;;  %v2325_v6 = vpop.f32.mrf.mxu2 }
 0x27e   :  { %v2326_v7 = vadd.f32 %v2325_v6, %v5805_v53  ;;  %v2665_v9 = vpop.f32.mrf.mxu0 }
 0x27f   :  { %v2666_v16 = vadd.f32 %v2665_v9, %v5801_v38 }
 0x280   :  { %v2494_v12 = vpop.f32.mrf.mxu3  ;;  %v2834_v19 = vpop.f32.mrf.mxu1 }
 0x281   :  { %v2495_v11 = vadd.f32 %v2494_v12, %v2326_v7  ;;  %v2835_v20 = vadd.f32 %v2834_v19, %v2666_v16  ;;  %v4784_v7 = vld [vmem:[#allocation2 + $0x164] sm:$0xf0]  ;;  %v4391_v16 = vld [vmem:[#allocation2 + $0x168] sm:$0xf0] }
 0x283   :  { %v2983_v22 = vmax.f32 %v2835_v20, 0.0  ;;  %v2980_v49 = vmax.f32 %v2495_v11, 0.0  ;;  %v4783_v11 = vld [vmem:[#allocation2 + $0x164] sm:$0xf] }
 0x285   :  { %v2327_v25 = vpop.f32.mrf.mxu2  ;;  %v5978_v36 = vpack.c.bf16 %v2983_v22, %v2981_v21  ;;  %v4389_v21 = vld [vmem:[#allocation2 + $0x160] sm:$0xf] }
 0x286   :  { %v2328_v31 = vadd.f32 %v2327_v25, %v5805_v53  ;;  %v2668_v39 = vpop.f32.mrf.mxu0 }
 0x287   :  { %v2669_v42 = vadd.f32 %v2668_v39, %v5801_v38 }
 0x288   :  { %v2496_v32 = vpop.f32.mrf.mxu3  ;;  %v2837_v43 = vpop.f32.mrf.mxu1 }
 0x289   :  { %v2497_v13 = vadd.f32 %v2496_v32, %v2328_v31  ;;  %v2838_v23 = vadd.f32 %v2837_v43, %v2669_v42  ;;  %2707 = vmatmul.bf16.gmra.mxu0 %v4382_v44  ;;  %v4390_v31 = vor.u32 %v4784_v7, %v4389_v21  ;;  %v4394_v32 = vor.u32 %v4783_v11, %v4391_v16  ;;  %v4786_v7 = vld [vmem:[#allocation2 + $0x174] sm:$0xf0]  ;;  %v4671_v11 = vld [vmem:[%s6459_s8 + $0x98] sm:$0xf0]  ;;  %v4785_v21 = vld [vmem:[#allocation2 + $0x174] sm:$0xf] }
 0x28a   :  { %2369 = vmatmul.bf16.gmra.mxu2 %v4382_v44 }
 0x28b   :  { %v2982_v51 = vmax.f32 %v2497_v13, 0.0  ;;  %2876 = vmatmul.bf16.gmra.mxu1 %v4386_v48  ;;  %v2985_v0 = vmax.f32 %v2838_v23, 0.0  ;;  %v4838_v13 = vld [vmem:[%s6459_s8 + $0x14] sm:$0xf0] }
 0x28c   :  { %v4606_v44 = vor.u32 %v4838_v13, %v4605_v40 }
 0x28d   :  { %2538 = vmatmul.bf16.gmra.mxu3 %v4386_v48  ;;  %v5981_v52 = vpack.c.bf16 %v2982_v51, %v2980_v49  ;;  %v2330_v54 = vpop.f32.mrf.mxu2  ;;  %v4669_v48 = vld [vmem:[%s6459_s8 + $0x90] sm:$0xf]  ;;  %v4854_v49 = vld [vmem:[%s6459_s8 + $0x94] sm:$0xf0] }
 0x28e   :  { %v2331_v56 = vadd.f32 %v2330_v54, %v5805_v53  ;;  %v2670_v59 = vpop.f32.mrf.mxu0  ;;  %v4670_v54 = vor.u32 %v4854_v49, %v4669_v48  ;;  %3328 = vmatpush.bf16.msra.mxu2 %v4606_v44 }
 0x28f   :  { %v2671_v62 = vadd.f32 %v2670_v59, %v5801_v38 }
 0x290   :  { %v2499_v58 = vpop.f32.mrf.mxu3  ;;  %v2839_v63 = vpop.f32.mrf.mxu1  ;;  %3497 = vmatpush.bf16.msra.mxu3 %v4670_v54 }
 0x291   :  { %v2500_v60 = vadd.f32 %v2499_v58, %v2331_v56  ;;  %v2840_v30 = vadd.f32 %v2839_v63, %v2671_v62 }
 0x293   :  { %v2987_v4 = vmax.f32 %v2840_v30, 0.0  ;;  %v2984_v33 = vmax.f32 %v2500_v60, 0.0 }
 0x295   :  { %v2332_v6 = vpop.f32.mrf.mxu2  ;;  %v5986_v19 = vpack.c.bf16 %v2987_v4, %v2985_v0  ;;  %v4837_v0 = vld [vmem:[%s6459_s8 + $0x14] sm:$0xf]  ;;  %v4607_v4 = vld [vmem:[%s6459_s8 + $0x18] sm:$0xf0] }
 0x296   :  { %v2333_v12 = vadd.f32 %v2332_v6, %v5805_v53  ;;  %v2673_v20 = vpop.f32.mrf.mxu0 }
 0x297   :  { %v2674_v25 = vadd.f32 %v2673_v20, %v5801_v38 }
 0x298   :  { %v2501_v9 = vpop.f32.mrf.mxu3  ;;  %v2842_v26 = vpop.f32.mrf.mxu1 }
 0x299   :  { %v2502_v22 = vadd.f32 %v2501_v9, %v2333_v12  ;;  %v2843_v39 = vadd.f32 %v2842_v26, %v2674_v25  ;;  %2712 = vmatmul.bf16.gmra.mxu0 %v4390_v31  ;;  %v4610_v12 = vor.u32 %v4837_v0, %v4607_v4  ;;  %v4853_v9 = vld [vmem:[%s6459_s8 + $0x94] sm:$0xf]  ;;  %v4788_v4 = vld [vmem:[#allocation2 + $0x184] sm:$0xf0] }
 0x29a   :  { %2374 = vmatmul.bf16.gmra.mxu2 %v4390_v31  ;;  %v4674_v25 = vor.u32 %v4853_v9, %v4671_v11  ;;  %v4407_v9 = vld [vmem:[#allocation2 + $0x188] sm:$0xf0] }
 0x29b   :  { %v2986_v35 = vmax.f32 %v2502_v22, 0.0  ;;  %2881 = vmatmul.bf16.gmra.mxu1 %v4394_v32  ;;  %v2989_v63 = vmax.f32 %v2843_v39, 0.0  ;;  %v4399_v22 = vld [vmem:[#allocation2 + $0x178] sm:$0xf0]  ;;  %3666 = vmatpush.bf16.msra.mxu0 %v4610_v12  ;;  %v4787_v12 = vld [vmem:[#allocation2 + $0x184] sm:$0xf] }
 0x29c   :  { %3835 = vmatpush.bf16.msra.mxu1 %v4674_v25  ;;  %v4402_v13 = vor.u32 %v4785_v21, %v4399_v22 }
 0x29d   :  { %2543 = vmatmul.bf16.gmra.mxu3 %v4394_v32  ;;  %v5995_v42 = vpack.c.bf16 %v2986_v35, %v2984_v33  ;;  %v2335_v43 = vpop.f32.mrf.mxu2  ;;  %v4397_v32 = vld [vmem:[#allocation2 + $0x170] sm:$0xf] }
 0x29e   :  { %v2336_v51 = vadd.f32 %v2335_v43, %v5805_v53  ;;  %v2675_v56 = vpop.f32.mrf.mxu0  ;;  %v4398_v40 = vor.u32 %v4786_v7, %v4397_v32  ;;  %v4410_v32 = vor.u32 %v4787_v12, %v4407_v9  ;;  %v4413_v12 = vld [vmem:[#allocation2 + $0x190] sm:$0xf] }
 0x29f   :  { %v2676_v59 = vadd.f32 %v2675_v56, %v5801_v38 }
 0x2a0   :  { %v2504_v23 = vpop.f32.mrf.mxu3  ;;  %v2844_v60 = vpop.f32.mrf.mxu1 }
 0x2a1   :  { %v2505_v58 = vadd.f32 %v2504_v23, %v2336_v51  ;;  %v2845_v62 = vadd.f32 %v2844_v60, %v2676_v59 }
 0x2a3   :  { %v2991_v30 = vmax.f32 %v2845_v62, 0.0  ;;  %v2988_v43 = vmax.f32 %v2505_v58, 0.0 }
 0x2a5   :  { %v2337_v6 = vpop.f32.mrf.mxu2  ;;  %v6018_v26 = vpack.c.bf16 %v2991_v30, %v2989_v63 }
 0x2a6   :  { %v2338_v16 = vadd.f32 %v2337_v6, %v5805_v53  ;;  %v2678_v31 = vpop.f32.mrf.mxu0 }
 0x2a7   :  { %v2679_v35 = vadd.f32 %v2678_v31, %v5801_v38 }
 0x2a8   :  { %v2506_v20 = vpop.f32.mrf.mxu3  ;;  %v2847_v39 = vpop.f32.mrf.mxu1 }
 0x2a9   :  { %v2507_v33 = vadd.f32 %v2506_v20, %v2338_v16  ;;  %v2848_v48 = vadd.f32 %v2847_v39, %v2679_v35  ;;  %2717 = vmatmul.bf16.gmra.mxu0 %v4398_v40  ;;  %v4405_v20 = vld [vmem:[#allocation2 + $0x180] sm:$0xf] }
 0x2aa   :  { %2379 = vmatmul.bf16.gmra.mxu2 %v4398_v40  ;;  %v4406_v31 = vor.u32 %v4788_v4, %v4405_v20  ;;  %v4415_v4 = vld [vmem:[#allocation2 + $0x198] sm:$0xf0] }
 0x2ab   :  { %v2990_v44 = vmax.f32 %v2507_v33, 0.0  ;;  %2886 = vmatmul.bf16.gmra.mxu1 %v4402_v13  ;;  %v2993_v30 = vmax.f32 %v2848_v48, 0.0 }
 0x2ad   :  { %2548 = vmatmul.bf16.gmra.mxu3 %v4402_v13  ;;  %v6021_v49 = vpack.c.bf16 %v2990_v44, %v2988_v43  ;;  %v2340_v51 = vpop.f32.mrf.mxu2 }
 0x2ae   :  { %v2341_v23 = vadd.f32 %v2340_v51, %v5805_v53  ;;  %v2680_v56 = vpop.f32.mrf.mxu0 }
 0x2af   :  { %v2681_v60 = vadd.f32 %v2680_v56, %v5801_v38 }
 0x2b0   :  { %v2509_v54 = vpop.f32.mrf.mxu3  ;;  %v2849_v62 = vpop.f32.mrf.mxu1 }
 0x2b1   :  { %v2510_v59 = vadd.f32 %v2509_v54, %v2341_v23  ;;  %v2850_v63 = vadd.f32 %v2849_v62, %v2681_v60 }
 0x2b3   :  { %v2995_v58 = vmax.f32 %v2850_v63, 0.0  ;;  %v2992_v33 = vmax.f32 %v2510_v59, 0.0  ;;  %v4790_v63 = vld [vmem:[#allocation2 + $0x194] sm:$0xf0] }
 0x2b5   :  { %v2342_v0 = vpop.f32.mrf.mxu2  ;;  %v6026_v11 = vpack.c.bf16 %v2995_v58, %v2993_v30 }
 0x2b6   :  { %v2343_v6 = vadd.f32 %v2342_v0, %v5805_v53  ;;  %v2683_v16 = vpop.f32.mrf.mxu0  ;;  %v4789_v0 = vld [vmem:[#allocation2 + $0x194] sm:$0xf] }
 0x2b7   :  { %v2684_v22 = vadd.f32 %v2683_v16, %v5801_v38 }
 0x2b8   :  { %v2511_v7 = vpop.f32.mrf.mxu3  ;;  %v2852_v25 = vpop.f32.mrf.mxu1 }
 0x2b9   :  { %v2512_v21 = vadd.f32 %v2511_v7, %v2343_v6  ;;  %v2853_v39 = vadd.f32 %v2852_v25, %v2684_v22  ;;  %2722 = vmatmul.bf16.gmra.mxu0 %v4406_v31  ;;  %v4418_v22 = vor.u32 %v4789_v0, %v4415_v4 }
 0x2ba   :  { %2384 = vmatmul.bf16.gmra.mxu2 %v4406_v31 }
 0x2bb   :  { %v2994_v35 = vmax.f32 %v2512_v21, 0.0  ;;  %2891 = vmatmul.bf16.gmra.mxu1 %v4410_v32  ;;  %v2997_v60 = vmax.f32 %v2853_v39, 0.0  ;;  %v4414_v21 = vor.u32 %v4790_v63, %v4413_v12 }
 0x2bd   :  { %2553 = vmatmul.bf16.gmra.mxu3 %v4410_v32  ;;  %v6029_v40 = vpack.c.bf16 %v2994_v35, %v2992_v33  ;;  %v2345_v13 = vpop.f32.mrf.mxu2 }
 0x2be   :  { %v2346_v43 = vadd.f32 %v2345_v13, %v5805_v53  ;;  %v2685_v48 = vpop.f32.mrf.mxu0 }
 0x2bf   :  { %v2686_v23 = vadd.f32 %v2685_v48, %v5801_v38 }
 0x2c0   :  { %v2514_v44 = vpop.f32.mrf.mxu3  ;;  %v2854_v54 = vpop.f32.mrf.mxu1 }
 0x2c1   :  { %v2515_v51 = vadd.f32 %v2514_v44, %v2346_v43  ;;  %v2855_v56 = vadd.f32 %v2854_v54, %v2686_v23 }
 0x2c3   :  { %v2999_v59 = vmax.f32 %v2855_v56, 0.0  ;;  %v2996_v25 = vmax.f32 %v2515_v51, 0.0 }
 0x2c5   :  { %v2347_v62 = vpop.f32.mrf.mxu2  ;;  %v6034_v6 = vpack.c.bf16 %v2999_v59, %v2997_v60  ;;  %v4792_v59 = vld [vmem:[#allocation2 + $0x1a4] sm:$0xf0] }
 0x2c6   :  { %v2348_v30 = vadd.f32 %v2347_v62, %v5805_v53  ;;  %v2688_v7 = vpop.f32.mrf.mxu0 }
 0x2c7   :  { %v2689_v16 = vadd.f32 %v2688_v7, %v5801_v38  ;;  %v4421_v7 = vld [vmem:[#allocation2 + $0x1a0] sm:$0xf] }
 0x2c8   :  { %v2516_v58 = vpop.f32.mrf.mxu3  ;;  %v2857_v20 = vpop.f32.mrf.mxu1 }
 0x2c9   :  { %v2517_v9 = vadd.f32 %v2516_v58, %v2348_v30  ;;  %v2858_v32 = vadd.f32 %v2857_v20, %v2689_v16  ;;  %2727 = vmatmul.bf16.gmra.mxu0 %v4414_v21  ;;  %v4791_v30 = vld [vmem:[#allocation2 + $0x1a4] sm:$0xf]  ;;  %v4423_v58 = vld [vmem:[#allocation2 + $0x1a8] sm:$0xf0]  ;;  %v4422_v20 = vor.u32 %v4792_v59, %v4421_v7 }
 0x2ca   :  { %2389 = vmatmul.bf16.gmra.mxu2 %v4414_v21  ;;  %v4426_v21 = vor.u32 %v4791_v30, %v4423_v58  ;;  %v4599_v7 = vld [vmem:[%s6459_s8 + $0x8] sm:$0xf0] }
 0x2cb   :  { %v2998_v31 = vmax.f32 %v2517_v9, 0.0  ;;  %2896 = vmatmul.bf16.gmra.mxu1 %v4418_v22  ;;  %v3001_v56 = vmax.f32 %v2858_v32, 0.0  ;;  %v4597_v32 = vld [vmem:[%s6459_s8] sm:$0xf] }
 0x2cd   :  { %2558 = vmatmul.bf16.gmra.mxu3 %v4418_v22  ;;  %v6037_v33 = vpack.c.bf16 %v2998_v31, %v2996_v25  ;;  %v2350_v35 = vpop.f32.mrf.mxu2 }
 0x2ce   :  { %v2351_v39 = vadd.f32 %v2350_v35, %v5805_v53  ;;  %v2690_v43 = vpop.f32.mrf.mxu0  ;;  %v4836_v35 = vld [vmem:[%s6459_s8 + $0x4] sm:$0xf0] }
 0x2cf   :  { %v2691_v48 = vadd.f32 %v2690_v43, %v5801_v38  ;;  %v4598_v43 = vor.u32 %v4836_v35, %v4597_v32  ;;  %v4431_v32 = vld [vmem:[#allocation2 + $0x1b8] sm:$0xf0] }
 0x2d0   :  { %v2519_v13 = vpop.f32.mrf.mxu3  ;;  %v2859_v23 = vpop.f32.mrf.mxu1 }
 0x2d1   :  { %v2520_v44 = vadd.f32 %v2519_v13, %v2351_v39  ;;  %v2860_v54 = vadd.f32 %v2859_v23, %v2691_v48  ;;  %v4852_v48 = vld [vmem:[%s6459_s8 + $0x84] sm:$0xf0]  ;;  %3329 = vmatpush.bf16.msra.mxu2 %v4598_v43 }
 0x2d3   :  { %v3003_v51 = vmax.f32 %v2860_v54, 0.0  ;;  %v3000_v22 = vmax.f32 %v2520_v44, 0.0  ;;  %v4661_v44 = vld [vmem:[%s6459_s8 + $0x80] sm:$0xf] }
 0x2d5   :  { %v2352_v60 = vpop.f32.mrf.mxu2  ;;  %v6042_v0 = vpack.c.bf16 %v3003_v51, %v3001_v56  ;;  %v4662_v56 = vor.u32 %v4852_v48, %v4661_v44  ;;  %v4429_v44 = vld [vmem:[#allocation2 + $0x1b0] sm:$0xf] }
 0x2d6   :  { %v2353_v62 = vadd.f32 %v2352_v60, %v5805_v53  ;;  %v2693_v4 = vpop.f32.mrf.mxu0 }
 0x2d7   :  { %v2694_v9 = vadd.f32 %v2693_v4, %v5801_v38  ;;  %3498 = vmatpush.bf16.msra.mxu3 %v4662_v56  ;;  %v4835_v4 = vld [vmem:[%s6459_s8 + $0x4] sm:$0xf] }
 0x2d8   :  { %v2521_v63 = vpop.f32.mrf.mxu3  ;;  %v2862_v16 = vpop.f32.mrf.mxu1 }
 0x2d9   :  { %v2522_v12 = vadd.f32 %v2521_v63, %v2353_v62  ;;  %v2863_v31 = vadd.f32 %v2862_v16, %v2694_v9  ;;  %2732 = vmatmul.bf16.gmra.mxu0 %v4422_v20  ;;  %v4794_v9 = vld [vmem:[#allocation2 + $0x1b4] sm:$0xf0]  ;;  %v4602_v16 = vor.u32 %v4835_v4, %v4599_v7 }
 0x2da   :  { %2394 = vmatmul.bf16.gmra.mxu2 %v4422_v20  ;;  %v4851_v20 = vld [vmem:[%s6459_s8 + $0x84] sm:$0xf]  ;;  %v4430_v56 = vor.u32 %v4794_v9, %v4429_v44  ;;  %v4439_v44 = vld [vmem:[#allocation2 + $0x1c8] sm:$0xf0] }
 0x2db   :  { %v3002_v25 = vmax.f32 %v2522_v12, 0.0  ;;  %2901 = vmatmul.bf16.gmra.mxu1 %v4426_v21  ;;  %v3005_v30 = vmax.f32 %v2863_v31, 0.0  ;;  %v4793_v31 = vld [vmem:[#allocation2 + $0x1b4] sm:$0xf]  ;;  %3667 = vmatpush.bf16.msra.mxu0 %v4602_v16 }
 0x2dd   :  { %2563 = vmatmul.bf16.gmra.mxu3 %v4426_v21  ;;  %v6051_v39 = vpack.c.bf16 %v3002_v25, %v3000_v22  ;;  %v2355_v13 = vpop.f32.mrf.mxu2  ;;  %v4663_v21 = vld [vmem:[%s6459_s8 + $0x88] sm:$0xf0] }
 0x2de   :  { %v2356_v23 = vadd.f32 %v2355_v13, %v5805_v53  ;;  %v2695_v51 = vpop.f32.mrf.mxu0  ;;  %v4666_v35 = vor.u32 %v4851_v20, %v4663_v21 }
 0x2df   :  { %v2696_v59 = vadd.f32 %v2695_v51, %v5801_v38  ;;  %v4434_v51 = vor.u32 %v4793_v31, %v4431_v32  ;;  %v4796_v31 = vld [vmem:[#allocation2 + $0x1c4] sm:$0xf0] }
 0x2e0   :  { %v2524_v54 = vpop.f32.mrf.mxu3  ;;  %v2864_v62 = vpop.f32.mrf.mxu1  ;;  %3836 = vmatpush.bf16.msra.mxu1 %v4666_v35 }
 0x2e1   :  { %v2525_v60 = vadd.f32 %v2524_v54, %v2356_v23  ;;  %v2865_v63 = vadd.f32 %v2864_v62, %v2696_v59 }
 0x2e3   :  { %v3007_v58 = vmax.f32 %v2865_v63, 0.0  ;;  %v3004_v59 = vmax.f32 %v2525_v60, 0.0 }
 0x2e5   :  { %v2357_v12 = vpop.f32.mrf.mxu2  ;;  %v6074_v13 = vpack.c.bf16 %v3007_v58, %v3005_v30 }
 0x2e6   :  { %v2358_v22 = vadd.f32 %v2357_v12, %v5805_v53  ;;  %v2698_v43 = vpop.f32.mrf.mxu0 }
 0x2e7   :  { %v2699_v23 = vadd.f32 %v2698_v43, %v5801_v38  ;;  %v4795_v43 = vld [vmem:[#allocation2 + $0x1c4] sm:$0xf] }
 0x2e8   :  { %v2526_v25 = vpop.f32.mrf.mxu3  ;;  %v2867_v54 = vpop.f32.mrf.mxu1 }
 0x2e9   :  { %v2527_v48 = vadd.f32 %v2526_v25, %v2358_v22  ;;  %v2868_v63 = vadd.f32 %v2867_v54, %v2699_v23  ;;  %2737 = vmatmul.bf16.gmra.mxu0 %v4430_v56  ;;  %v4437_v54 = vld [vmem:[#allocation2 + $0x1c0] sm:$0xf] }
 0x2ea   :  { %2399 = vmatmul.bf16.gmra.mxu2 %v4430_v56 }
 0x2eb   :  { %v3006_v62 = vmax.f32 %v2527_v48, 0.0  ;;  %2906 = vmatmul.bf16.gmra.mxu1 %v4434_v51  ;;  %v3009_v22 = vmax.f32 %v2868_v63, 0.0 }
 0x2ed   :  { %2568 = vmatmul.bf16.gmra.mxu3 %v4434_v51  ;;  %v6077_v4 = vpack.c.bf16 %v3006_v62, %v3004_v59  ;;  %v2360_v30 = vpop.f32.mrf.mxu2  ;;  %v4438_v62 = vor.u32 %v4796_v31, %v4437_v54 }
 0x2ee   :  { %v2361_v58 = vadd.f32 %v2360_v30, %v5805_v53  ;;  %v2700_v12 = vpop.f32.mrf.mxu0  ;;  %v4442_v30 = vor.u32 %v4795_v43, %v4439_v44  ;;  %v4798_v44 = vld [vmem:[#allocation2 + $0x1d4] sm:$0xf0] }
 0x2ef   :  { %v2701_v20 = vadd.f32 %v2700_v12, %v5801_v38 }
 0x2f0   :  { %v2529_v7 = vpop.f32.mrf.mxu3  ;;  %v2869_v9 = vpop.f32.mrf.mxu1 }
 0x2f1   :  { %v2530_v16 = vadd.f32 %v2529_v7, %v2361_v58  ;;  %v2870_v21 = vadd.f32 %v2869_v9, %v2701_v20 }
 0x2f3   :  { %v3011_v60 = vmax.f32 %v2870_v21, 0.0  ;;  %v3008_v58 = vmax.f32 %v2530_v16, 0.0 }
 0x2f5   :  { %v2362_v25 = vpop.f32.mrf.mxu2  ;;  %v6082_v48 = vpack.c.bf16 %v3011_v60, %v3009_v22 }
 0x2f6   :  { %v2363_v32 = vadd.f32 %v2362_v25, %v5805_v53  ;;  %v2703_v23 = vpop.f32.mrf.mxu0 }
 0x2f7   :  { %v2704_v51 = vadd.f32 %v2703_v23, %v5801_v38 }
 0x2f8   :  { %v2531_v35 = vpop.f32.mrf.mxu3  ;;  %v2872_v59 = vpop.f32.mrf.mxu1 }
 0x2f9   :  { %v2532_v56 = vadd.f32 %v2531_v35, %v2363_v32  ;;  %v2873_v7 = vadd.f32 %v2872_v59, %v2704_v51  ;;  %2742 = vmatmul.bf16.gmra.mxu0 %v4438_v62  ;;  %v4447_v51 = vld [vmem:[#allocation2 + $0x1d8] sm:$0xf0] }
 0x2fa   :  { %2404 = vmatmul.bf16.gmra.mxu2 %v4438_v62 }
 0x2fb   :  { %v3010_v63 = vmax.f32 %v2532_v56, 0.0  ;;  %2911 = vmatmul.bf16.gmra.mxu1 %v4442_v30  ;;  %v3013_v35 = vmax.f32 %v2873_v7, 0.0  ;;  %v4797_v56 = vld [vmem:[#allocation2 + $0x1d4] sm:$0xf] }
 0x2fd   :  { %2573 = vmatmul.bf16.gmra.mxu3 %v4442_v30  ;;  %v6085_v12 = vpack.c.bf16 %v3010_v63, %v3008_v58  ;;  %v2365_v20 = vpop.f32.mrf.mxu2  ;;  %v4445_v30 = vld [vmem:[#allocation2 + $0x1d0] sm:$0xf] }
 0x2fe   :  { %v2366_v9 = vadd.f32 %v2365_v20, %v5805_v53  ;;  %v2705_v22 = vpop.f32.mrf.mxu0 }
 0x2ff   :  { %v2706_v25 = vadd.f32 %v2705_v22, %v5801_v38 }
 0x300   :  { %v2534_v21 = vpop.f32.mrf.mxu3  ;;  %v2874_v32 = vpop.f32.mrf.mxu1 }
 0x301   :  { %v2535_v60 = vadd.f32 %v2534_v21, %v2366_v9  ;;  %v2875_v31 = vadd.f32 %v2874_v32, %v2706_v25  ;;  %v4446_v9 = vor.u32 %v4798_v44, %v4445_v30  ;;  %v4450_v21 = vor.u32 %v4797_v56, %v4447_v51  ;;  %v4800_v30 = vld [vmem:[#allocation2 + $0x1e4] sm:$0xf0] }
 0x303   :  { %v3015_v16 = vmax.f32 %v2875_v31, 0.0  ;;  %v3012_v22 = vmax.f32 %v2535_v60, 0.0 }
 0x305   :  { %v2367_v43 = vpop.f32.mrf.mxu2  ;;  %v6090_v59 = vpack.c.bf16 %v3015_v16, %v3013_v35 }
 0x306   :  { %v2368_v23 = vadd.f32 %v2367_v43, %v5805_v53  ;;  %v2708_v62 = vpop.f32.mrf.mxu0 }
 0x307   :  { %6466 = vst [vmem:[#allocation17_spill] sm:$0xff] %v6090_v59  ;;  %v2709_v63 = vadd.f32 %v2708_v62, %v5801_v38 }
 0x308   :  { %v2536_v54 = vpop.f32.mrf.mxu3  ;;  %v2877_v20 = vpop.f32.mrf.mxu1 }
 0x309   :  { %v2537_v58 = vadd.f32 %v2536_v54, %v2368_v23  ;;  %v2878_v25 = vadd.f32 %v2877_v20, %v2709_v63  ;;  %2747 = vmatmul.bf16.gmra.mxu0 %v4446_v9  ;;  %v4799_v20 = vld [vmem:[#allocation2 + $0x1e4] sm:$0xf] }
 0x30a   :  { %2409 = vmatmul.bf16.gmra.mxu2 %v4446_v9  ;;  %v4455_v9 = vld [vmem:[#allocation2 + $0x1e8] sm:$0xf0] }
 0x30b   :  { %v3014_v7 = vmax.f32 %v2537_v58, 0.0  ;;  %2916 = vmatmul.bf16.gmra.mxu1 %v4450_v21  ;;  %v3017_v56 = vmax.f32 %v2878_v25, 0.0  ;;  %v4458_v59 = vor.u32 %v4799_v20, %v4455_v9 }
 0x30d   :  { %2578 = vmatmul.bf16.gmra.mxu3 %v4450_v21  ;;  %v6093_v32 = vpack.c.bf16 %v3014_v7, %v3012_v22  ;;  %v2370_v31 = vpop.f32.mrf.mxu2  ;;  %v4453_v7 = vld [vmem:[#allocation2 + $0x1e0] sm:$0xf] }
 0x30e   :  { %v2371_v35 = vadd.f32 %v2370_v31, %v5805_v53  ;;  %v2710_v43 = vpop.f32.mrf.mxu0 }
 0x30f   :  { %v2711_v54 = vadd.f32 %v2710_v43, %v5801_v38  ;;  %v4454_v43 = vor.u32 %v4800_v30, %v4453_v7  ;;  %v4802_v7 = vld [vmem:[#allocation2 + $0x1f4] sm:$0xf0] }
 0x310   :  { %v2539_v16 = vpop.f32.mrf.mxu3  ;;  %v2879_v62 = vpop.f32.mrf.mxu1 }
 0x311   :  { %v2540_v23 = vadd.f32 %v2539_v16, %v2371_v35  ;;  %v2880_v44 = vadd.f32 %v2879_v62, %v2711_v54 }
 0x313   :  { %v3019_v60 = vmax.f32 %v2880_v44, 0.0  ;;  %v3016_v54 = vmax.f32 %v2540_v23, 0.0 }
 0x315   :  { %v2372_v51 = vpop.f32.mrf.mxu2  ;;  %v6098_v21 = vpack.c.bf16 %v3019_v60, %v3017_v56 }
 0x316   :  { %v2373_v58 = vadd.f32 %v2372_v51, %v5805_v53  ;;  %v2713_v22 = vpop.f32.mrf.mxu0 }
 0x317   :  { %6467 = vst [vmem:[#allocation18_spill] sm:$0xff] %v6098_v21  ;;  %v2714_v35 = vadd.f32 %v2713_v22, %v5801_v38 }
 0x318   :  { %v2541_v63 = vpop.f32.mrf.mxu3  ;;  %v2882_v16 = vpop.f32.mrf.mxu1 }
 0x319   :  { %v2542_v31 = vadd.f32 %v2541_v63, %v2373_v58  ;;  %v2883_v62 = vadd.f32 %v2882_v16, %v2714_v35  ;;  %2752 = vmatmul.bf16.gmra.mxu0 %v4454_v43  ;;  %v4463_v16 = vld [vmem:[#allocation2 + $0x1f8] sm:$0xf0] }
 0x31a   :  { %2414 = vmatmul.bf16.gmra.mxu2 %v4454_v43 }
 0x31b   :  { %v3018_v25 = vmax.f32 %v2542_v31, 0.0  ;;  %2921 = vmatmul.bf16.gmra.mxu1 %v4458_v59  ;;  %v3021_v20 = vmax.f32 %v2883_v62, 0.0 }
 0x31d   :  { %2583 = vmatmul.bf16.gmra.mxu3 %v4458_v59  ;;  %v6101_v44 = vpack.c.bf16 %v3018_v25, %v3016_v54  ;;  %v2375_v51 = vpop.f32.mrf.mxu2  ;;  %v4801_v59 = vld [vmem:[#allocation2 + $0x1f4] sm:$0xf]  ;;  %v4461_v25 = vld [vmem:[#allocation2 + $0x1f0] sm:$0xf] }
 0x31e   :  { %v2376_v56 = vadd.f32 %v2375_v51, %v5805_v53  ;;  %v2715_v21 = vpop.f32.mrf.mxu0 }
 0x31f   :  { %6468 = vst [vmem:[#allocation19_spill] sm:$0xff] %v6101_v44  ;;  %v2716_v63 = vadd.f32 %v2715_v21, %v5801_v38  ;;  %v4462_v21 = vor.u32 %v4802_v7, %v4461_v25  ;;  %v4466_v44 = vor.u32 %v4801_v59, %v4463_v16 }
 0x320   :  { %v2544_v60 = vpop.f32.mrf.mxu3  ;;  %v2884_v22 = vpop.f32.mrf.mxu1 }
 0x321   :  { %v2545_v58 = vadd.f32 %v2544_v60, %v2376_v56  ;;  %v2885_v30 = vadd.f32 %v2884_v22, %v2716_v63 }
 0x323   :  { %v3023_v23 = vmax.f32 %v2885_v30, 0.0  ;;  %v3020_v63 = vmax.f32 %v2545_v58, 0.0 }
 0x325   :  { %v2377_v9 = vpop.f32.mrf.mxu2  ;;  %v6106_v43 = vpack.c.bf16 %v3023_v23, %v3021_v20 }
 0x326   :  { %v2378_v31 = vadd.f32 %v2377_v9, %v5805_v53  ;;  %v2718_v54 = vpop.f32.mrf.mxu0 }
 0x327   :  { %6469 = vst [vmem:[#allocation20_spill] sm:$0xff] %v6106_v43  ;;  %v2719_v56 = vadd.f32 %v2718_v54, %v5801_v38 }
 0x328   :  { %v2546_v35 = vpop.f32.mrf.mxu3  ;;  %v2887_v60 = vpop.f32.mrf.mxu1 }
 0x329   :  { %v2547_v51 = vadd.f32 %v2546_v35, %v2378_v31  ;;  %v2888_v22 = vadd.f32 %v2887_v60, %v2719_v56  ;;  %2757 = vmatmul.bf16.gmra.mxu0 %v4462_v21 }
 0x32a   :  { %2419 = vmatmul.bf16.gmra.mxu2 %v4462_v21 }
 0x32b   :  { %v3022_v62 = vmax.f32 %v2547_v51, 0.0  ;;  %2926 = vmatmul.bf16.gmra.mxu1 %v4466_v44  ;;  %v3025_v59 = vmax.f32 %v2888_v22, 0.0 }
 0x32d   :  { %2588 = vmatmul.bf16.gmra.mxu3 %v4466_v44  ;;  %v6109_v30 = vpack.c.bf16 %v3022_v62, %v3020_v63  ;;  %v2380_v9 = vpop.f32.mrf.mxu2 }
 0x32e   :  { %v2381_v20 = vadd.f32 %v2380_v9, %v5805_v53  ;;  %v2720_v43 = vpop.f32.mrf.mxu0 }
 0x32f   :  { %v2721_v35 = vadd.f32 %v2720_v43, %v5801_v38 }
 0x330   :  { %v2549_v23 = vpop.f32.mrf.mxu3  ;;  %v2889_v54 = vpop.f32.mrf.mxu1 }
 0x331   :  { %v2550_v31 = vadd.f32 %v2549_v23, %v2381_v20  ;;  %v2890_v7 = vadd.f32 %v2889_v54, %v2721_v35 }
 0x333   :  { %v3027_v58 = vmax.f32 %v2890_v7, 0.0  ;;  %v3024_v62 = vmax.f32 %v2550_v31, 0.0 }
 0x335   :  { %v2382_v16 = vpop.f32.mrf.mxu2  ;;  %v6114_v56 = vpack.c.bf16 %v3027_v58, %v3025_v59 }
 0x336   :  { %v2383_v25 = vadd.f32 %v2382_v16, %v5805_v53  ;;  %v2723_v44 = vpop.f32.mrf.mxu0 }
 0x337   :  { %v2724_v21 = vadd.f32 %v2723_v44, %v5801_v38 }
 0x338   :  { %v2551_v51 = vpop.f32.mrf.mxu3  ;;  %v2892_v63 = vpop.f32.mrf.mxu1 }
 0x339   :  { %v2552_v60 = vadd.f32 %v2551_v51, %v2383_v25  ;;  %v2893_v20 = vadd.f32 %v2892_v63, %v2724_v21  ;;  %3668 = vmatmul.bf16.vlgmr.msra.gmra.mxu0 %v5813_v18 }
 0x33a   :  { %3330 = vmatmul.bf16.vlgmr.msra.gmra.mxu2 %v5813_v18 }
 0x33b   :  { %v3026_v9 = vmax.f32 %v2552_v60, 0.0  ;;  %3837 = vmatmul.bf16.vlgmr.msra.gmra.mxu1 %v5809_v2  ;;  %v3029_v16 = vmax.f32 %v2893_v20, 0.0 }
 0x33d   :  { %3499 = vmatmul.bf16.vlgmr.msra.gmra.mxu3 %v5809_v2  ;;  %v6121_v43 = vpack.c.bf16 %v3026_v9, %v3024_v62  ;;  %v2385_v22 = vpop.f32.mrf.mxu2 }
 0x33e   :  { %v2386_v23 = vadd.f32 %v2385_v22, %v5805_v53  ;;  %v2725_v54 = vpop.f32.mrf.mxu0 }
 0x33f   :  { %v2726_v31 = vadd.f32 %v2725_v54, %v5801_v38 }
 0x340   :  { %v2554_v35 = vpop.f32.mrf.mxu3  ;;  %v2894_v59 = vpop.f32.mrf.mxu1 }
 0x341   :  { %v2555_v7 = vadd.f32 %v2554_v35, %v2386_v23  ;;  %v2895_v58 = vadd.f32 %v2894_v59, %v2726_v31 }
 0x343   :  { %v3031_v25 = vmax.f32 %v2895_v58, 0.0  ;;  %v3028_v9 = vmax.f32 %v2555_v7, 0.0 }
 0x345   :  { %v2387_v51 = vpop.f32.mrf.mxu2  ;;  %v6126_v60 = vpack.c.bf16 %v3031_v25, %v3029_v16 }
 0x346   :  { %v2388_v18 = vadd.f32 %v2387_v51, %v5805_v53  ;;  %v2728_v2 = vpop.f32.mrf.mxu0 }
 0x347   :  { %v2729_v63 = vadd.f32 %v2728_v2, %v5801_v38 }
 0x348   :  { %v2556_v44 = vpop.f32.mrf.mxu3  ;;  %v2897_v62 = vpop.f32.mrf.mxu1 }
 0x349   :  { %v2557_v21 = vadd.f32 %v2556_v44, %v2388_v18  ;;  %v2898_v23 = vadd.f32 %v2897_v62, %v2729_v63  ;;  %3673 = vmatmul.bf16.gmra.mxu0 %v5827_v50 }
 0x34a   :  { %3335 = vmatmul.bf16.gmra.mxu2 %v5827_v50 }
 0x34b   :  { %v3030_v22 = vmax.f32 %v2557_v21, 0.0  ;;  %3842 = vmatmul.bf16.gmra.mxu1 %v5818_v37  ;;  %v3033_v51 = vmax.f32 %v2898_v23, 0.0 }
 0x34d   :  { %3504 = vmatmul.bf16.gmra.mxu3 %v5818_v37  ;;  %v6133_v20 = vpack.c.bf16 %v3030_v22, %v3028_v9  ;;  %v2390_v35 = vpop.f32.mrf.mxu2 }
 0x34e   :  { %v2391_v54 = vadd.f32 %v2390_v35, %v5805_v53  ;;  %v2730_v59 = vpop.f32.mrf.mxu0 }
 0x34f   :  { %v2731_v7 = vadd.f32 %v2730_v59, %v5801_v38 }
 0x350   :  { %v2559_v31 = vpop.f32.mrf.mxu3  ;;  %v2899_v16 = vpop.f32.mrf.mxu1 }
 0x351   :  { %v2560_v58 = vadd.f32 %v2559_v31, %v2391_v54  ;;  %v2900_v25 = vadd.f32 %v2899_v16, %v2731_v7 }
 0x353   :  { %v3035_v18 = vmax.f32 %v2900_v25, 0.0  ;;  %v3032_v22 = vmax.f32 %v2560_v58, 0.0 }
 0x355   :  { %v2392_v44 = vpop.f32.mrf.mxu2  ;;  %v6138_v21 = vpack.c.bf16 %v3035_v18, %v3033_v51 }
 0x356   :  { %v2393_v50 = vadd.f32 %v2392_v44, %v5805_v53  ;;  %v2733_v37 = vpop.f32.mrf.mxu0 }
 0x357   :  { %v2734_v62 = vadd.f32 %v2733_v37, %v5801_v38 }
 0x358   :  { %v2561_v2 = vpop.f32.mrf.mxu3  ;;  %v2902_v9 = vpop.f32.mrf.mxu1 }
 0x359   :  { %v2562_v63 = vadd.f32 %v2561_v2, %v2393_v50  ;;  %v2903_v54 = vadd.f32 %v2902_v9, %v2734_v62  ;;  %3678 = vmatmul.bf16.gmra.mxu0 %v5853_v28 }
 0x35a   :  { %3340 = vmatmul.bf16.gmra.mxu2 %v5853_v28 }
 0x35b   :  { %v3034_v35 = vmax.f32 %v2562_v63, 0.0  ;;  %3847 = vmatmul.bf16.gmra.mxu1 %v5850_v14  ;;  %v3037_v44 = vmax.f32 %v2903_v54, 0.0 }
 0x35d   :  { %3509 = vmatmul.bf16.gmra.mxu3 %v5850_v14  ;;  %v6145_v23 = vpack.c.bf16 %v3034_v35, %v3032_v22  ;;  %v2395_v31 = vpop.f32.mrf.mxu2 }
 0x35e   :  { %v2396_v59 = vadd.f32 %v2395_v31, %v5805_v53  ;;  %v2735_v16 = vpop.f32.mrf.mxu0 }
 0x35f   :  { %v2736_v58 = vadd.f32 %v2735_v16, %v5801_v38 }
 0x360   :  { %v2564_v7 = vpop.f32.mrf.mxu3  ;;  %v2904_v51 = vpop.f32.mrf.mxu1 }
 0x361   :  { %v2565_v25 = vadd.f32 %v2564_v7, %v2396_v59  ;;  %v2905_v18 = vadd.f32 %v2904_v51, %v2736_v58 }
 0x363   :  { %v3039_v50 = vmax.f32 %v2905_v18, 0.0  ;;  %v3036_v35 = vmax.f32 %v2565_v25, 0.0 }
 0x365   :  { %v2397_v2 = vpop.f32.mrf.mxu2  ;;  %v6150_v63 = vpack.c.bf16 %v3039_v50, %v3037_v44 }
 0x366   :  { %v2398_v28 = vadd.f32 %v2397_v2, %v5805_v53  ;;  %v2738_v14 = vpop.f32.mrf.mxu0 }
 0x367   :  { %v2739_v9 = vadd.f32 %v2738_v14, %v5801_v38 }
 0x368   :  { %v2566_v37 = vpop.f32.mrf.mxu3  ;;  %v2907_v22 = vpop.f32.mrf.mxu1 }
 0x369   :  { %v2567_v62 = vadd.f32 %v2566_v37, %v2398_v28  ;;  %v2908_v59 = vadd.f32 %v2907_v22, %v2739_v9  ;;  %3683 = vmatmul.bf16.gmra.mxu0 %v5861_v57 }
 0x36a   :  { %3345 = vmatmul.bf16.gmra.mxu2 %v5861_v57 }
 0x36b   :  { %v3038_v31 = vmax.f32 %v2567_v62, 0.0  ;;  %3852 = vmatmul.bf16.gmra.mxu1 %v5858_v46  ;;  %v3041_v2 = vmax.f32 %v2908_v59, 0.0 }
 0x36d   :  { %3514 = vmatmul.bf16.gmra.mxu3 %v5858_v46  ;;  %v6157_v54 = vpack.c.bf16 %v3038_v31, %v3036_v35  ;;  %v2400_v7 = vpop.f32.mrf.mxu2 }
 0x36e   :  { %v2401_v16 = vadd.f32 %v2400_v7, %v5805_v53  ;;  %v2740_v51 = vpop.f32.mrf.mxu0 }
 0x36f   :  { %v2741_v25 = vadd.f32 %v2740_v51, %v5801_v38 }
 0x370   :  { %v2569_v58 = vpop.f32.mrf.mxu3  ;;  %v2909_v44 = vpop.f32.mrf.mxu1 }
 0x371   :  { %v2570_v18 = vadd.f32 %v2569_v58, %v2401_v16  ;;  %v2910_v50 = vadd.f32 %v2909_v44, %v2741_v25 }
 0x373   :  { %v3043_v28 = vmax.f32 %v2910_v50, 0.0  ;;  %v3040_v31 = vmax.f32 %v2570_v18, 0.0 }
 0x375   :  { %v2402_v37 = vpop.f32.mrf.mxu2  ;;  %v6162_v62 = vpack.c.bf16 %v3043_v28, %v3041_v2 }
 0x376   :  { %v2403_v57 = vadd.f32 %v2402_v37, %v5805_v53  ;;  %v2743_v46 = vpop.f32.mrf.mxu0 }
 0x377   :  { %v2744_v22 = vadd.f32 %v2743_v46, %v5801_v38 }
 0x378   :  { %v2571_v14 = vpop.f32.mrf.mxu3  ;;  %v2912_v35 = vpop.f32.mrf.mxu1 }
 0x379   :  { %v2572_v9 = vadd.f32 %v2571_v14, %v2403_v57  ;;  %v2913_v16 = vadd.f32 %v2912_v35, %v2744_v22  ;;  %3688 = vmatmul.bf16.gmra.mxu0 %v5869_v27 }
 0x37a   :  { %3350 = vmatmul.bf16.gmra.mxu2 %v5869_v27 }
 0x37b   :  { %v3042_v7 = vmax.f32 %v2572_v9, 0.0  ;;  %3857 = vmatmul.bf16.gmra.mxu1 %v5866_v10  ;;  %v3045_v37 = vmax.f32 %v2913_v16, 0.0 }
 0x37d   :  { %3519 = vmatmul.bf16.gmra.mxu3 %v5866_v10  ;;  %v6169_v59 = vpack.c.bf16 %v3042_v7, %v3040_v31  ;;  %v2405_v58 = vpop.f32.mrf.mxu2 }
 0x37e   :  { %v2406_v51 = vadd.f32 %v2405_v58, %v5805_v53  ;;  %v2745_v44 = vpop.f32.mrf.mxu0 }
 0x37f   :  { %v2746_v18 = vadd.f32 %v2745_v44, %v5801_v38 }
 0x380   :  { %v2574_v25 = vpop.f32.mrf.mxu3  ;;  %v2914_v2 = vpop.f32.mrf.mxu1 }
 0x381   :  { %v2575_v50 = vadd.f32 %v2574_v25, %v2406_v51  ;;  %v2915_v28 = vadd.f32 %v2914_v2, %v2746_v18 }
 0x383   :  { %v3047_v57 = vmax.f32 %v2915_v28, 0.0  ;;  %v3044_v7 = vmax.f32 %v2575_v50, 0.0 }
 0x385   :  { %v2407_v14 = vpop.f32.mrf.mxu2  ;;  %v6174_v9 = vpack.c.bf16 %v3047_v57, %v3045_v37 }
 0x386   :  { %v2408_v27 = vadd.f32 %v2407_v14, %v5805_v53  ;;  %v2748_v10 = vpop.f32.mrf.mxu0 }
 0x387   :  { %v2749_v35 = vadd.f32 %v2748_v10, %v5801_v38 }
 0x388   :  { %v2576_v46 = vpop.f32.mrf.mxu3  ;;  %v2917_v31 = vpop.f32.mrf.mxu1 }
 0x389   :  { %v2577_v22 = vadd.f32 %v2576_v46, %v2408_v27  ;;  %v2918_v51 = vadd.f32 %v2917_v31, %v2749_v35  ;;  %3693 = vmatmul.bf16.gmra.mxu0 %v5883_v61 }
 0x38a   :  { %3355 = vmatmul.bf16.gmra.mxu2 %v5883_v61 }
 0x38b   :  { %v3046_v58 = vmax.f32 %v2577_v22, 0.0  ;;  %3862 = vmatmul.bf16.gmra.mxu1 %v5874_v47  ;;  %v3049_v14 = vmax.f32 %v2918_v51, 0.0 }
 0x38d   :  { %3524 = vmatmul.bf16.gmra.mxu3 %v5874_v47  ;;  %v6181_v16 = vpack.c.bf16 %v3046_v58, %v3044_v7  ;;  %v2410_v25 = vpop.f32.mrf.mxu2 }
 0x38e   :  { %v2411_v44 = vadd.f32 %v2410_v25, %v5805_v53  ;;  %v2750_v2 = vpop.f32.mrf.mxu0 }
 0x38f   :  { %v2751_v50 = vadd.f32 %v2750_v2, %v5801_v38 }
 0x390   :  { %v2579_v18 = vpop.f32.mrf.mxu3  ;;  %v2919_v37 = vpop.f32.mrf.mxu1 }
 0x391   :  { %v2580_v28 = vadd.f32 %v2579_v18, %v2411_v44  ;;  %v2920_v57 = vadd.f32 %v2919_v37, %v2751_v50 }
 0x393   :  { %v3051_v27 = vmax.f32 %v2920_v57, 0.0  ;;  %v3048_v58 = vmax.f32 %v2580_v28, 0.0 }
 0x395   :  { %v2412_v46 = vpop.f32.mrf.mxu2  ;;  %v6186_v22 = vpack.c.bf16 %v3051_v27, %v3049_v14 }
 0x396   :  { %v2413_v61 = vadd.f32 %v2412_v46, %v5805_v53  ;;  %v2753_v47 = vpop.f32.mrf.mxu0 }
 0x397   :  { %v2754_v31 = vadd.f32 %v2753_v47, %v5801_v38 }
 0x398   :  { %v2581_v10 = vpop.f32.mrf.mxu3  ;;  %v2922_v7 = vpop.f32.mrf.mxu1 }
 0x399   :  { %v2582_v35 = vadd.f32 %v2581_v10, %v2413_v61  ;;  %v2923_v44 = vadd.f32 %v2922_v7, %v2754_v31  ;;  %3698 = vmatmul.bf16.gmra.mxu0 %v5909_v45 }
 0x39a   :  { %3360 = vmatmul.bf16.gmra.mxu2 %v5909_v45 }
 0x39b   :  { %v3050_v25 = vmax.f32 %v2582_v35, 0.0  ;;  %3867 = vmatmul.bf16.gmra.mxu1 %v5906_v34  ;;  %v3053_v46 = vmax.f32 %v2923_v44, 0.0 }
 0x39d   :  { %3529 = vmatmul.bf16.gmra.mxu3 %v5906_v34  ;;  %v6193_v51 = vpack.c.bf16 %v3050_v25, %v3048_v58  ;;  %v2415_v18 = vpop.f32.mrf.mxu2 }
 0x39e   :  { %v2416_v2 = vadd.f32 %v2415_v18, %v5805_v53  ;;  %v2755_v37 = vpop.f32.mrf.mxu0 }
 0x39f   :  { %v2756_v28 = vadd.f32 %v2755_v37, %v5801_v38 }
 0x3a0   :  { %v2584_v50 = vpop.f32.mrf.mxu3  ;;  %v2924_v14 = vpop.f32.mrf.mxu1 }
 0x3a1   :  { %v2585_v57 = vadd.f32 %v2584_v50, %v2416_v2  ;;  %v2925_v27 = vadd.f32 %v2924_v14, %v2756_v28 }
 0x3a3   :  { %v3055_v61 = vmax.f32 %v2925_v27, 0.0  ;;  %v3052_v25 = vmax.f32 %v2585_v57, 0.0 }
 0x3a5   :  { %v2417_v10 = vpop.f32.mrf.mxu2  ;;  %v6198_v35 = vpack.c.bf16 %v3055_v61, %v3053_v46  ;;  %v3156_v61 = vld [vmem:[%s6460_s9] sm:$0x3]  ;;  %s5065_s9 = smov [#allocation12]  }
 0x3a6   :  { %v2418_v45 = vadd.f32 %v2417_v10, %v5805_v53  ;;  %v2758_v34 = vpop.f32.mrf.mxu0  ;;  %s4130_s5 = sshll.u32 %s5065_s9, 4  ;;  %s4131_s5 = int_to_ptr.vmem [resolvable:$true] %s4130_s5 }
 0x3a7   :  { %v2759_v7 = vadd.f32 %v2758_v34, %v5801_v38 }
 0x3a8   :  { %v2586_v47 = vpop.f32.mrf.mxu3  ;;  %v2927_v58 = vpop.f32.mrf.mxu1 }
 0x3a9   :  { %v2587_v31 = vadd.f32 %v2586_v47, %v2418_v45  ;;  %v2928_v2 = vadd.f32 %v2927_v58, %v2759_v7  ;;  %3703 = vmatmul.bf16.gmra.mxu0 %v5917_v17  ;;  %v6212_v47 = vperm.slane %v3156_v61, 1 }
 0x3aa   :  { %3365 = vmatmul.bf16.gmra.mxu2 %v5917_v17 }
 0x3ab   :  { %v3054_v18 = vmax.f32 %v2587_v31, 0.0  ;;  %3872 = vmatmul.bf16.gmra.mxu1 %v5914_v3  ;;  %v3057_v10 = vmax.f32 %v2928_v2, 0.0  ;;  %v6220_v2 = vperm.slane %v3156_v61, 0 }
 0x3ad   :  { %3534 = vmatmul.bf16.gmra.mxu3 %v5914_v3  ;;  %v6205_v44 = vpack.c.bf16 %v3054_v18, %v3052_v25  ;;  %v2420_v50 = vpop.f32.mrf.mxu2 }
 0x3ae   :  { %v2421_v37 = vadd.f32 %v2420_v50, %v5805_v53  ;;  %v2760_v14 = vpop.f32.mrf.mxu0 }
 0x3af   :  { %v2761_v57 = vadd.f32 %v2760_v14, %v5801_v38 }
 0x3b0   :  { %v2589_v28 = vpop.f32.mrf.mxu3  ;;  %v2929_v46 = vpop.f32.mrf.mxu1 }
 0x3b1   :  { %v2590_v27 = vadd.f32 %v2589_v28, %v2421_v37  ;;  %v2930_v17 = vadd.f32 %v2929_v46, %v2761_v57 }
 0x3b3   :  { %v3059_v45 = vmax.f32 %v2930_v17, 0.0  ;;  %v3056_v50 = vmax.f32 %v2590_v27, 0.0 }
 0x3b5   :  { %v2422_v3 = vpop.f32.mrf.mxu2  ;;  %v6215_v7 = vpack.c.bf16 %v3059_v45, %v3057_v10 }
 0x3b6   :  { %v2423_v34 = vadd.f32 %v2422_v3, %v5805_v53  ;;  %v3669_v58 = vpop.f32.mrf.mxu0 }
 0x3b7   :  { %v3670_v38 = vadd.f32 %v3669_v58, %v6212_v47 }
 0x3b8   :  { %v2591_v31 = vpop.f32.mrf.mxu3  ;;  %v3838_v18 = vpop.f32.mrf.mxu1 }
 0x3b9   :  { %v2592_v25 = vadd.f32 %v2591_v31, %v2423_v34  ;;  %v3839_v28 = vadd.f32 %v3838_v18, %v3670_v38  ;;  %3708 = vmatmul.bf16.gmra.mxu0 %v5925_v55 }
 0x3ba   :  { %3370 = vmatmul.bf16.gmra.mxu2 %v5925_v55 }
 0x3bb   :  { %v3058_v37 = vmax.f32 %v2592_v25, 0.0  ;;  %3877 = vmatmul.bf16.gmra.mxu1 %v5922_v41  ;;  %3999 = vst [vmem:[#allocation12 + $0x8] sm:$0xff] %v3839_v28 }
 0x3bd   :  { %3539 = vmatmul.bf16.gmra.mxu3 %v5922_v41  ;;  %v6224_v53 = vpack.c.bf16 %v3058_v37, %v3056_v50  ;;  %v3331_v14 = vpop.f32.mrf.mxu2 }
 0x3be   :  { %v3332_v57 = vadd.f32 %v3331_v14, %v6220_v2  ;;  %v3671_v27 = vpop.f32.mrf.mxu0 }
 0x3bf   :  { %v3672_v10 = vadd.f32 %v3671_v27, %v6212_v47 }
 0x3c0   :  { %v3500_v46 = vpop.f32.mrf.mxu3  ;;  %v3840_v45 = vpop.f32.mrf.mxu1 }
 0x3c1   :  { %v3501_v17 = vadd.f32 %v3500_v46, %v3332_v57  ;;  %v3841_v55 = vadd.f32 %v3840_v45, %v3672_v10 }
 0x3c3   :  { %3998 = vst [vmem:[#allocation12] sm:$0xff] %v3501_v17 }
 0x3c4   :  { %4001 = vst [vmem:[#allocation12 + $0x18] sm:$0xff] %v3841_v55 }
 0x3c5   :  { %v3333_v61 = vpop.f32.mrf.mxu2 }
 0x3c6   :  { %v3334_v3 = vadd.f32 %v3333_v61, %v6220_v2  ;;  %v3674_v41 = vpop.f32.mrf.mxu0 }
 0x3c7   :  { %v3675_v58 = vadd.f32 %v3674_v41, %v6212_v47 }
 0x3c8   :  { %v3502_v34 = vpop.f32.mrf.mxu3  ;;  %v3843_v25 = vpop.f32.mrf.mxu1 }
 0x3c9   :  { %v3503_v31 = vadd.f32 %v3502_v34, %v3334_v3  ;;  %v3844_v38 = vadd.f32 %v3843_v25, %v3675_v58  ;;  %3713 = vmatmul.bf16.gmra.mxu0 %v5939_v1 }
 0x3ca   :  { %3375 = vmatmul.bf16.gmra.mxu2 %v5939_v1 }
 0x3cb   :  { %4000 = vst [vmem:[#allocation12 + $0x10] sm:$0xff] %v3503_v31  ;;  %3882 = vmatmul.bf16.gmra.mxu1 %v5930_v15 }
 0x3cc   :  { %4003 = vst [vmem:[#allocation12 + $0x28] sm:$0xff] %v3844_v38 }
 0x3cd   :  { %3544 = vmatmul.bf16.gmra.mxu3 %v5930_v15  ;;  %v3336_v18 = vpop.f32.mrf.mxu2 }
 0x3ce   :  { %v3337_v50 = vadd.f32 %v3336_v18, %v6220_v2  ;;  %v3676_v28 = vpop.f32.mrf.mxu0 }
 0x3cf   :  { %v3677_v57 = vadd.f32 %v3676_v28, %v6212_v47 }
 0x3d0   :  { %v3505_v37 = vpop.f32.mrf.mxu3  ;;  %v3845_v46 = vpop.f32.mrf.mxu1 }
 0x3d1   :  { %v3506_v14 = vadd.f32 %v3505_v37, %v3337_v50  ;;  %v3846_v27 = vadd.f32 %v3845_v46, %v3677_v57 }
 0x3d3   :  { %4002 = vst [vmem:[#allocation12 + $0x20] sm:$0xff] %v3506_v14 }
 0x3d4   :  { %4005 = vst [vmem:[#allocation12 + $0x38] sm:$0xff] %v3846_v27 }
 0x3d5   :  { %v3338_v17 = vpop.f32.mrf.mxu2 }
 0x3d6   :  { %v3339_v1 = vadd.f32 %v3338_v17, %v6220_v2  ;;  %v3679_v45 = vpop.f32.mrf.mxu0 }
 0x3d7   :  { %v3680_v15 = vadd.f32 %v3679_v45, %v6212_v47 }
 0x3d8   :  { %v3507_v10 = vpop.f32.mrf.mxu3  ;;  %v3848_v61 = vpop.f32.mrf.mxu1 }
 0x3d9   :  { %v3508_v55 = vadd.f32 %v3507_v10, %v3339_v1  ;;  %v3849_v3 = vadd.f32 %v3848_v61, %v3680_v15  ;;  %3718 = vmatmul.bf16.gmra.mxu0 %v5965_v29 }
 0x3da   :  { %3380 = vmatmul.bf16.gmra.mxu2 %v5965_v29 }
 0x3db   :  { %4004 = vst [vmem:[#allocation12 + $0x30] sm:$0xff] %v3508_v55  ;;  %3887 = vmatmul.bf16.gmra.mxu1 %v5962_v8 }
 0x3dc   :  { %4007 = vst [vmem:[#allocation12 + $0x48] sm:$0xff] %v3849_v3 }
 0x3dd   :  { %3549 = vmatmul.bf16.gmra.mxu3 %v5962_v8  ;;  %v3341_v34 = vpop.f32.mrf.mxu2 }
 0x3de   :  { %v3342_v41 = vadd.f32 %v3341_v34, %v6220_v2  ;;  %v3681_v58 = vpop.f32.mrf.mxu0 }
 0x3df   :  { %v3682_v38 = vadd.f32 %v3681_v58, %v6212_v47 }
 0x3e0   :  { %v3510_v31 = vpop.f32.mrf.mxu3  ;;  %v3850_v18 = vpop.f32.mrf.mxu1 }
 0x3e1   :  { %v3511_v25 = vadd.f32 %v3510_v31, %v3342_v41  ;;  %v3851_v50 = vadd.f32 %v3850_v18, %v3682_v38 }
 0x3e3   :  { %4006 = vst [vmem:[#allocation12 + $0x40] sm:$0xff] %v3511_v25 }
 0x3e4   :  { %4009 = vst [vmem:[#allocation12 + $0x58] sm:$0xff] %v3851_v50 }
 0x3e5   :  { %v3343_v37 = vpop.f32.mrf.mxu2 }
 0x3e6   :  { %v3344_v29 = vadd.f32 %v3343_v37, %v6220_v2  ;;  %v3684_v14 = vpop.f32.mrf.mxu0 }
 0x3e7   :  { %v3685_v8 = vadd.f32 %v3684_v14, %v6212_v47 }
 0x3e8   :  { %v3512_v28 = vpop.f32.mrf.mxu3  ;;  %v3853_v46 = vpop.f32.mrf.mxu1 }
 0x3e9   :  { %v3513_v57 = vadd.f32 %v3512_v28, %v3344_v29  ;;  %v3854_v27 = vadd.f32 %v3853_v46, %v3685_v8  ;;  %3723 = vmatmul.bf16.gmra.mxu0 %v5973_v5 }
 0x3ea   :  { %3385 = vmatmul.bf16.gmra.mxu2 %v5973_v5 }
 0x3eb   :  { %4008 = vst [vmem:[#allocation12 + $0x50] sm:$0xff] %v3513_v57  ;;  %3892 = vmatmul.bf16.gmra.mxu1 %v5970_v24 }
 0x3ec   :  { %4011 = vst [vmem:[#allocation12 + $0x68] sm:$0xff] %v3854_v27 }
 0x3ed   :  { %3554 = vmatmul.bf16.gmra.mxu3 %v5970_v24  ;;  %v3346_v17 = vpop.f32.mrf.mxu2 }
 0x3ee   :  { %v3347_v1 = vadd.f32 %v3346_v17, %v6220_v2  ;;  %v3686_v45 = vpop.f32.mrf.mxu0 }
 0x3ef   :  { %v3687_v15 = vadd.f32 %v3686_v45, %v6212_v47 }
 0x3f0   :  { %v3515_v10 = vpop.f32.mrf.mxu3  ;;  %v3855_v61 = vpop.f32.mrf.mxu1 }
 0x3f1   :  { %v3516_v55 = vadd.f32 %v3515_v10, %v3347_v1  ;;  %v3856_v3 = vadd.f32 %v3855_v61, %v3687_v15 }
 0x3f3   :  { %4010 = vst [vmem:[#allocation12 + $0x60] sm:$0xff] %v3516_v55 }
 0x3f4   :  { %4013 = vst [vmem:[#allocation12 + $0x78] sm:$0xff] %v3856_v3 }
 0x3f5   :  { %v3348_v34 = vpop.f32.mrf.mxu2 }
 0x3f6   :  { %v3349_v5 = vadd.f32 %v3348_v34, %v6220_v2  ;;  %v3689_v31 = vpop.f32.mrf.mxu0 }
 0x3f7   :  { %v3690_v24 = vadd.f32 %v3689_v31, %v6212_v47 }
 0x3f8   :  { %v3517_v41 = vpop.f32.mrf.mxu3  ;;  %v3858_v25 = vpop.f32.mrf.mxu1 }
 0x3f9   :  { %v3518_v58 = vadd.f32 %v3517_v41, %v3349_v5  ;;  %v3859_v38 = vadd.f32 %v3858_v25, %v3690_v24  ;;  %3728 = vmatmul.bf16.gmra.mxu0 %v5981_v52 }
 0x3fa   :  { %3390 = vmatmul.bf16.gmra.mxu2 %v5981_v52 }
 0x3fb   :  { %4012 = vst [vmem:[#allocation12 + $0x70] sm:$0xff] %v3518_v58  ;;  %3897 = vmatmul.bf16.gmra.mxu1 %v5978_v36 }
 0x3fc   :  { %4015 = vst [vmem:[#allocation12 + $0x88] sm:$0xff] %v3859_v38 }
 0x3fd   :  { %3559 = vmatmul.bf16.gmra.mxu3 %v5978_v36  ;;  %v3351_v18 = vpop.f32.mrf.mxu2 }
 0x3fe   :  { %v3352_v50 = vadd.f32 %v3351_v18, %v6220_v2  ;;  %v3691_v29 = vpop.f32.mrf.mxu0 }
 0x3ff   :  { %v3692_v14 = vadd.f32 %v3691_v29, %v6212_v47 }
 0x400   :  { %v3520_v37 = vpop.f32.mrf.mxu3  ;;  %v3860_v57 = vpop.f32.mrf.mxu1 }
 0x401   :  { %v3521_v28 = vadd.f32 %v3520_v37, %v3352_v50  ;;  %v3861_v8 = vadd.f32 %v3860_v57, %v3692_v14 }
 0x403   :  { %4014 = vst [vmem:[#allocation12 + $0x80] sm:$0xff] %v3521_v28 }
 0x404   :  { %4017 = vst [vmem:[#allocation12 + $0x98] sm:$0xff] %v3861_v8 }
 0x405   :  { %v3353_v46 = vpop.f32.mrf.mxu2 }
 0x406   :  { %v3354_v52 = vadd.f32 %v3353_v46, %v6220_v2  ;;  %v3694_v17 = vpop.f32.mrf.mxu0 }
 0x407   :  { %v3695_v36 = vadd.f32 %v3694_v17, %v6212_v47 }
 0x408   :  { %v3522_v27 = vpop.f32.mrf.mxu3  ;;  %v3863_v10 = vpop.f32.mrf.mxu1 }
 0x409   :  { %v3523_v1 = vadd.f32 %v3522_v27, %v3354_v52  ;;  %v3864_v45 = vadd.f32 %v3863_v10, %v3695_v36  ;;  %3733 = vmatmul.bf16.gmra.mxu0 %v5995_v42 }
 0x40a   :  { %3395 = vmatmul.bf16.gmra.mxu2 %v5995_v42 }
 0x40b   :  { %4016 = vst [vmem:[#allocation12 + $0x90] sm:$0xff] %v3523_v1  ;;  %3902 = vmatmul.bf16.gmra.mxu1 %v5986_v19 }
 0x40c   :  { %4019 = vst [vmem:[#allocation12 + $0xa8] sm:$0xff] %v3864_v45 }
 0x40d   :  { %3564 = vmatmul.bf16.gmra.mxu3 %v5986_v19  ;;  %v3356_v55 = vpop.f32.mrf.mxu2 }
 0x40e   :  { %v3357_v15 = vadd.f32 %v3356_v55, %v6220_v2  ;;  %v3696_v3 = vpop.f32.mrf.mxu0 }
 0x40f   :  { %v3697_v5 = vadd.f32 %v3696_v3, %v6212_v47 }
 0x410   :  { %v3525_v61 = vpop.f32.mrf.mxu3  ;;  %v3865_v41 = vpop.f32.mrf.mxu1 }
 0x411   :  { %v3526_v34 = vadd.f32 %v3525_v61, %v3357_v15  ;;  %v3866_v31 = vadd.f32 %v3865_v41, %v3697_v5 }
 0x413   :  { %4018 = vst [vmem:[#allocation12 + $0xa0] sm:$0xff] %v3526_v34 }
 0x414   :  { %4021 = vst [vmem:[#allocation12 + $0xb8] sm:$0xff] %v3866_v31 }
 0x415   :  { %v3358_v58 = vpop.f32.mrf.mxu2 }
 0x416   :  { %v3359_v42 = vadd.f32 %v3358_v58, %v6220_v2  ;;  %v3699_v25 = vpop.f32.mrf.mxu0 }
 0x417   :  { %v3700_v19 = vadd.f32 %v3699_v25, %v6212_v47 }
 0x418   :  { %v3527_v24 = vpop.f32.mrf.mxu3  ;;  %v3868_v18 = vpop.f32.mrf.mxu1 }
 0x419   :  { %v3528_v38 = vadd.f32 %v3527_v24, %v3359_v42  ;;  %v3869_v50 = vadd.f32 %v3868_v18, %v3700_v19  ;;  %3738 = vmatmul.bf16.gmra.mxu0 %v6021_v49 }
 0x41a   :  { %3400 = vmatmul.bf16.gmra.mxu2 %v6021_v49 }
 0x41b   :  { %4020 = vst [vmem:[#allocation12 + $0xb0] sm:$0xff] %v3528_v38  ;;  %3907 = vmatmul.bf16.gmra.mxu1 %v6018_v26 }
 0x41c   :  { %4023 = vst [vmem:[#allocation12 + $0xc8] sm:$0xff] %v3869_v50 }
 0x41d   :  { %3569 = vmatmul.bf16.gmra.mxu3 %v6018_v26  ;;  %v3361_v37 = vpop.f32.mrf.mxu2 }
 0x41e   :  { %v3362_v29 = vadd.f32 %v3361_v37, %v6220_v2  ;;  %v3701_v14 = vpop.f32.mrf.mxu0 }
 0x41f   :  { %v3702_v8 = vadd.f32 %v3701_v14, %v6212_v47 }
 0x420   :  { %v3530_v28 = vpop.f32.mrf.mxu3  ;;  %v3870_v46 = vpop.f32.mrf.mxu1 }
 0x421   :  { %v3531_v57 = vadd.f32 %v3530_v28, %v3362_v29  ;;  %v3871_v52 = vadd.f32 %v3870_v46, %v3702_v8 }
 0x423   :  { %4022 = vst [vmem:[#allocation12 + $0xc0] sm:$0xff] %v3531_v57 }
 0x424   :  { %4025 = vst [vmem:[#allocation12 + $0xd8] sm:$0xff] %v3871_v52 }
 0x425   :  { %v3363_v27 = vpop.f32.mrf.mxu2 }
 0x426   :  { %v3364_v49 = vadd.f32 %v3363_v27, %v6220_v2  ;;  %v3704_v1 = vpop.f32.mrf.mxu0 }
 0x427   :  { %v3705_v26 = vadd.f32 %v3704_v1, %v6212_v47 }
 0x428   :  { %v3532_v17 = vpop.f32.mrf.mxu3  ;;  %v3873_v10 = vpop.f32.mrf.mxu1 }
 0x429   :  { %v3533_v36 = vadd.f32 %v3532_v17, %v3364_v49  ;;  %v3874_v45 = vadd.f32 %v3873_v10, %v3705_v26  ;;  %3743 = vmatmul.bf16.gmra.mxu0 %v6029_v40 }
 0x42a   :  { %3405 = vmatmul.bf16.gmra.mxu2 %v6029_v40 }
 0x42b   :  { %4024 = vst [vmem:[#allocation12 + $0xd0] sm:$0xff] %v3533_v36  ;;  %3912 = vmatmul.bf16.gmra.mxu1 %v6026_v11 }
 0x42c   :  { %4027 = vst [vmem:[#allocation12 + $0xe8] sm:$0xff] %v3874_v45 }
 0x42d   :  { %3574 = vmatmul.bf16.gmra.mxu3 %v6026_v11  ;;  %v3366_v55 = vpop.f32.mrf.mxu2 }
 0x42e   :  { %v3367_v15 = vadd.f32 %v3366_v55, %v6220_v2  ;;  %v3706_v3 = vpop.f32.mrf.mxu0 }
 0x42f   :  { %v3707_v5 = vadd.f32 %v3706_v3, %v6212_v47 }
 0x430   :  { %v3535_v61 = vpop.f32.mrf.mxu3  ;;  %v3875_v41 = vpop.f32.mrf.mxu1 }
 0x431   :  { %v3536_v34 = vadd.f32 %v3535_v61, %v3367_v15  ;;  %v3876_v31 = vadd.f32 %v3875_v41, %v3707_v5 }
 0x433   :  { %4026 = vst [vmem:[#allocation12 + $0xe0] sm:$0xff] %v3536_v34 }
 0x434   :  { %4029 = vst [vmem:[#allocation12 + $0xf8] sm:$0xff] %v3876_v31 }
 0x435   :  { %v3368_v58 = vpop.f32.mrf.mxu2 }
 0x436   :  { %v3369_v40 = vadd.f32 %v3368_v58, %v6220_v2  ;;  %v3709_v24 = vpop.f32.mrf.mxu0 }
 0x437   :  { %v3710_v11 = vadd.f32 %v3709_v24, %v6212_v47 }
 0x438   :  { %v3537_v42 = vpop.f32.mrf.mxu3  ;;  %v3878_v38 = vpop.f32.mrf.mxu1 }
 0x439   :  { %v3538_v25 = vadd.f32 %v3537_v42, %v3369_v40  ;;  %v3879_v19 = vadd.f32 %v3878_v38, %v3710_v11  ;;  %3748 = vmatmul.bf16.gmra.mxu0 %v6037_v33 }
 0x43a   :  { %3410 = vmatmul.bf16.gmra.mxu2 %v6037_v33 }
 0x43b   :  { %4028 = vst [vmem:[#allocation12 + $0xf0] sm:$0xff] %v3538_v25  ;;  %3917 = vmatmul.bf16.gmra.mxu1 %v6034_v6 }
 0x43c   :  { %4031 = vst [vmem:[#allocation12 + $0x108] sm:$0xff] %v3879_v19 }
 0x43d   :  { %3579 = vmatmul.bf16.gmra.mxu3 %v6034_v6  ;;  %v3371_v18 = vpop.f32.mrf.mxu2 }
 0x43e   :  { %v3372_v50 = vadd.f32 %v3371_v18, %v6220_v2  ;;  %v3711_v29 = vpop.f32.mrf.mxu0 }
 0x43f   :  { %v3712_v14 = vadd.f32 %v3711_v29, %v6212_v47 }
 0x440   :  { %v3540_v37 = vpop.f32.mrf.mxu3  ;;  %v3880_v57 = vpop.f32.mrf.mxu1 }
 0x441   :  { %v3541_v28 = vadd.f32 %v3540_v37, %v3372_v50  ;;  %v3881_v8 = vadd.f32 %v3880_v57, %v3712_v14 }
 0x443   :  { %4030 = vst [vmem:[#allocation12 + $0x100] sm:$0xff] %v3541_v28 }
 0x444   :  { %4033 = vst [vmem:[#allocation12 + $0x118] sm:$0xff] %v3881_v8 }
 0x445   :  { %v3373_v46 = vpop.f32.mrf.mxu2 }
 0x446   :  { %v3374_v33 = vadd.f32 %v3373_v46, %v6220_v2  ;;  %v3714_v27 = vpop.f32.mrf.mxu0 }
 0x447   :  { %v3715_v6 = vadd.f32 %v3714_v27, %v6212_v47 }
 0x448   :  { %v3542_v52 = vpop.f32.mrf.mxu3  ;;  %v3883_v17 = vpop.f32.mrf.mxu1 }
 0x449   :  { %v3543_v49 = vadd.f32 %v3542_v52, %v3374_v33  ;;  %v3884_v1 = vadd.f32 %v3883_v17, %v3715_v6  ;;  %3753 = vmatmul.bf16.gmra.mxu0 %v6051_v39 }
 0x44a   :  { %3415 = vmatmul.bf16.gmra.mxu2 %v6051_v39 }
 0x44b   :  { %4032 = vst [vmem:[#allocation12 + $0x110] sm:$0xff] %v3543_v49  ;;  %3922 = vmatmul.bf16.gmra.mxu1 %v6042_v0 }
 0x44c   :  { %4035 = vst [vmem:[#allocation12 + $0x128] sm:$0xff] %v3884_v1 }
 0x44d   :  { %3584 = vmatmul.bf16.gmra.mxu3 %v6042_v0  ;;  %v3376_v36 = vpop.f32.mrf.mxu2 }
 0x44e   :  { %v3377_v26 = vadd.f32 %v3376_v36, %v6220_v2  ;;  %v3716_v45 = vpop.f32.mrf.mxu0 }
 0x44f   :  { %v3717_v15 = vadd.f32 %v3716_v45, %v6212_v47 }
 0x450   :  { %v3545_v10 = vpop.f32.mrf.mxu3  ;;  %v3885_v61 = vpop.f32.mrf.mxu1 }
 0x451   :  { %v3546_v55 = vadd.f32 %v3545_v10, %v3377_v26  ;;  %v3886_v3 = vadd.f32 %v3885_v61, %v3717_v15  ;;  %v6470_v61 = vld [vmem:[#allocation17_spill] sm:$0xff] }
 0x453   :  { %4034 = vst [vmem:[#allocation12 + $0x120] sm:$0xff] %v3546_v55 }
 0x454   :  { %4037 = vst [vmem:[#allocation12 + $0x138] sm:$0xff] %v3886_v3 }
 0x455   :  { %v3378_v34 = vpop.f32.mrf.mxu2 }
 0x456   :  { %v3379_v39 = vadd.f32 %v3378_v34, %v6220_v2  ;;  %v3719_v41 = vpop.f32.mrf.mxu0 }
 0x457   :  { %v3720_v0 = vadd.f32 %v3719_v41, %v6212_v47 }
 0x458   :  { %v3547_v5 = vpop.f32.mrf.mxu3  ;;  %v3888_v58 = vpop.f32.mrf.mxu1 }
 0x459   :  { %v3548_v31 = vadd.f32 %v3547_v5, %v3379_v39  ;;  %v3889_v40 = vadd.f32 %v3888_v58, %v3720_v0  ;;  %3758 = vmatmul.bf16.gmra.mxu0 %v6077_v4 }
 0x45a   :  { %3420 = vmatmul.bf16.gmra.mxu2 %v6077_v4 }
 0x45b   :  { %4036 = vst [vmem:[#allocation12 + $0x130] sm:$0xff] %v3548_v31  ;;  %3927 = vmatmul.bf16.gmra.mxu1 %v6074_v13 }
 0x45c   :  { %4039 = vst [vmem:[#allocation12 + $0x148] sm:$0xff] %v3889_v40 }
 0x45d   :  { %3589 = vmatmul.bf16.gmra.mxu3 %v6074_v13  ;;  %v3381_v42 = vpop.f32.mrf.mxu2 }
 0x45e   :  { %v3382_v24 = vadd.f32 %v3381_v42, %v6220_v2  ;;  %v3721_v11 = vpop.f32.mrf.mxu0 }
 0x45f   :  { %v3722_v19 = vadd.f32 %v3721_v11, %v6212_v47 }
 0x460   :  { %v3550_v25 = vpop.f32.mrf.mxu3  ;;  %v3890_v18 = vpop.f32.mrf.mxu1 }
 0x461   :  { %v3551_v38 = vadd.f32 %v3550_v25, %v3382_v24  ;;  %v3891_v50 = vadd.f32 %v3890_v18, %v3722_v19  ;;  %v6471_v18 = vld [vmem:[#allocation19_spill] sm:$0xff] }
 0x463   :  { %4038 = vst [vmem:[#allocation12 + $0x140] sm:$0xff] %v3551_v38 }
 0x464   :  { %4041 = vst [vmem:[#allocation12 + $0x158] sm:$0xff] %v3891_v50  ;;  %v6472_v50 = vld [vmem:[#allocation18_spill] sm:$0xff] }
 0x465   :  { %v3383_v37 = vpop.f32.mrf.mxu2 }
 0x466   :  { %v3384_v4 = vadd.f32 %v3383_v37, %v6220_v2  ;;  %v3724_v28 = vpop.f32.mrf.mxu0 }
 0x467   :  { %v3725_v13 = vadd.f32 %v3724_v28, %v6212_v47 }
 0x468   :  { %v3552_v29 = vpop.f32.mrf.mxu3  ;;  %v3893_v57 = vpop.f32.mrf.mxu1 }
 0x469   :  { %v3553_v14 = vadd.f32 %v3552_v29, %v3384_v4  ;;  %v3894_v8 = vadd.f32 %v3893_v57, %v3725_v13  ;;  %3763 = vmatmul.bf16.gmra.mxu0 %v6085_v12 }
 0x46a   :  { %3425 = vmatmul.bf16.gmra.mxu2 %v6085_v12 }
 0x46b   :  { %4040 = vst [vmem:[#allocation12 + $0x150] sm:$0xff] %v3553_v14  ;;  %3932 = vmatmul.bf16.gmra.mxu1 %v6082_v48 }
 0x46c   :  { %4043 = vst [vmem:[#allocation12 + $0x168] sm:$0xff] %v3894_v8 }
 0x46d   :  { %3594 = vmatmul.bf16.gmra.mxu3 %v6082_v48  ;;  %v3386_v46 = vpop.f32.mrf.mxu2 }
 0x46e   :  { %v3387_v33 = vadd.f32 %v3386_v46, %v6220_v2  ;;  %v3726_v27 = vpop.f32.mrf.mxu0 }
 0x46f   :  { %v3727_v6 = vadd.f32 %v3726_v27, %v6212_v47 }
 0x470   :  { %v3555_v52 = vpop.f32.mrf.mxu3  ;;  %v3895_v17 = vpop.f32.mrf.mxu1 }
 0x471   :  { %v3556_v49 = vadd.f32 %v3555_v52, %v3387_v33  ;;  %v3896_v1 = vadd.f32 %v3895_v17, %v3727_v6 }
 0x473   :  { %4042 = vst [vmem:[#allocation12 + $0x160] sm:$0xff] %v3556_v49 }
 0x474   :  { %4045 = vst [vmem:[#allocation12 + $0x178] sm:$0xff] %v3896_v1 }
 0x475   :  { %v3388_v36 = vpop.f32.mrf.mxu2 }
 0x476   :  { %v3389_v12 = vadd.f32 %v3388_v36, %v6220_v2  ;;  %v3729_v10 = vpop.f32.mrf.mxu0  ;;  %v6473_v36 = vld [vmem:[#allocation20_spill] sm:$0xff] }
 0x477   :  { %v3730_v48 = vadd.f32 %v3729_v10, %v6212_v47 }
 0x478   :  { %v3557_v26 = vpop.f32.mrf.mxu3  ;;  %v3898_v55 = vpop.f32.mrf.mxu1 }
 0x479   :  { %v3558_v45 = vadd.f32 %v3557_v26, %v3389_v12  ;;  %v3899_v15 = vadd.f32 %v3898_v55, %v3730_v48  ;;  %3768 = vmatmul.bf16.gmra.mxu0 %v6093_v32 }
 0x47a   :  { %3430 = vmatmul.bf16.gmra.mxu2 %v6093_v32 }
 0x47b   :  { %4044 = vst [vmem:[#allocation12 + $0x170] sm:$0xff] %v3558_v45  ;;  %3937 = vmatmul.bf16.gmra.mxu1 %v6470_v61 }
 0x47c   :  { %4047 = vst [vmem:[#allocation12 + $0x188] sm:$0xff] %v3899_v15 }
 0x47d   :  { %3599 = vmatmul.bf16.gmra.mxu3 %v6470_v61  ;;  %v3391_v3 = vpop.f32.mrf.mxu2 }
 0x47e   :  { %v3392_v34 = vadd.f32 %v3391_v3, %v6220_v2  ;;  %v3731_v5 = vpop.f32.mrf.mxu0 }
 0x47f   :  { %v3732_v31 = vadd.f32 %v3731_v5, %v6212_v47 }
 0x480   :  { %v3560_v39 = vpop.f32.mrf.mxu3  ;;  %v3900_v0 = vpop.f32.mrf.mxu1 }
 0x481   :  { %v3561_v41 = vadd.f32 %v3560_v39, %v3392_v34  ;;  %v3901_v58 = vadd.f32 %v3900_v0, %v3732_v31 }
 0x483   :  { %4046 = vst [vmem:[#allocation12 + $0x180] sm:$0xff] %v3561_v41 }
 0x484   :  { %4049 = vst [vmem:[#allocation12 + $0x198] sm:$0xff] %v3901_v58 }
 0x485   :  { %v3393_v40 = vpop.f32.mrf.mxu2 }
 0x486   :  { %v3394_v32 = vadd.f32 %v3393_v40, %v6220_v2  ;;  %v3734_v24 = vpop.f32.mrf.mxu0 }
 0x487   :  { %v3735_v11 = vadd.f32 %v3734_v24, %v6212_v47 }
 0x488   :  { %v3562_v42 = vpop.f32.mrf.mxu3  ;;  %v3903_v38 = vpop.f32.mrf.mxu1 }
 0x489   :  { %v3563_v25 = vadd.f32 %v3562_v42, %v3394_v32  ;;  %v3904_v19 = vadd.f32 %v3903_v38, %v3735_v11  ;;  %3773 = vmatmul.bf16.gmra.mxu0 %v6471_v18 }
 0x48a   :  { %3435 = vmatmul.bf16.gmra.mxu2 %v6471_v18 }
 0x48b   :  { %4048 = vst [vmem:[#allocation12 + $0x190] sm:$0xff] %v3563_v25  ;;  %3942 = vmatmul.bf16.gmra.mxu1 %v6472_v50 }
 0x48c   :  { %4051 = vst [vmem:[#allocation12 + $0x1a8] sm:$0xff] %v3904_v19 }
 0x48d   :  { %3604 = vmatmul.bf16.gmra.mxu3 %v6472_v50  ;;  %v3396_v37 = vpop.f32.mrf.mxu2 }
 0x48e   :  { %v3397_v4 = vadd.f32 %v3396_v37, %v6220_v2  ;;  %v3736_v28 = vpop.f32.mrf.mxu0 }
 0x48f   :  { %v3737_v13 = vadd.f32 %v3736_v28, %v6212_v47 }
 0x490   :  { %v3565_v29 = vpop.f32.mrf.mxu3  ;;  %v3905_v57 = vpop.f32.mrf.mxu1 }
 0x491   :  { %v3566_v14 = vadd.f32 %v3565_v29, %v3397_v4  ;;  %v3906_v8 = vadd.f32 %v3905_v57, %v3737_v13 }
 0x493   :  { %4050 = vst [vmem:[#allocation12 + $0x1a0] sm:$0xff] %v3566_v14 }
 0x494   :  { %4053 = vst [vmem:[#allocation12 + $0x1b8] sm:$0xff] %v3906_v8 }
 0x495   :  { %v3398_v46 = vpop.f32.mrf.mxu2 }
 0x496   :  { %v3399_v33 = vadd.f32 %v3398_v46, %v6220_v2  ;;  %v3739_v27 = vpop.f32.mrf.mxu0 }
 0x497   :  { %v3740_v6 = vadd.f32 %v3739_v27, %v6212_v47 }
 0x498   :  { %v3567_v52 = vpop.f32.mrf.mxu3  ;;  %v3908_v17 = vpop.f32.mrf.mxu1 }
 0x499   :  { %v3568_v49 = vadd.f32 %v3567_v52, %v3399_v33  ;;  %v3909_v1 = vadd.f32 %v3908_v17, %v3740_v6  ;;  %3778 = vmatmul.bf16.gmra.mxu0 %v6109_v30 }
 0x49a   :  { %3440 = vmatmul.bf16.gmra.mxu2 %v6109_v30 }
 0x49b   :  { %4052 = vst [vmem:[#allocation12 + $0x1b0] sm:$0xff] %v3568_v49  ;;  %3947 = vmatmul.bf16.gmra.mxu1 %v6473_v36 }
 0x49c   :  { %4055 = vst [vmem:[#allocation12 + $0x1c8] sm:$0xff] %v3909_v1 }
 0x49d   :  { %3609 = vmatmul.bf16.gmra.mxu3 %v6473_v36  ;;  %v3401_v12 = vpop.f32.mrf.mxu2 }
 0x49e   :  { %v3402_v26 = vadd.f32 %v3401_v12, %v6220_v2  ;;  %v3741_v45 = vpop.f32.mrf.mxu0 }
 0x49f   :  { %v3742_v55 = vadd.f32 %v3741_v45, %v6212_v47 }
 0x4a0   :  { %v3570_v10 = vpop.f32.mrf.mxu3  ;;  %v3910_v15 = vpop.f32.mrf.mxu1 }
 0x4a1   :  { %v3571_v48 = vadd.f32 %v3570_v10, %v3402_v26  ;;  %v3911_v61 = vadd.f32 %v3910_v15, %v3742_v55 }
 0x4a3   :  { %4054 = vst [vmem:[#allocation12 + $0x1c0] sm:$0xff] %v3571_v48 }
 0x4a4   :  { %4057 = vst [vmem:[#allocation12 + $0x1d8] sm:$0xff] %v3911_v61 }
 0x4a5   :  { %v3403_v3 = vpop.f32.mrf.mxu2 }
 0x4a6   :  { %v3404_v30 = vadd.f32 %v3403_v3, %v6220_v2  ;;  %v3744_v39 = vpop.f32.mrf.mxu0 }
 0x4a7   :  { %v3745_v41 = vadd.f32 %v3744_v39, %v6212_v47 }
 0x4a8   :  { %v3572_v34 = vpop.f32.mrf.mxu3  ;;  %v3913_v31 = vpop.f32.mrf.mxu1 }
 0x4a9   :  { %v3573_v5 = vadd.f32 %v3572_v34, %v3404_v30  ;;  %v3914_v0 = vadd.f32 %v3913_v31, %v3745_v41  ;;  %3783 = vmatmul.bf16.gmra.mxu0 %v6121_v43 }
 0x4aa   :  { %3445 = vmatmul.bf16.gmra.mxu2 %v6121_v43 }
 0x4ab   :  { %4056 = vst [vmem:[#allocation12 + $0x1d0] sm:$0xff] %v3573_v5  ;;  %3952 = vmatmul.bf16.gmra.mxu1 %v6114_v56 }
 0x4ac   :  { %4059 = vst [vmem:[#allocation12 + $0x1e8] sm:$0xff] %v3914_v0 }
 0x4ad   :  { %3614 = vmatmul.bf16.gmra.mxu3 %v6114_v56  ;;  %v3406_v58 = vpop.f32.mrf.mxu2 }
 0x4ae   :  { %v3407_v40 = vadd.f32 %v3406_v58, %v6220_v2  ;;  %v3746_v42 = vpop.f32.mrf.mxu0 }
 0x4af   :  { %v3747_v25 = vadd.f32 %v3746_v42, %v6212_v47 }
 0x4b0   :  { %v3575_v32 = vpop.f32.mrf.mxu3  ;;  %v3915_v11 = vpop.f32.mrf.mxu1 }
 0x4b1   :  { %v3576_v24 = vadd.f32 %v3575_v32, %v3407_v40  ;;  %v3916_v38 = vadd.f32 %v3915_v11, %v3747_v25 }
 0x4b3   :  { %4058 = vst [vmem:[#allocation12 + $0x1e0] sm:$0xff] %v3576_v24 }
 0x4b4   :  { %4061 = vst [vmem:[#allocation12 + $0x1f8] sm:$0xff] %v3916_v38 }
 0x4b5   :  { %v3408_v19 = vpop.f32.mrf.mxu2 }
 0x4b6   :  { %v3409_v43 = vadd.f32 %v3408_v19, %v6220_v2  ;;  %v3749_v50 = vpop.f32.mrf.mxu0 }
 0x4b7   :  { %v3750_v56 = vadd.f32 %v3749_v50, %v6212_v47 }
 0x4b8   :  { %v3577_v18 = vpop.f32.mrf.mxu3  ;;  %v3918_v4 = vpop.f32.mrf.mxu1 }
 0x4b9   :  { %v3578_v37 = vadd.f32 %v3577_v18, %v3409_v43  ;;  %v3919_v29 = vadd.f32 %v3918_v4, %v3750_v56  ;;  %3788 = vmatmul.bf16.gmra.mxu0 %v6133_v20 }
 0x4ba   :  { %3450 = vmatmul.bf16.gmra.mxu2 %v6133_v20 }
 0x4bb   :  { %4060 = vst [vmem:[#allocation12 + $0x1f0] sm:$0xff] %v3578_v37  ;;  %3957 = vmatmul.bf16.gmra.mxu1 %v6126_v60 }
 0x4bc   :  { %4063 = vst [vmem:[#allocation12 + $0x208] sm:$0xff] %v3919_v29 }
 0x4bd   :  { %3619 = vmatmul.bf16.gmra.mxu3 %v6126_v60  ;;  %v3411_v28 = vpop.f32.mrf.mxu2 }
 0x4be   :  { %v3412_v14 = vadd.f32 %v3411_v28, %v6220_v2  ;;  %v3751_v57 = vpop.f32.mrf.mxu0 }
 0x4bf   :  { %v3752_v46 = vadd.f32 %v3751_v57, %v6212_v47 }
 0x4c0   :  { %v3580_v13 = vpop.f32.mrf.mxu3  ;;  %v3920_v33 = vpop.f32.mrf.mxu1 }
 0x4c1   :  { %v3581_v8 = vadd.f32 %v3580_v13, %v3412_v14  ;;  %v3921_v52 = vadd.f32 %v3920_v33, %v3752_v46 }
 0x4c3   :  { %4062 = vst [vmem:[#allocation12 + $0x200] sm:$0xff] %v3581_v8 }
 0x4c4   :  { %4065 = vst [vmem:[#allocation12 + $0x218] sm:$0xff] %v3921_v52 }
 0x4c5   :  { %v3413_v27 = vpop.f32.mrf.mxu2 }
 0x4c6   :  { %v3414_v20 = vadd.f32 %v3413_v27, %v6220_v2  ;;  %v3754_v6 = vpop.f32.mrf.mxu0 }
 0x4c7   :  { %v3755_v60 = vadd.f32 %v3754_v6, %v6212_v47 }
 0x4c8   :  { %v3582_v49 = vpop.f32.mrf.mxu3  ;;  %v3923_v1 = vpop.f32.mrf.mxu1 }
 0x4c9   :  { %v3583_v17 = vadd.f32 %v3582_v49, %v3414_v20  ;;  %v3924_v36 = vadd.f32 %v3923_v1, %v3755_v60  ;;  %3793 = vmatmul.bf16.gmra.mxu0 %v6145_v23 }
 0x4ca   :  { %3455 = vmatmul.bf16.gmra.mxu2 %v6145_v23 }
 0x4cb   :  { %4064 = vst [vmem:[#allocation12 + $0x210] sm:$0xff] %v3583_v17  ;;  %3962 = vmatmul.bf16.gmra.mxu1 %v6138_v21 }
 0x4cc   :  { %4067 = vst [vmem:[#allocation12 + $0x228] sm:$0xff] %v3924_v36 }
 0x4cd   :  { %3624 = vmatmul.bf16.gmra.mxu3 %v6138_v21  ;;  %v3416_v12 = vpop.f32.mrf.mxu2 }
 0x4ce   :  { %v3417_v26 = vadd.f32 %v3416_v12, %v6220_v2  ;;  %v3756_v45 = vpop.f32.mrf.mxu0 }
 0x4cf   :  { %v3757_v55 = vadd.f32 %v3756_v45, %v6212_v47 }
 0x4d0   :  { %v3585_v10 = vpop.f32.mrf.mxu3  ;;  %v3925_v15 = vpop.f32.mrf.mxu1 }
 0x4d1   :  { %v3586_v48 = vadd.f32 %v3585_v10, %v3417_v26  ;;  %v3926_v61 = vadd.f32 %v3925_v15, %v3757_v55 }
 0x4d3   :  { %4066 = vst [vmem:[#allocation12 + $0x220] sm:$0xff] %v3586_v48 }
 0x4d4   :  { %4069 = vst [vmem:[#allocation12 + $0x238] sm:$0xff] %v3926_v61 }
 0x4d5   :  { %v3418_v3 = vpop.f32.mrf.mxu2 }
 0x4d6   :  { %v3419_v23 = vadd.f32 %v3418_v3, %v6220_v2  ;;  %v3759_v34 = vpop.f32.mrf.mxu0 }
 0x4d7   :  { %v3760_v21 = vadd.f32 %v3759_v34, %v6212_v47 }
 0x4d8   :  { %v3587_v30 = vpop.f32.mrf.mxu3  ;;  %v3928_v5 = vpop.f32.mrf.mxu1 }
 0x4d9   :  { %v3588_v39 = vadd.f32 %v3587_v30, %v3419_v23  ;;  %v3929_v41 = vadd.f32 %v3928_v5, %v3760_v21  ;;  %3798 = vmatmul.bf16.gmra.mxu0 %v6157_v54 }
 0x4da   :  { %3460 = vmatmul.bf16.gmra.mxu2 %v6157_v54 }
 0x4db   :  { %4068 = vst [vmem:[#allocation12 + $0x230] sm:$0xff] %v3588_v39  ;;  %3967 = vmatmul.bf16.gmra.mxu1 %v6150_v63 }
 0x4dc   :  { %4071 = vst [vmem:[#allocation12 + $0x248] sm:$0xff] %v3929_v41 }
 0x4dd   :  { %3629 = vmatmul.bf16.gmra.mxu3 %v6150_v63  ;;  %v3421_v31 = vpop.f32.mrf.mxu2 }
 0x4de   :  { %v3422_v0 = vadd.f32 %v3421_v31, %v6220_v2  ;;  %v3761_v40 = vpop.f32.mrf.mxu0 }
 0x4df   :  { %v3762_v42 = vadd.f32 %v3761_v40, %v6212_v47 }
 0x4e0   :  { %v3590_v58 = vpop.f32.mrf.mxu3  ;;  %v3930_v24 = vpop.f32.mrf.mxu1 }
 0x4e1   :  { %v3591_v32 = vadd.f32 %v3590_v58, %v3422_v0  ;;  %v3931_v25 = vadd.f32 %v3930_v24, %v3762_v42 }
 0x4e3   :  { %4070 = vst [vmem:[#allocation12 + $0x240] sm:$0xff] %v3591_v32 }
 0x4e4   :  { %4073 = vst [vmem:[#allocation12 + $0x258] sm:$0xff] %v3931_v25 }
 0x4e5   :  { %v3423_v11 = vpop.f32.mrf.mxu2 }
 0x4e6   :  { %v3424_v54 = vadd.f32 %v3423_v11, %v6220_v2  ;;  %v3764_v19 = vpop.f32.mrf.mxu0 }
 0x4e7   :  { %v3765_v63 = vadd.f32 %v3764_v19, %v6212_v47 }
 0x4e8   :  { %v3592_v38 = vpop.f32.mrf.mxu3  ;;  %v3933_v18 = vpop.f32.mrf.mxu1 }
 0x4e9   :  { %v3593_v43 = vadd.f32 %v3592_v38, %v3424_v54  ;;  %v3934_v50 = vadd.f32 %v3933_v18, %v3765_v63  ;;  %3803 = vmatmul.bf16.gmra.mxu0 %v6169_v59 }
 0x4ea   :  { %3465 = vmatmul.bf16.gmra.mxu2 %v6169_v59 }
 0x4eb   :  { %4072 = vst [vmem:[#allocation12 + $0x250] sm:$0xff] %v3593_v43  ;;  %3972 = vmatmul.bf16.gmra.mxu1 %v6162_v62 }
 0x4ec   :  { %4075 = vst [vmem:[#allocation12 + $0x268] sm:$0xff] %v3934_v50 }
 0x4ed   :  { %3634 = vmatmul.bf16.gmra.mxu3 %v6162_v62  ;;  %v3426_v37 = vpop.f32.mrf.mxu2 }
 0x4ee   :  { %v3427_v56 = vadd.f32 %v3426_v37, %v6220_v2  ;;  %v3766_v29 = vpop.f32.mrf.mxu0 }
 0x4ef   :  { %v3767_v14 = vadd.f32 %v3766_v29, %v6212_v47 }
 0x4f0   :  { %v3595_v4 = vpop.f32.mrf.mxu3  ;;  %v3935_v13 = vpop.f32.mrf.mxu1 }
 0x4f1   :  { %v3596_v28 = vadd.f32 %v3595_v4, %v3427_v56  ;;  %v3936_v57 = vadd.f32 %v3935_v13, %v3767_v14 }
 0x4f3   :  { %4074 = vst [vmem:[#allocation12 + $0x260] sm:$0xff] %v3596_v28 }
 0x4f4   :  { %4077 = vst [vmem:[#allocation12 + $0x278] sm:$0xff] %v3936_v57 }
 0x4f5   :  { %v3428_v8 = vpop.f32.mrf.mxu2 }
 0x4f6   :  { %v3429_v59 = vadd.f32 %v3428_v8, %v6220_v2  ;;  %v3769_v33 = vpop.f32.mrf.mxu0 }
 0x4f7   :  { %v3770_v62 = vadd.f32 %v3769_v33, %v6212_v47 }
 0x4f8   :  { %v3597_v46 = vpop.f32.mrf.mxu3  ;;  %v3938_v27 = vpop.f32.mrf.mxu1 }
 0x4f9   :  { %v3598_v52 = vadd.f32 %v3597_v46, %v3429_v59  ;;  %v3939_v20 = vadd.f32 %v3938_v27, %v3770_v62  ;;  %3808 = vmatmul.bf16.gmra.mxu0 %v6181_v16 }
 0x4fa   :  { %3470 = vmatmul.bf16.gmra.mxu2 %v6181_v16 }
 0x4fb   :  { %4076 = vst [vmem:[#allocation12 + $0x270] sm:$0xff] %v3598_v52  ;;  %3977 = vmatmul.bf16.gmra.mxu1 %v6174_v9 }
 0x4fc   :  { %4079 = vst [vmem:[#allocation12 + $0x288] sm:$0xff] %v3939_v20 }
 0x4fd   :  { %3639 = vmatmul.bf16.gmra.mxu3 %v6174_v9  ;;  %v3431_v49 = vpop.f32.mrf.mxu2 }
 0x4fe   :  { %v3432_v6 = vadd.f32 %v3431_v49, %v6220_v2  ;;  %v3771_v60 = vpop.f32.mrf.mxu0 }
 0x4ff   :  { %v3772_v36 = vadd.f32 %v3771_v60, %v6212_v47 }
 0x500   :  { %v3600_v17 = vpop.f32.mrf.mxu3  ;;  %v3940_v12 = vpop.f32.mrf.mxu1 }
 0x501   :  { %v3601_v1 = vadd.f32 %v3600_v17, %v3432_v6  ;;  %v3941_v26 = vadd.f32 %v3940_v12, %v3772_v36 }
 0x503   :  { %4078 = vst [vmem:[#allocation12 + $0x280] sm:$0xff] %v3601_v1 }
 0x504   :  { %4081 = vst [vmem:[#allocation12 + $0x298] sm:$0xff] %v3941_v26 }
 0x505   :  { %v3433_v10 = vpop.f32.mrf.mxu2 }
 0x506   :  { %v3434_v16 = vadd.f32 %v3433_v10, %v6220_v2  ;;  %v3774_v48 = vpop.f32.mrf.mxu0 }
 0x507   :  { %v3775_v9 = vadd.f32 %v3774_v48, %v6212_v47 }
 0x508   :  { %v3602_v45 = vpop.f32.mrf.mxu3  ;;  %v3943_v15 = vpop.f32.mrf.mxu1 }
 0x509   :  { %v3603_v55 = vadd.f32 %v3602_v45, %v3434_v16  ;;  %v3944_v61 = vadd.f32 %v3943_v15, %v3775_v9  ;;  %3813 = vmatmul.bf16.gmra.mxu0 %v6193_v51 }
 0x50a   :  { %3475 = vmatmul.bf16.gmra.mxu2 %v6193_v51 }
 0x50b   :  { %4080 = vst [vmem:[#allocation12 + $0x290] sm:$0xff] %v3603_v55  ;;  %3982 = vmatmul.bf16.gmra.mxu1 %v6186_v22 }
 0x50c   :  { %4083 = vst [vmem:[#allocation12 + $0x2a8] sm:$0xff] %v3944_v61 }
 0x50d   :  { %3644 = vmatmul.bf16.gmra.mxu3 %v6186_v22  ;;  %v3436_v3 = vpop.f32.mrf.mxu2 }
 0x50e   :  { %v3437_v23 = vadd.f32 %v3436_v3, %v6220_v2  ;;  %v3776_v34 = vpop.f32.mrf.mxu0 }
 0x50f   :  { %v3777_v21 = vadd.f32 %v3776_v34, %v6212_v47 }
 0x510   :  { %v3605_v30 = vpop.f32.mrf.mxu3  ;;  %v3945_v5 = vpop.f32.mrf.mxu1 }
 0x511   :  { %v3606_v39 = vadd.f32 %v3605_v30, %v3437_v23  ;;  %v3946_v41 = vadd.f32 %v3945_v5, %v3777_v21 }
 0x513   :  { %4082 = vst [vmem:[#allocation12 + $0x2a0] sm:$0xff] %v3606_v39 }
 0x514   :  { %4085 = vst [vmem:[#allocation12 + $0x2b8] sm:$0xff] %v3946_v41 }
 0x515   :  { %v3438_v31 = vpop.f32.mrf.mxu2 }
 0x516   :  { %v3439_v51 = vadd.f32 %v3438_v31, %v6220_v2  ;;  %v3779_v58 = vpop.f32.mrf.mxu0 }
 0x517   :  { %v3780_v22 = vadd.f32 %v3779_v58, %v6212_v47 }
 0x518   :  { %v3607_v0 = vpop.f32.mrf.mxu3  ;;  %v3948_v32 = vpop.f32.mrf.mxu1 }
 0x519   :  { %v3608_v40 = vadd.f32 %v3607_v0, %v3439_v51  ;;  %v3949_v42 = vadd.f32 %v3948_v32, %v3780_v22  ;;  %3818 = vmatmul.bf16.gmra.mxu0 %v6205_v44 }
 0x51a   :  { %3480 = vmatmul.bf16.gmra.mxu2 %v6205_v44 }
 0x51b   :  { %4084 = vst [vmem:[#allocation12 + $0x2b0] sm:$0xff] %v3608_v40  ;;  %3987 = vmatmul.bf16.gmra.mxu1 %v6198_v35 }
 0x51c   :  { %4087 = vst [vmem:[#allocation12 + $0x2c8] sm:$0xff] %v3949_v42 }
 0x51d   :  { %3649 = vmatmul.bf16.gmra.mxu3 %v6198_v35  ;;  %v3441_v24 = vpop.f32.mrf.mxu2 }
 0x51e   :  { %v3442_v25 = vadd.f32 %v3441_v24, %v6220_v2  ;;  %v3781_v54 = vpop.f32.mrf.mxu0 }
 0x51f   :  { %v3782_v19 = vadd.f32 %v3781_v54, %v6212_v47 }
 0x520   :  { %v3610_v11 = vpop.f32.mrf.mxu3  ;;  %v3950_v43 = vpop.f32.mrf.mxu1 }
 0x521   :  { %v3611_v38 = vadd.f32 %v3610_v11, %v3442_v25  ;;  %v3951_v63 = vadd.f32 %v3950_v43, %v3782_v19 }
 0x523   :  { %4086 = vst [vmem:[#allocation12 + $0x2c0] sm:$0xff] %v3611_v38 }
 0x524   :  { %4089 = vst [vmem:[#allocation12 + $0x2d8] sm:$0xff] %v3951_v63 }
 0x525   :  { %v3443_v18 = vpop.f32.mrf.mxu2 }
 0x526   :  { %v3444_v44 = vadd.f32 %v3443_v18, %v6220_v2  ;;  %v3784_v37 = vpop.f32.mrf.mxu0 }
 0x527   :  { %v3785_v35 = vadd.f32 %v3784_v37, %v6212_v47 }
 0x528   :  { %v3612_v50 = vpop.f32.mrf.mxu3  ;;  %v3953_v4 = vpop.f32.mrf.mxu1 }
 0x529   :  { %v3613_v56 = vadd.f32 %v3612_v50, %v3444_v44  ;;  %v3954_v29 = vadd.f32 %v3953_v4, %v3785_v35  ;;  %3823 = vmatmul.bf16.gmra.mxu0 %v6224_v53 }
 0x52a   :  { %3485 = vmatmul.bf16.gmra.mxu2 %v6224_v53 }
 0x52b   :  { %4088 = vst [vmem:[#allocation12 + $0x2d0] sm:$0xff] %v3613_v56  ;;  %3992 = vmatmul.bf16.gmra.mxu1 %v6215_v7 }
 0x52c   :  { %4091 = vst [vmem:[#allocation12 + $0x2e8] sm:$0xff] %v3954_v29 }
 0x52d   :  { %3654 = vmatmul.bf16.gmra.mxu3 %v6215_v7  ;;  %v3446_v28 = vpop.f32.mrf.mxu2 }
 0x52e   :  { %v3447_v14 = vadd.f32 %v3446_v28, %v6220_v2  ;;  %v3786_v57 = vpop.f32.mrf.mxu0 }
 0x52f   :  { %v3787_v59 = vadd.f32 %v3786_v57, %v6212_v47 }
 0x530   :  { %v3615_v13 = vpop.f32.mrf.mxu3  ;;  %v3955_v46 = vpop.f32.mrf.mxu1 }
 0x531   :  { %v3616_v8 = vadd.f32 %v3615_v13, %v3447_v14  ;;  %v3956_v33 = vadd.f32 %v3955_v46, %v3787_v59 }
 0x533   :  { %4090 = vst [vmem:[#allocation12 + $0x2e0] sm:$0xff] %v3616_v8 }
 0x534   :  { %4093 = vst [vmem:[#allocation12 + $0x2f8] sm:$0xff] %v3956_v33 }
 0x535   :  { %v3448_v52 = vpop.f32.mrf.mxu2 }
 0x536   :  { %v3449_v53 = vadd.f32 %v3448_v52, %v6220_v2  ;;  %v3789_v27 = vpop.f32.mrf.mxu0 }
 0x537   :  { %v3790_v7 = vadd.f32 %v3789_v27, %v6212_v47 }
 0x538   :  { %v3617_v62 = vpop.f32.mrf.mxu3  ;;  %v3958_v49 = vpop.f32.mrf.mxu1 }
 0x539   :  { %v3618_v20 = vadd.f32 %v3617_v62, %v3449_v53  ;;  %v3959_v6 = vadd.f32 %v3958_v49, %v3790_v7 }
 0x53b   :  { %4092 = vst [vmem:[#allocation12 + $0x2f0] sm:$0xff] %v3618_v20 }
 0x53c   :  { %4095 = vst [vmem:[#allocation12 + $0x308] sm:$0xff] %v3959_v6 }
 0x53d   :  { %v3451_v17 = vpop.f32.mrf.mxu2 }
 0x53e   :  { %v3452_v60 = vadd.f32 %v3451_v17, %v6220_v2  ;;  %v3791_v36 = vpop.f32.mrf.mxu0 }
 0x53f   :  { %v3792_v26 = vadd.f32 %v3791_v36, %v6212_v47 }
 0x540   :  { %v3620_v1 = vpop.f32.mrf.mxu3  ;;  %v3960_v10 = vpop.f32.mrf.mxu1 }
 0x541   :  { %v3621_v12 = vadd.f32 %v3620_v1, %v3452_v60  ;;  %v3961_v16 = vadd.f32 %v3960_v10, %v3792_v26 }
 0x543   :  { %4094 = vst [vmem:[#allocation12 + $0x300] sm:$0xff] %v3621_v12 }
 0x544   :  { %4097 = vst [vmem:[#allocation12 + $0x318] sm:$0xff] %v3961_v16 }
 0x545   :  { %v3453_v45 = vpop.f32.mrf.mxu2 }
 0x546   :  { %v3454_v48 = vadd.f32 %v3453_v45, %v6220_v2  ;;  %v3794_v9 = vpop.f32.mrf.mxu0 }
 0x547   :  { %v3795_v61 = vadd.f32 %v3794_v9, %v6212_v47 }
 0x548   :  { %v3622_v55 = vpop.f32.mrf.mxu3  ;;  %v3963_v3 = vpop.f32.mrf.mxu1 }
 0x549   :  { %v3623_v15 = vadd.f32 %v3622_v55, %v3454_v48  ;;  %v3964_v23 = vadd.f32 %v3963_v3, %v3795_v61 }
 0x54b   :  { %4096 = vst [vmem:[#allocation12 + $0x310] sm:$0xff] %v3623_v15 }
 0x54c   :  { %4099 = vst [vmem:[#allocation12 + $0x328] sm:$0xff] %v3964_v23 }
 0x54d   :  { %v3456_v30 = vpop.f32.mrf.mxu2 }
 0x54e   :  { %v3457_v34 = vadd.f32 %v3456_v30, %v6220_v2  ;;  %v3796_v21 = vpop.f32.mrf.mxu0 }
 0x54f   :  { %v3797_v41 = vadd.f32 %v3796_v21, %v6212_v47 }
 0x550   :  { %v3625_v39 = vpop.f32.mrf.mxu3  ;;  %v3965_v31 = vpop.f32.mrf.mxu1 }
 0x551   :  { %v3626_v5 = vadd.f32 %v3625_v39, %v3457_v34  ;;  %v3966_v51 = vadd.f32 %v3965_v31, %v3797_v41 }
 0x553   :  { %4098 = vst [vmem:[#allocation12 + $0x320] sm:$0xff] %v3626_v5 }
 0x554   :  { %4101 = vst [vmem:[#allocation12 + $0x338] sm:$0xff] %v3966_v51 }
 0x555   :  { %v3458_v0 = vpop.f32.mrf.mxu2 }
 0x556   :  { %v3459_v58 = vadd.f32 %v3458_v0, %v6220_v2  ;;  %v3799_v22 = vpop.f32.mrf.mxu0 }
 0x557   :  { %v3800_v42 = vadd.f32 %v3799_v22, %v6212_v47 }
 0x558   :  { %v3627_v40 = vpop.f32.mrf.mxu3  ;;  %v3968_v24 = vpop.f32.mrf.mxu1 }
 0x559   :  { %v3628_v32 = vadd.f32 %v3627_v40, %v3459_v58  ;;  %v3969_v25 = vadd.f32 %v3968_v24, %v3800_v42 }
 0x55b   :  { %4100 = vst [vmem:[#allocation12 + $0x330] sm:$0xff] %v3628_v32 }
 0x55c   :  { %4103 = vst [vmem:[#allocation12 + $0x348] sm:$0xff] %v3969_v25 }
 0x55d   :  { %v3461_v11 = vpop.f32.mrf.mxu2 }
 0x55e   :  { %v3462_v54 = vadd.f32 %v3461_v11, %v6220_v2  ;;  %v3801_v19 = vpop.f32.mrf.mxu0 }
 0x55f   :  { %v3802_v63 = vadd.f32 %v3801_v19, %v6212_v47 }
 0x560   :  { %v3630_v38 = vpop.f32.mrf.mxu3  ;;  %v3970_v18 = vpop.f32.mrf.mxu1 }
 0x561   :  { %v3631_v43 = vadd.f32 %v3630_v38, %v3462_v54  ;;  %v3971_v44 = vadd.f32 %v3970_v18, %v3802_v63 }
 0x563   :  { %4102 = vst [vmem:[#allocation12 + $0x340] sm:$0xff] %v3631_v43 }
 0x564   :  { %4105 = vst [vmem:[#allocation12 + $0x358] sm:$0xff] %v3971_v44 }
 0x565   :  { %v3463_v50 = vpop.f32.mrf.mxu2 }
 0x566   :  { %v3464_v37 = vadd.f32 %v3463_v50, %v6220_v2  ;;  %v3804_v35 = vpop.f32.mrf.mxu0 }
 0x567   :  { %v3805_v29 = vadd.f32 %v3804_v35, %v6212_v47 }
 0x568   :  { %v3632_v56 = vpop.f32.mrf.mxu3  ;;  %v3973_v28 = vpop.f32.mrf.mxu1 }
 0x569   :  { %v3633_v4 = vadd.f32 %v3632_v56, %v3464_v37  ;;  %v3974_v14 = vadd.f32 %v3973_v28, %v3805_v29 }
 0x56b   :  { %4104 = vst [vmem:[#allocation12 + $0x350] sm:$0xff] %v3633_v4 }
 0x56c   :  { %4107 = vst [vmem:[#allocation12 + $0x368] sm:$0xff] %v3974_v14 }
 0x56d   :  { %v3466_v13 = vpop.f32.mrf.mxu2 }
 0x56e   :  { %v3467_v57 = vadd.f32 %v3466_v13, %v6220_v2  ;;  %v3806_v59 = vpop.f32.mrf.mxu0 }
 0x56f   :  { %v3807_v33 = vadd.f32 %v3806_v59, %v6212_v47 }
 0x570   :  { %v3635_v8 = vpop.f32.mrf.mxu3  ;;  %v3975_v52 = vpop.f32.mrf.mxu1 }
 0x571   :  { %v3636_v46 = vadd.f32 %v3635_v8, %v3467_v57  ;;  %v3976_v53 = vadd.f32 %v3975_v52, %v3807_v33 }
 0x573   :  { %4106 = vst [vmem:[#allocation12 + $0x360] sm:$0xff] %v3636_v46 }
 0x574   :  { %4109 = vst [vmem:[#allocation12 + $0x378] sm:$0xff] %v3976_v53 }
 0x575   :  { %v3468_v62 = vpop.f32.mrf.mxu2 }
 0x576   :  { %v3469_v27 = vadd.f32 %v3468_v62, %v6220_v2  ;;  %v3809_v7 = vpop.f32.mrf.mxu0 }
 0x577   :  { %v3810_v6 = vadd.f32 %v3809_v7, %v6212_v47 }
 0x578   :  { %v3637_v20 = vpop.f32.mrf.mxu3  ;;  %v3978_v17 = vpop.f32.mrf.mxu1 }
 0x579   :  { %v3638_v49 = vadd.f32 %v3637_v20, %v3469_v27  ;;  %v3979_v60 = vadd.f32 %v3978_v17, %v3810_v6 }
 0x57b   :  { %4108 = vst [vmem:[#allocation12 + $0x370] sm:$0xff] %v3638_v49 }
 0x57c   :  { %4111 = vst [vmem:[#allocation12 + $0x388] sm:$0xff] %v3979_v60 }
 0x57d   :  { %v3471_v1 = vpop.f32.mrf.mxu2 }
 0x57e   :  { %v3472_v36 = vadd.f32 %v3471_v1, %v6220_v2  ;;  %v3811_v26 = vpop.f32.mrf.mxu0 }
 0x57f   :  { %v3812_v16 = vadd.f32 %v3811_v26, %v6212_v47 }
 0x580   :  { %v3640_v12 = vpop.f32.mrf.mxu3  ;;  %v3980_v45 = vpop.f32.mrf.mxu1 }
 0x581   :  { %v3641_v10 = vadd.f32 %v3640_v12, %v3472_v36  ;;  %v3981_v48 = vadd.f32 %v3980_v45, %v3812_v16 }
 0x583   :  { %4110 = vst [vmem:[#allocation12 + $0x380] sm:$0xff] %v3641_v10 }
 0x584   :  { %4113 = vst [vmem:[#allocation12 + $0x398] sm:$0xff] %v3981_v48 }
 0x585   :  { %v3473_v55 = vpop.f32.mrf.mxu2 }
 0x586   :  { %v3474_v9 = vadd.f32 %v3473_v55, %v6220_v2  ;;  %v3814_v61 = vpop.f32.mrf.mxu0 }
 0x587   :  { %v3815_v23 = vadd.f32 %v3814_v61, %v6212_v47 }
 0x588   :  { %v3642_v15 = vpop.f32.mrf.mxu3  ;;  %v3983_v30 = vpop.f32.mrf.mxu1 }
 0x589   :  { %v3643_v3 = vadd.f32 %v3642_v15, %v3474_v9  ;;  %v3984_v34 = vadd.f32 %v3983_v30, %v3815_v23 }
 0x58b   :  { %4112 = vst [vmem:[#allocation12 + $0x390] sm:$0xff] %v3643_v3 }
 0x58c   :  { %4115 = vst [vmem:[#allocation12 + $0x3a8] sm:$0xff] %v3984_v34 }
 0x58d   :  { %v3476_v39 = vpop.f32.mrf.mxu2 }
 0x58e   :  { %v3477_v21 = vadd.f32 %v3476_v39, %v6220_v2  ;;  %v3816_v41 = vpop.f32.mrf.mxu0 }
 0x58f   :  { %v3817_v51 = vadd.f32 %v3816_v41, %v6212_v47 }
 0x590   :  { %v3645_v5 = vpop.f32.mrf.mxu3  ;;  %v3985_v0 = vpop.f32.mrf.mxu1 }
 0x591   :  { %v3646_v31 = vadd.f32 %v3645_v5, %v3477_v21  ;;  %v3986_v58 = vadd.f32 %v3985_v0, %v3817_v51 }
 0x593   :  { %4114 = vst [vmem:[#allocation12 + $0x3a0] sm:$0xff] %v3646_v31 }
 0x594   :  { %4117 = vst [vmem:[#allocation12 + $0x3b8] sm:$0xff] %v3986_v58 }
 0x595   :  { %v3478_v40 = vpop.f32.mrf.mxu2 }
 0x596   :  { %v3479_v22 = vadd.f32 %v3478_v40, %v6220_v2  ;;  %v3819_v42 = vpop.f32.mrf.mxu0 }
 0x597   :  { %v3820_v25 = vadd.f32 %v3819_v42, %v6212_v47 }
 0x598   :  { %v3647_v32 = vpop.f32.mrf.mxu3  ;;  %v3988_v11 = vpop.f32.mrf.mxu1 }
 0x599   :  { %v3648_v24 = vadd.f32 %v3647_v32, %v3479_v22  ;;  %v3989_v54 = vadd.f32 %v3988_v11, %v3820_v25 }
 0x59b   :  { %4116 = vst [vmem:[#allocation12 + $0x3b0] sm:$0xff] %v3648_v24 }
 0x59c   :  { %4119 = vst [vmem:[#allocation12 + $0x3c8] sm:$0xff] %v3989_v54 }
 0x59d   :  { %v3481_v38 = vpop.f32.mrf.mxu2 }
 0x59e   :  { %v3482_v19 = vadd.f32 %v3481_v38, %v6220_v2  ;;  %v3821_v63 = vpop.f32.mrf.mxu0 }
 0x59f   :  { %v3822_v44 = vadd.f32 %v3821_v63, %v6212_v47 }
 0x5a0   :  { %v3650_v43 = vpop.f32.mrf.mxu3  ;;  %v3990_v50 = vpop.f32.mrf.mxu1 }
 0x5a1   :  { %v3651_v18 = vadd.f32 %v3650_v43, %v3482_v19  ;;  %v3991_v37 = vadd.f32 %v3990_v50, %v3822_v44 }
 0x5a3   :  { %4118 = vst [vmem:[#allocation12 + $0x3c0] sm:$0xff] %v3651_v18 }
 0x5a4   :  { %4121 = vst [vmem:[#allocation12 + $0x3d8] sm:$0xff] %v3991_v37 }
 0x5a5   :  { %v3483_v56 = vpop.f32.mrf.mxu2 }
 0x5a6   :  { %v3484_v35 = vadd.f32 %v3483_v56, %v6220_v2  ;;  %v3824_v29 = vpop.f32.mrf.mxu0 }
 0x5a7   :  { %v3825_v14 = vadd.f32 %v3824_v29, %v6212_v47 }
 0x5a8   :  { %v3652_v4 = vpop.f32.mrf.mxu3  ;;  %v3993_v13 = vpop.f32.mrf.mxu1 }
 0x5a9   :  { %v3653_v28 = vadd.f32 %v3652_v4, %v3484_v35  ;;  %v3994_v57 = vadd.f32 %v3993_v13, %v3825_v14 }
 0x5ab   :  { %4120 = vst [vmem:[#allocation12 + $0x3d0] sm:$0xff] %v3653_v28 }
 0x5ac   :  { %4123 = vst [vmem:[#allocation12 + $0x3e8] sm:$0xff] %v3994_v57 }
 0x5ad   :  { %v3486_v8 = vpop.f32.mrf.mxu2 }
 0x5ae   :  { %v3487_v59 = vadd.f32 %v3486_v8, %v6220_v2  ;;  %v3826_v33 = vpop.f32.mrf.mxu0 }
 0x5af   :  { %v3827_v53 = vadd.f32 %v3826_v33, %v6212_v47 }
 0x5b0   :  { %v3655_v46 = vpop.f32.mrf.mxu3  ;;  %v3995_v62 = vpop.f32.mrf.mxu1 }
 0x5b1   :  { %v3656_v52 = vadd.f32 %v3655_v46, %v3487_v59  ;;  %v3996_v27 = vadd.f32 %v3995_v62, %v3827_v53 }
 0x5b3   :  { %4122 = vst [vmem:[#allocation12 + $0x3e0] sm:$0xff] %v3656_v52 }
 0x5b4   :  { %4125 = vst [vmem:[#allocation12 + $0x3f8] sm:$0xff] %v3996_v27 }
 0x5b5   :  { %v3488_v20 = vpop.f32.mrf.mxu2 }
 0x5b6   :  { %v3489_v7 = vadd.f32 %v3488_v20, %v6220_v2 }
 0x5b8   :  { %v3657_v49 = vpop.f32.mrf.mxu3 }
 0x5b9   :  { %v3658_v6 = vadd.f32 %v3657_v49, %v3489_v7 }
 0x5bb   :  { %4124 = vst [vmem:[#allocation12 + $0x3f0] sm:$0xff] %v3658_v6 }
 0x5bc   :  { %4138 = dma.vmem_to_hbm [thread:$0]  %s4131_s5, 16384, %s4133_s1, [#allocation5], %s5060_s11, %s5060_s11, %s5061_s12  }
 0x5bd   :  { %5053 = dma.done.wait [#allocation5], 16384  }
 0x5be   :  { %5054 = vsyncadd [#allocation5], 4294950912 }
 0x5bf   :  { %4143 = vsyncpa [#allocation4], 1 }
 0x5c0   :  { %4144 = vsyncpa [#allocation7], 1 }
 0x5c1   :  { %4145 = vsyncpa [#allocation10], 1 }
 0x5c2   :  { %4146 = vsyncpa [#allocation5], 1 }

</bundles_post_ra>
